<compile_context>
chip_gen: v6e
topology: v6e:2x2x1
jax: 0.10.0
libtpu: 0.0.40
codegen_flags: <defaults>
</compile_context>

<pallas_src>
import jax
import jax.numpy as jnp
from jax.experimental import pallas as pl
from jax.experimental.pallas import tpu as pltpu

IN_FEATURES = 16000
H1 = 128
H2 = 64
N_LABELS = 35

BLOCK_B = 512      # batch tile for large batches (W1 re-streamed once per tile)
BLOCK_K = 3200     # K tile for large batches: multiple of 128, divides 16000
SMALL_BATCH = 128  # up to this batch size: one batch tile, one K step


def simplenet_kernel(x_ref, w1_ref, b1_ref, w2_ref, b2_ref, w3_ref, b3_ref,
                     o_ref, acc_ref):
    k = pl.program_id(1)

    # ---- init the f32 accumulator on the first K step ----
    @pl.when(k == 0)
    def _():
        acc_ref[...] = jnp.zeros_like(acc_ref)

    # ---- layer-1 partial matmul ----
    # x is read from HBM as f32 and cast to bf16 in vregs (free under the DMA);
    # W1 is streamed as bf16; accumulation in f32 on the MXU.
    x_bf16 = x_ref[...].astype(jnp.bfloat16)
    acc_ref[...] += jnp.dot(x_bf16, w1_ref[...],
                            preferred_element_type=jnp.float32)

    # ---- epilogue on the last K step: bias+ReLU, layers 2/3, log_softmax ----
    @pl.when(k == pl.num_programs(1) - 1)
    def _():
        h1 = jnp.maximum(acc_ref[...] + b1_ref[...], 0.0)            # ReLU
        h2 = jnp.dot(h1, w2_ref[...], preferred_element_type=jnp.float32)
        h2 = jnp.maximum(h2 + b2_ref[...], 0.0)                      # ReLU
        logits = jnp.dot(h2, w3_ref[...],
                         preferred_element_type=jnp.float32) + b3_ref[...]
        # numerically stable log_softmax over the class axis (dim=1)
        m = jnp.max(logits, axis=-1, keepdims=True)
        shifted = logits - m
        lse = jnp.log(jnp.sum(jnp.exp(shifted), axis=-1, keepdims=True))
        o_ref[...] = shifted - lse


def _round_up(n, m):
    return ((n + m - 1) // m) * m


def _choose_tiles(batch):
    """Pick (batch_tile, k_tile) keeping double-buffered VMEM under ~24 MiB."""
    if batch <= SMALL_BATCH:
        # Single batch tile, single K step: whole W1 DMA'd exactly once, no
        # per-K-step grid overhead.  Worst case (tb=128):
        #   2*(128*16000*4 + 16000*128*2) + 128*128*4  ~= 24 MiB.
        return _round_up(batch, 8), IN_FEATURES
    # Larger batches: 512-row batch tiles, 3200-wide K chunks so the x / W1
    # DMAs double-buffer under the MXU.  Footprint:
    #   2*(512*3200*4 + 3200*128*2) + 512*128*4  ~= 14.6 MiB.
    tb = min(BLOCK_B, _round_up(batch, 8))
    return tb, BLOCK_K


def simplenet_forward(x, w1, b1, w2, b2, w3, b3):
    B, K = x.shape
    assert K == IN_FEATURES

    # Dominant HBM stream: keep W1 in bf16 (no-op if already bf16).
    w1 = w1.astype(jnp.bfloat16)

    tb, tk = _choose_tiles(B)
    b_pad = _round_up(B, tb)
    if b_pad != B:
        # Pad ragged batches to the tile instead of tb=B (keeps tiles bounded
        # and VMEM-safe for large odd batches).
        x = jnp.pad(x, ((0, b_pad - B), (0, 0)))

    n_b_tiles = b_pad // tb
    grid = (n_b_tiles, K // tk)

    resident = lambda shape: pl.BlockSpec(shape, lambda b, k: (0, 0))

    flops = 2 * b_pad * (IN_FEATURES * H1 + H1 * H2 + H2 * N_LABELS)
    bytes_accessed = (
        b_pad * IN_FEATURES * x.dtype.itemsize       # x read once
        + n_b_tiles * IN_FEATURES * H1 * 2           # W1 streamed once per batch tile
        + (b1.size + w2.size + b2.size + w3.size + b3.size) * 4
        + b_pad * N_LABELS * 4                       # output
    )

    out = pl.pallas_call(
        simplenet_kernel,
        out_shape=jax.ShapeDtypeStruct((b_pad, N_LABELS), jnp.float32),
        grid_spec=pltpu.PrefetchScalarGridSpec(
            num_scalar_prefetch=0,
            grid=grid,
            in_specs=[
                # x: (tb, tk) f32 tiles, pipelined along K, cast in-kernel
                pl.BlockSpec((tb, tk), lambda b, k: (b, k)),
                # W1: (tk, 128) bf16 tiles; re-streamed once per batch tile
                pl.BlockSpec((tk, H1), lambda b, k: (k, 0)),
                # small, VMEM-resident parameters (DMA'd once, constant index)
                resident((1, H1)),
                resident((H1, H2)),
                resident((1, H2)),
                resident((H2, N_LABELS)),
                resident((1, N_LABELS)),
            ],
            # output resident across the K (reduction) axis, written once
            out_specs=pl.BlockSpec((tb, N_LABELS), lambda b, k: (b, 0)),
            scratch_shapes=[pltpu.VMEM((tb, H1), jnp.float32)],
        ),
        compiler_params=pltpu.CompilerParams(
            dimension_semantics=("parallel", "arbitrary"),
            vmem_limit_bytes=32 << 20,  # >= worst-case ~24 MiB footprint; legal on v5e/v6e/v7x
        ),
        cost_estimate=pl.CostEstimate(
            flops=flops,
            transcendentals=b_pad * (N_LABELS + 1),
            bytes_accessed=bytes_accessed,
        ),
    )(x, w1, b1, w2, b2, w3, b3)

    return out[:B] if b_pad != B else out


def init_params(key):
    """Deterministic PyTorch-Linear-style init: U(-1/sqrt(fan_in), 1/sqrt(fan_in))."""
    keys = jax.random.split(key, 6)

    def linear(kw, kb, fan_in, fan_out, w_dtype=jnp.float32):
        bound = 1.0 / jnp.sqrt(fan_in)
        # stored as (in, out) so the kernel does x @ W
        w = jax.random.uniform(kw, (fan_in, fan_out), jnp.float32,
                               -bound, bound).astype(w_dtype)
        b = jax.random.uniform(kb, (1, fan_out), jnp.float32, -bound, bound)
        return w, b

    # W1 is the HBM-bandwidth bottleneck -> store it in bf16
    w1, b1 = linear(keys[0], keys[1], IN_FEATURES, H1, w_dtype=jnp.bfloat16)
    w2, b2 = linear(keys[2], keys[3], H1, H2)
    w3, b3 = linear(keys[4], keys[5], H2, N_LABELS)
    return w1, b1, w2, b2, w3, b3


if __name__ == "__main__":
    key = jax.random.PRNGKey(0)
    k_x, k_p = jax.random.split(key)

    B = 2
    x = jax.random.normal(k_x, (B, IN_FEATURES), dtype=jnp.float32)
    w1, b1, w2, b2, w3, b3 = init_params(k_p)

    out = simplenet_forward(x, w1, b1, w2, b2, w3, b3)
    out = jax.block_until_ready(out)

    # sanity: log-probs over 35 classes should sum to ~1 after exp
    assert out.shape == (B, N_LABELS)
    assert jnp.allclose(jnp.sum(jnp.exp(out), axis=1), 1.0, atol=1e-4)

    print("KERNEL_OK")
</pallas_src>

<mosaic_0001>
module attributes {stable_mosaic.version = 11 : i64} {
  func.func @simplenet_kernel(%arg0: i32, %arg1: i32, %arg2: memref<8x16000xf32, #tpu.memory_space<vmem>>, %arg3: memref<16000x128xbf16, #tpu.memory_space<vmem>>, %arg4: memref<1x128xf32, #tpu.memory_space<vmem>>, %arg5: memref<128x64xf32, #tpu.memory_space<vmem>>, %arg6: memref<1x64xf32, #tpu.memory_space<vmem>>, %arg7: memref<64x35xf32, #tpu.memory_space<vmem>>, %arg8: memref<1x35xf32, #tpu.memory_space<vmem>>, %arg9: memref<8x35xf32, #tpu.memory_space<vmem>>, %arg10: memref<8x128xf32, #tpu.memory_space<vmem>>) attributes {dimension_semantics = [#tpu.dimension_semantics<parallel>, #tpu.dimension_semantics<arbitrary>], iteration_bounds = array<i64: 1, 1>, scalar_prefetch = 0 : i64, scratch_operands = 1 : i64, tpu.core_type = #tpu.core_type<tc>, window_params = [{transform_indices = @transform_0, window_bounds = array<i64: 8, 16000>}, {transform_indices = @transform_1, window_bounds = array<i64: 16000, 128>}, {pipeline_mode = #tpu.pipeline_mode<synchronous>, transform_indices = @transform_2, window_bounds = array<i64: 1, 128>}, {pipeline_mode = #tpu.pipeline_mode<synchronous>, transform_indices = @transform_3, window_bounds = array<i64: 128, 64>}, {pipeline_mode = #tpu.pipeline_mode<synchronous>, transform_indices = @transform_4, window_bounds = array<i64: 1, 64>}, {pipeline_mode = #tpu.pipeline_mode<synchronous>, transform_indices = @transform_5, window_bounds = array<i64: 64, 35>}, {pipeline_mode = #tpu.pipeline_mode<synchronous>, transform_indices = @transform_6, window_bounds = array<i64: 1, 35>}, {transform_indices = @transform_7, window_bounds = array<i64: 8, 35>}]} {
    %c0_i32 = arith.constant 0 : i32
    %0 = arith.cmpi eq, %arg1, %c0_i32 : i32
    %1 = arith.extui %0 : i1 to i32
    %c0_i32_0 = arith.constant 0 : i32
    %2 = arith.cmpi ne, %1, %c0_i32_0 : i32
    scf.if %2 {
      %cst_10 = arith.constant 0.000000e+00 : f32
      %13 = vector.broadcast %cst_10 : f32 to vector<8x128xf32>
      %c0_11 = arith.constant 0 : index
      %c0_12 = arith.constant 0 : index
      %14 = vector.load %arg10[%c0_11, %c0_12] : memref<8x128xf32, #tpu.memory_space<vmem>>, vector<8x128xf32>
      tpu.vector_store %arg10[%c0_11, %c0_12], %13 {strides = array<i32>} : memref<8x128xf32, #tpu.memory_space<vmem>>, vector<8x128xf32>,
    } else {
    }
    %c0 = arith.constant 0 : index
    %c0_1 = arith.constant 0 : index
    %3 = vector.load %arg2[%c0, %c0_1] : memref<8x16000xf32, #tpu.memory_space<vmem>>, vector<8x16000xf32>
    %4 = arith.truncf %3 : vector<8x16000xf32> to vector<8x16000xbf16>
    %c0_2 = arith.constant 0 : index
    %c0_3 = arith.constant 0 : index
    %5 = vector.load %arg10[%c0_2, %c0_3] : memref<8x128xf32, #tpu.memory_space<vmem>>, vector<8x128xf32>
    %c0_4 = arith.constant 0 : index
    %c0_5 = arith.constant 0 : index
    %6 = vector.load %arg3[%c0_4, %c0_5] : memref<16000x128xbf16, #tpu.memory_space<vmem>>, vector<16000x128xbf16>
    %cst = arith.constant dense<0.000000e+00> : vector<8x128xf32>
    %7 = tpu.matmul %4, %6, %cst {dimension_numbers = #tpu.dot_dimension_numbers<[1], [0], [0], [1], [0, 0, 1, 1], [], []>} : vector<8x16000xbf16>, vector<16000x128xbf16>, vector<8x128xf32> -> vector<8x128xf32>
    %8 = arith.addf %5, %7 : vector<8x128xf32>
    %c0_6 = arith.constant 0 : index
    %c0_7 = arith.constant 0 : index
    %9 = vector.load %arg10[%c0_6, %c0_7] : memref<8x128xf32, #tpu.memory_space<vmem>>, vector<8x128xf32>
    tpu.vector_store %arg10[%c0_6, %c0_7], %8 {strides = array<i32>} : memref<8x128xf32, #tpu.memory_space<vmem>>, vector<8x128xf32>,
    %c0_i32_8 = arith.constant 0 : i32
    %10 = arith.cmpi eq, %arg1, %c0_i32_8 : i32
    %11 = arith.extui %10 : i1 to i32
    %c0_i32_9 = arith.constant 0 : i32
    %12 = arith.cmpi ne, %11, %c0_i32_9 : i32
    scf.if %12 {
      %c0_10 = arith.constant 0 : index
      %c0_11 = arith.constant 0 : index
      %13 = vector.load %arg10[%c0_10, %c0_11] : memref<8x128xf32, #tpu.memory_space<vmem>>, vector<8x128xf32>
      %c0_12 = arith.constant 0 : index
      %c0_13 = arith.constant 0 : index
      %14 = vector.load %arg4[%c0_12, %c0_13] : memref<1x128xf32, #tpu.memory_space<vmem>>, vector<1x128xf32>
      %15 = vector.broadcast %14 : vector<1x128xf32> to vector<8x128xf32>
      %16 = arith.addf %13, %15 : vector<8x128xf32>
      %cst_14 = arith.constant 0.000000e+00 : f32
      %17 = vector.broadcast %cst_14 : f32 to vector<8x128xf32>
      %18 = arith.maximumf %16, %17 : vector<8x128xf32>
      %c0_15 = arith.constant 0 : index
      %c0_16 = arith.constant 0 : index
      %19 = vector.load %arg5[%c0_15, %c0_16] : memref<128x64xf32, #tpu.memory_space<vmem>>, vector<128x64xf32>
      %cst_17 = arith.constant dense<0.000000e+00> : vector<8x64xf32>
      %20 = tpu.matmul %18, %19, %cst_17 {dimension_numbers = #tpu.dot_dimension_numbers<[1], [0], [0], [1], [0, 0, 1, 1], [], []>} : vector<8x128xf32>, vector<128x64xf32>, vector<8x64xf32> -> vector<8x64xf32>
      %c0_18 = arith.constant 0 : index
      %c0_19 = arith.constant 0 : index
      %21 = vector.load %arg6[%c0_18, %c0_19] : memref<1x64xf32, #tpu.memory_space<vmem>>, vector<1x64xf32>
      %22 = vector.broadcast %21 : vector<1x64xf32> to vector<8x64xf32>
      %23 = arith.addf %20, %22 : vector<8x64xf32>
      %cst_20 = arith.constant 0.000000e+00 : f32
      %24 = vector.broadcast %cst_20 : f32 to vector<8x64xf32>
      %25 = arith.maximumf %23, %24 : vector<8x64xf32>
      %c0_21 = arith.constant 0 : index
      %c0_22 = arith.constant 0 : index
      %26 = vector.load %arg7[%c0_21, %c0_22] : memref<64x35xf32, #tpu.memory_space<vmem>>, vector<64x35xf32>
      %cst_23 = arith.constant dense<0.000000e+00> : vector<8x35xf32>
      %27 = tpu.matmul %25, %26, %cst_23 {dimension_numbers = #tpu.dot_dimension_numbers<[1], [0], [0], [1], [0, 0, 1, 1], [], []>} : vector<8x64xf32>, vector<64x35xf32>, vector<8x35xf32> -> vector<8x35xf32>
      %c0_24 = arith.constant 0 : index
      %c0_25 = arith.constant 0 : index
      %28 = vector.load %arg8[%c0_24, %c0_25] : memref<1x35xf32, #tpu.memory_space<vmem>>, vector<1x35xf32>
      %29 = vector.broadcast %28 : vector<1x35xf32> to vector<8x35xf32>
      %30 = arith.addf %27, %29 : vector<8x35xf32>
      %cst_26 = arith.constant dense<0xFF800000> : vector<8xf32>
      %31 = vector.multi_reduction <maximumf>, %30, %cst_26 [1] : vector<8x35xf32> to vector<8xf32>
      %32 = vector.shape_cast %31 : vector<8xf32> to vector<8x1xf32>
      %33 = vector.broadcast %32 : vector<8x1xf32> to vector<8x35xf32>
      %34 = arith.subf %30, %33 : vector<8x35xf32>
      %35 = math.exp %34 : vector<8x35xf32>
      %cst_27 = arith.constant dense<0.000000e+00> : vector<8xf32>
      %36 = vector.multi_reduction <add>, %35, %cst_27 [1] : vector<8x35xf32> to vector<8xf32>
      %37 = vector.shape_cast %36 : vector<8xf32> to vector<8x1xf32>
      %38 = math.log %37 : vector<8x1xf32>
      %39 = vector.broadcast %38 : vector<8x1xf32> to vector<8x35xf32>
      %40 = arith.subf %34, %39 : vector<8x35xf32>
      %c0_28 = arith.constant 0 : index
      %c0_29 = arith.constant 0 : index
      %41 = vector.load %arg9[%c0_28, %c0_29] : memref<8x35xf32, #tpu.memory_space<vmem>>, vector<8x35xf32>
      tpu.vector_store %arg9[%c0_28, %c0_29], %40 {strides = array<i32>} : memref<8x35xf32, #tpu.memory_space<vmem>>, vector<8x35xf32>,
    } else {
    }
    return
  }
  func.func @transform_0(%arg0: i32, %arg1: i32) -> (i32, i32) {
    %c0_i32 = arith.constant 0 : i32
    return %arg0, %arg1 : i32, i32
  }
  func.func @transform_1(%arg0: i32, %arg1: i32) -> (i32, i32) {
    %c0_i32 = arith.constant 0 : i32
    %c0_i32_0 = arith.constant 0 : i32
    return %arg1, %c0_i32 : i32, i32
  }
  func.func @transform_2(%arg0: i32, %arg1: i32) -> (i32, i32) {
    %c0_i32 = arith.constant 0 : i32
    %c0_i32_0 = arith.constant 0 : i32
    %c0_i32_1 = arith.constant 0 : i32
    return %c0_i32, %c0_i32_0 : i32, i32
  }
  func.func @transform_3(%arg0: i32, %arg1: i32) -> (i32, i32) {
    %c0_i32 = arith.constant 0 : i32
    %c0_i32_0 = arith.constant 0 : i32
    %c0_i32_1 = arith.constant 0 : i32
    return %c0_i32, %c0_i32_0 : i32, i32
  }
  func.func @transform_4(%arg0: i32, %arg1: i32) -> (i32, i32) {
    %c0_i32 = arith.constant 0 : i32
    %c0_i32_0 = arith.constant 0 : i32
    %c0_i32_1 = arith.constant 0 : i32
    return %c0_i32, %c0_i32_0 : i32, i32
  }
  func.func @transform_5(%arg0: i32, %arg1: i32) -> (i32, i32) {
    %c0_i32 = arith.constant 0 : i32
    %c0_i32_0 = arith.constant 0 : i32
    %c0_i32_1 = arith.constant 0 : i32
    return %c0_i32, %c0_i32_0 : i32, i32
  }
  func.func @transform_6(%arg0: i32, %arg1: i32) -> (i32, i32) {
    %c0_i32 = arith.constant 0 : i32
    %c0_i32_0 = arith.constant 0 : i32
    %c0_i32_1 = arith.constant 0 : i32
    return %c0_i32, %c0_i32_0 : i32, i32
  }
  func.func @transform_7(%arg0: i32, %arg1: i32) -> (i32, i32) {
    %c0_i32 = arith.constant 0 : i32
    %c0_i32_0 = arith.constant 0 : i32
    return %arg0, %c0_i32 : i32, i32
  }
}

</mosaic_0001>

<bundles_post_ra>
// kernel: tpu_custom_call.1
= control target key start
LH: loop header
LB: loop body
LE: loop exit
PB: predicated region body
PF: predicated region fallthrough
CT: control target
= control target key end

     0   :  { %12 = vsyncpa [#allocation4], 0  ;;  %s14965_s0 = inlined_call_operand.hbm [shape: f32[8,16000], index: 0, kind: input, shape index: {}]   ;;  %s14966_s1 = inlined_call_operand.hbm [shape: bf16[16000,128], index: 1, kind: input, shape index: {}]   ;;  %s14967_s2 = inlined_call_operand.hbm [shape: f32[1,128], index: 2, kind: input, shape index: {}]   ;;  %s14968_s3 = inlined_call_operand.vmem [shape: f32[128,64], index: 3, kind: input, shape index: {}]   ;;  %s14969_s4 = inlined_call_operand.hbm [shape: f32[1,64], index: 4, kind: input, shape index: {}]   ;;  %s14970_s5 = inlined_call_operand.vmem [shape: f32[64,35], index: 5, kind: input, shape index: {}]   ;;  %s14971_s6 = inlined_call_operand.hbm [shape: f32[1,35], index: 6, kind: input, shape index: {}]   ;;  %s14972_s7 = inlined_call_operand.hbm [shape: f32[8,35], index: 7, kind: output, shape index: {}]  }
   0x1   :  { %13 = vsyncpa [#allocation7], 0 }
   0x2   :  { %14 = vsyncpa [#allocation10], 0 }
   0x3   :  { %15 = vsyncpa [#allocation5], 0  ;;  %s14712_s24 = smov [#allocation6]  }
   0x4   :  { %s31_s25 = sshll.u32 %s14712_s24, 4  ;;  %s32_s25 = int_to_ptr.vmem [resolvable:$true] %s31_s25 }
   0x5   :  { %s14592_s26 = scalar_lea.vmem %s32_s25, 128000  ;;  %p14597_p1 = scmp.lt.s32.totalorder %s32_s25, %s32_s25 }
   0x6   :  { %p14593_p0 = scmp.ne.s32.totalorder %s32_s25, %s14592_s26  ;;  %p14598_p2 = scmp.lt.s32.totalorder %s14592_s26, %s14592_s26 }
   0x8   :  { %p14599_p3 = por %p14598_p2, %p14597_p1 }
   0xa   :  { %p14600_p4 = pnand %p14599_p3, %p14593_p0 }
   0xc   :  { %14603 = shalt.err (!%p14600_p4)
}
   0xd   :  { %s14713_s27 = smov 64   ;;  %s14714_s28 = smov 4  }
   0xe   :  { %37 = dma.hbm_to_vmem [thread:$0]  %s14966_s1, 128000, %s32_s25, [#allocation7], %s14713_s27, %s14713_s27, %s14714_s28  }
   0xf   :  { %s14715_s8 = smov [#allocation9]   ;;  %s14716_s10 = smov [#allocation3]  }
  0x10   :  { %s56_s9 = sshll.u32 %s14715_s8, 4  ;;  %s22_s11 = sshll.u32 %s14716_s10, 4  ;;  %s57_s9 = int_to_ptr.vmem [resolvable:$true] %s56_s9  ;;  %s23_s11 = int_to_ptr.vmem [resolvable:$true] %s22_s11 }
  0x11   :  { %s14612_s12 = scalar_lea.vmem %s57_s9, 16  ;;  %s14616_s13 = scalar_lea.vmem %s57_s9, 32 }
  0x12   :  { %p14613_p5 = scmp.ne.s32.totalorder %s57_s9, %s14612_s12  ;;  %p14617_p6 = scmp.lt.s32.totalorder %s57_s9, %s57_s9 }
  0x13   :  { %p14618_p7 = scmp.lt.s32.totalorder %s14616_s13, %s14612_s12 }
  0x15   :  { %p14619_p8 = por %p14618_p7, %p14617_p6 }
  0x17   :  { %p14620_p9 = pnand %p14619_p8, %p14613_p5 }
  0x19   :  { %14623 = shalt.err (!%p14620_p9)
}
  0x1a   :  { %59 = dma.hbm_to_vmem [thread:$0]  %s14969_s4, 16, %s57_s9, [#allocation10]  }
  0x1b   :  { %s14632_s16 = scalar_lea.vmem %s23_s11, 16000  ;;  %p14637_p11 = scmp.lt.s32.totalorder %s23_s11, %s23_s11 }
  0x1c   :  { %p14633_p10 = scmp.ne.s32.totalorder %s23_s11, %s14632_s16  ;;  %p14638_p12 = scmp.lt.s32.totalorder %s14632_s16, %s14632_s16 }
  0x1e   :  { %p14639_p13 = por %p14638_p12, %p14637_p11 }
  0x20   :  { %p14640_p0 = pnand %p14639_p13, %p14633_p10 }
  0x22   :  { %14643 = shalt.err (!%p14640_p0)
}
  0x23   :  { %25 = dma.hbm_to_vmem [thread:$0]  %s14965_s0, 16000, %s23_s11, [#allocation4]  }
  0x24   :  { %s14717_s18 = smov [#allocation8]   ;;  %s14718_s20 = smov [#allocation11]  }
  0x25   :  { %s44_s19 = sshll.u32 %s14717_s18, 4  ;;  %s68_s21 = sshll.u32 %s14718_s20, 4  ;;  %s45_s19 = int_to_ptr.vmem [resolvable:$true] %s44_s19  ;;  %s69_s21 = int_to_ptr.vmem [resolvable:$true] %s68_s21 }
  0x26   :  { %s14652_s22 = scalar_lea.vmem %s45_s19, 16  ;;  %s14656_s4 = scalar_lea.vmem %s45_s19, 32 }
  0x27   :  { %p14653_p1 = scmp.ne.s32.totalorder %s45_s19, %s14652_s22  ;;  %p14657_p2 = scmp.lt.s32.totalorder %s45_s19, %s45_s19 }
  0x28   :  { %p14658_p3 = scmp.lt.s32.totalorder %s14656_s4, %s14652_s22 }
  0x2a   :  { %p14659_p4 = por %p14658_p3, %p14657_p2 }
  0x2c   :  { %p14660_p5 = pnand %p14659_p4, %p14653_p1 }
  0x2e   :  { %14663 = shalt.err (!%p14660_p5)
}
  0x2f   :  { %47 = dma.hbm_to_vmem [thread:$0]  %s14967_s2, 16, %s45_s19, [#allocation7]  }
  0x30   :  { %s14672_s25 = scalar_lea.vmem %s69_s21, 16  ;;  %s14676_s0 = scalar_lea.vmem %s69_s21, 32 }
  0x31   :  { %p14673_p6 = scmp.ne.s32.totalorder %s69_s21, %s14672_s25  ;;  %p14677_p7 = scmp.lt.s32.totalorder %s69_s21, %s69_s21 }
  0x32   :  { %p14678_p8 = scmp.lt.s32.totalorder %s14676_s0, %s14672_s25 }
  0x34   :  { %p14679_p9 = por %p14678_p8, %p14677_p7 }
  0x36   :  { %p14680_p10 = pnand %p14679_p9, %p14673_p6 }
  0x38   :  { %14683 = shalt.err (!%p14680_p10)
}
  0x39   :  { %71 = dma.hbm_to_vmem [thread:$0]  %s14971_s6, 16, %s69_s21, [#allocation10]  }
  0x3a   :  { %14704 = dma.done.wait [#allocation4], 16000  }
  0x3b   :  { %14705 = vsyncadd [#allocation4], 4294951296 }
  0x3c   :  { %14706 = dma.done.wait [#allocation7], 128016  }
  0x3d   :  { %14707 = vsyncadd [#allocation7], 4294839280 }
  0x3e   :  { %14708 = dma.done.wait [#allocation10], 32  }
  0x3f   :  { %14709 = vsyncadd [#allocation10], 4294967264  ;;  %v13580_v0 = vld [vmem:[#allocation6 + $0x78] sm:$0xff]   ;;  %v13584_v4 = vld [vmem:[#allocation6 + $0x70] sm:$0xff]   ;;  %vm14720_vm0 = vmmov 0   ;;  %vm10988_vm1 = vcmask 523264  }
  0x40   :  { %v13581_v1 = vld [vmem:[#allocation6 + $0xf8] sm:$0xff]   ;;  %12097 = vmatprep.subr.bf16.mxu0 %v13580_v0  ;;  %v13585_v5 = vld [vmem:[#allocation6 + $0xf0] sm:$0xff]   ;;  %v13588_v8 = vld [vmem:[#allocation6 + $0x68] sm:$0xff]   ;;  %vm11062_vm2 = vcmask 285696  }
  0x41   :  { %v13582_v2 = vld [vmem:[#allocation6 + $0x38] sm:$0xff]   ;;  %12119 = vmatprep.subr.bf16.mxu1 %v13581_v1  ;;  %v13586_v6 = vld [vmem:[#allocation6 + $0x30] sm:$0xff]   ;;  %v13589_v9 = vld [vmem:[#allocation6 + $0xe8] sm:$0xff]  }
  0x42   :  { %v13583_v3 = vld [vmem:[#allocation6 + $0xb8] sm:$0xff]   ;;  %12098 = vmatpush3.bf16.msra.mxu0 %v13582_v2  ;;  %v13587_v7 = vld [vmem:[#allocation6 + $0xb0] sm:$0xff]   ;;  %v13590_v10 = vld [vmem:[#allocation6 + $0x28] sm:$0xff]  }
  0x43   :  { %12120 = vmatpush3.bf16.msra.mxu1 %v13583_v3  ;;  %12099 = vmatprep.subr.bf16.mxu0 %v13584_v4  ;;  %v13591_v11 = vld [vmem:[#allocation6 + $0xa8] sm:$0xff]   ;;  %v13592_v12 = vld [vmem:[#allocation6 + $0x60] sm:$0xff]   ;;  %v13596_v16 = vld [vmem:[#allocation6 + $0x58] sm:$0xff]  }
  0x44   :  { %12121 = vmatprep.subr.bf16.mxu1 %v13585_v5  ;;  %v13593_v13 = vld [vmem:[#allocation6 + $0xe0] sm:$0xff]   ;;  %v13597_v17 = vld [vmem:[#allocation6 + $0xd8] sm:$0xff]   ;;  %v13600_v20 = vld [vmem:[#allocation6 + $0x50] sm:$0xff]  }
  0x45   :  { %v13594_v14 = vld [vmem:[#allocation6 + $0x20] sm:$0xff]   ;;  %v13598_v18 = vld [vmem:[#allocation6 + $0x18] sm:$0xff]   ;;  %v13601_v21 = vld [vmem:[#allocation6 + $0xd0] sm:$0xff]  }
  0x46   :  { %12100 = vmatpush3.bf16.msra.mxu0 %v13586_v6  ;;  %v13595_v15 = vld [vmem:[#allocation6 + $0xa0] sm:$0xff]   ;;  %v13599_v19 = vld [vmem:[#allocation6 + $0x98] sm:$0xff]   ;;  %v13602_v22 = vld [vmem:[#allocation6 + $0x10] sm:$0xff]  }
  0x47   :  { %12122 = vmatpush3.bf16.msra.mxu1 %v13587_v7  ;;  %12101 = vmatprep.subr.bf16.mxu0 %v13588_v8  ;;  %v13603_v23 = vld [vmem:[#allocation6 + $0x90] sm:$0xff]   ;;  %v13604_v24 = vld [vmem:[#allocation6 + $0x48] sm:$0xff]   ;;  %v13608_v28 = vld [vmem:[#allocation6 + $0x40] sm:$0xff]  }
  0x48   :  { %12123 = vmatprep.subr.bf16.mxu1 %v13589_v9  ;;  %v13605_v25 = vld [vmem:[#allocation6 + $0xc8] sm:$0xff]   ;;  %v13609_v29 = vld [vmem:[#allocation6 + $0xc0] sm:$0xff]   ;;  %v96_v33 = vld [vmem:[#allocation3 + $0x18] sm:$0xff] }
  0x49   :  { %v13606_v26 = vld [vmem:[#allocation6 + $0x8] sm:$0xff]   ;;  %v13610_v30 = vld [vmem:[#allocation6] sm:$0xff]   ;;  %v93_v34 = vld [vmem:[#allocation3] sm:$0xff]  ;;  %v221_v36 = vpack.c.bf16 %v96_v33, %v96_v33 }
  0x4a   :  { %12102 = vmatpush3.bf16.msra.mxu0 %v13590_v10  ;;  %v13607_v27 = vld [vmem:[#allocation6 + $0x88] sm:$0xff]   ;;  %v13611_v31 = vld [vmem:[#allocation6 + $0x80] sm:$0xff]   ;;  %v218_v37 = vpack.c.bf16 %v93_v34, %v93_v34  ;;  %v13612_v40 = vld [vmem:[#allocation6 + $0x178] sm:$0xff]  }
  0x4b   :  { %12124 = vmatpush3.bf16.msra.mxu1 %v13591_v11  ;;  %12103 = vmatprep.subr.bf16.mxu0 %v13592_v12  ;;  %v94_v32 = vld [vmem:[#allocation3 + $0x8] sm:$0xff]  ;;  %v95_v38 = vld [vmem:[#allocation3 + $0x10] sm:$0xff]  ;;  %v13613_v41 = vld [vmem:[#allocation6 + $0x138] sm:$0xff]  }
  0x4c   :  { %12125 = vmatprep.subr.bf16.mxu1 %v13593_v13  ;;  %v219_v35 = vpack.c.bf16 %v94_v32, %v94_v32  ;;  %v220_v39 = vpack.c.bf16 %v95_v38, %v95_v38  ;;  %8416 = vmatprep.mubr.bf16.mxu1 %v221_v36  ;;  %v13614_v42 = vld [vmem:[#allocation6 + $0x1f8] sm:$0xff]   ;;  %v13616_v44 = vld [vmem:[#allocation6 + $0x170] sm:$0xff]   ;;  %v13620_v48 = vld [vmem:[#allocation6 + $0x168] sm:$0xff]  }
  0x4d   :  { %v13615_v43 = vld [vmem:[#allocation6 + $0x1b8] sm:$0xff]   ;;  %v13617_v45 = vld [vmem:[#allocation6 + $0x130] sm:$0xff]   ;;  %v13621_v49 = vld [vmem:[#allocation6 + $0x128] sm:$0xff]  }
  0x4e   :  { %12104 = vmatpush3.bf16.msra.mxu0 %v13594_v14  ;;  %8376 = vmatprep.mubr.bf16.mxu0 %v219_v35  ;;  %v13618_v46 = vld [vmem:[#allocation6 + $0x1f0] sm:$0xff]   ;;  %v13622_v50 = vld [vmem:[#allocation6 + $0x1e8] sm:$0xff]   ;;  %v13624_v52 = vld [vmem:[#allocation6 + $0x160] sm:$0xff]  }
  0x4f   :  { %12126 = vmatpush3.bf16.msra.mxu1 %v13595_v15  ;;  %12105 = vmatprep.subr.bf16.mxu0 %v13596_v16  ;;  %v13619_v47 = vld [vmem:[#allocation6 + $0x1b0] sm:$0xff]   ;;  %v13623_v51 = vld [vmem:[#allocation6 + $0x1a8] sm:$0xff]   ;;  %v13625_v53 = vld [vmem:[#allocation6 + $0x120] sm:$0xff]  }
  0x50   :  { %12127 = vmatprep.subr.bf16.mxu1 %v13597_v17  ;;  %v13626_v54 = vld [vmem:[#allocation6 + $0x1e0] sm:$0xff]   ;;  %v13628_v56 = vld [vmem:[#allocation6 + $0x158] sm:$0xff]   ;;  %v13632_v60 = vld [vmem:[#allocation6 + $0x150] sm:$0xff]  }
  0x51   :  { %v13627_v55 = vld [vmem:[#allocation6 + $0x1a0] sm:$0xff]   ;;  %v13629_v57 = vld [vmem:[#allocation6 + $0x118] sm:$0xff]   ;;  %v13633_v61 = vld [vmem:[#allocation6 + $0x110] sm:$0xff]  }
  0x52   :  { %12106 = vmatpush3.bf16.msra.mxu0 %v13598_v18  ;;  %v13630_v58 = vld [vmem:[#allocation6 + $0x1d8] sm:$0xff]   ;;  %v13634_v62 = vld [vmem:[#allocation6 + $0x1d0] sm:$0xff]   ;;  %v13636_v0 = vld [vmem:[#allocation6 + $0x148] sm:$0xff]  }
  0x53   :  { %12128 = vmatpush3.bf16.msra.mxu1 %v13599_v19  ;;  %12107 = vmatprep.subr.bf16.mxu0 %v13600_v20  ;;  %v13631_v59 = vld [vmem:[#allocation6 + $0x198] sm:$0xff]   ;;  %v13635_v63 = vld [vmem:[#allocation6 + $0x190] sm:$0xff]   ;;  %v13637_v1 = vld [vmem:[#allocation6 + $0x108] sm:$0xff]  }
  0x54   :  { %12129 = vmatprep.subr.bf16.mxu1 %v13601_v21  ;;  %v13638_v2 = vld [vmem:[#allocation6 + $0x1c8] sm:$0xff]   ;;  %v13640_v4 = vld [vmem:[#allocation6 + $0x140] sm:$0xff]   ;;  %v97_v10 = vld [vmem:[#allocation3 + $0x20] sm:$0xff] }
  0x55   :  { %v13639_v3 = vld [vmem:[#allocation6 + $0x188] sm:$0xff]   ;;  %v13641_v5 = vld [vmem:[#allocation6 + $0x100] sm:$0xff]   ;;  %v222_v11 = vpack.c.bf16 %v97_v10, %v97_v10  ;;  %v13644_v12 = vld [vmem:[#allocation6 + $0x278] sm:$0xff]  }
  0x56   :  { %12108 = vmatpush3.bf16.msra.mxu0 %v13602_v22  ;;  %v13642_v6 = vld [vmem:[#allocation6 + $0x1c0] sm:$0xff]   ;;  %v100_v13 = vld [vmem:[#allocation3 + $0x38] sm:$0xff]  ;;  %v13645_v15 = vld [vmem:[#allocation6 + $0x238] sm:$0xff]  }
  0x57   :  { %12130 = vmatpush3.bf16.msra.mxu1 %v13603_v23  ;;  %12109 = vmatprep.subr.bf16.mxu0 %v13604_v24  ;;  %v98_v7 = vld [vmem:[#allocation3 + $0x28] sm:$0xff]  ;;  %v225_v14 = vpack.c.bf16 %v100_v13, %v100_v13  ;;  %v99_v16 = vld [vmem:[#allocation3 + $0x30] sm:$0xff]  ;;  %v13646_v18 = vld [vmem:[#allocation6 + $0x2f8] sm:$0xff]  }
  0x58   :  { %12131 = vmatprep.subr.bf16.mxu1 %v13605_v25  ;;  %v223_v8 = vpack.c.bf16 %v98_v7, %v98_v7  ;;  %v13643_v9 = vld [vmem:[#allocation6 + $0x180] sm:$0xff]   ;;  %v224_v17 = vpack.c.bf16 %v99_v16, %v99_v16  ;;  %v13647_v19 = vld [vmem:[#allocation6 + $0x2b8] sm:$0xff]   ;;  %v13648_v20 = vld [vmem:[#allocation6 + $0x270] sm:$0xff]  }
  0x59   :  { %v13649_v21 = vld [vmem:[#allocation6 + $0x230] sm:$0xff]   ;;  %v13652_v24 = vld [vmem:[#allocation6 + $0x268] sm:$0xff]   ;;  %v13660_v32 = vld [vmem:[#allocation6 + $0x258] sm:$0xff]  }
  0x5a   :  { %12110 = vmatpush3.bf16.msra.mxu0 %v13606_v26  ;;  %v13650_v22 = vld [vmem:[#allocation6 + $0x2f0] sm:$0xff]   ;;  %v13653_v25 = vld [vmem:[#allocation6 + $0x228] sm:$0xff]   ;;  %v13661_v33 = vld [vmem:[#allocation6 + $0x218] sm:$0xff]  }
  0x5b   :  { %12132 = vmatpush3.bf16.msra.mxu1 %v13607_v27  ;;  %12111 = vmatprep.subr.bf16.mxu0 %v13608_v28  ;;  %v13651_v23 = vld [vmem:[#allocation6 + $0x2b0] sm:$0xff]   ;;  %v13654_v26 = vld [vmem:[#allocation6 + $0x2e8] sm:$0xff]   ;;  %v13656_v28 = vld [vmem:[#allocation6 + $0x260] sm:$0xff]  }
  0x5c   :  { %12133 = vmatprep.subr.bf16.mxu1 %v13609_v29  ;;  %v13655_v27 = vld [vmem:[#allocation6 + $0x2a8] sm:$0xff]   ;;  %v13657_v29 = vld [vmem:[#allocation6 + $0x220] sm:$0xff]   ;;  %v13662_v34 = vld [vmem:[#allocation6 + $0x2d8] sm:$0xff]  }
  0x5d   :  { %v13663_v35 = vld [vmem:[#allocation6 + $0x298] sm:$0xff]   ;;  %v13664_v36 = vld [vmem:[#allocation6 + $0x250] sm:$0xff]   ;;  %v13691_v7 = vld [vmem:[#allocation6 + $0x3a0] sm:$0xff]  }
  0x5e   :  { %12112 = vmatpush3.bf16.msra.mxu0 %v13610_v30  ;;  %v13658_v30 = vld [vmem:[#allocation6 + $0x2e0] sm:$0xff]   ;;  %v13666_v38 = vld [vmem:[#allocation6 + $0x2d0] sm:$0xff]   ;;  %v13694_v10 = vld [vmem:[#allocation6 + $0x3d8] sm:$0xff]  }
  0x5f   :  { %12134 = vmatpush3.bf16.msra.mxu1 %v13611_v31  ;;  %12141 = vmatprep.subr.bf16.mxu0 %v13612_v40  ;;  %v13659_v31 = vld [vmem:[#allocation6 + $0x2a0] sm:$0xff]   ;;  %v13668_v40 = vld [vmem:[#allocation6 + $0x248] sm:$0xff]   ;;  %v13697_v13 = vld [vmem:[#allocation6 + $0x310] sm:$0xff]  }
  0x60   :  { %12163 = vmatprep.subr.bf16.mxu1 %v13614_v42  ;;  %v13670_v42 = vld [vmem:[#allocation6 + $0x2c8] sm:$0xff]  }
  0x61   :  { %8377 = vmatmul.mubr.bf16.vlgmr.msra.gmra.mxu0 %v218_v37  ;;  %v13665_v37 = vld [vmem:[#allocation6 + $0x210] sm:$0xff]   ;;  %v13700_v16 = vld [vmem:[#allocation6 + $0x348] sm:$0xff]  }
  0x62   :  { %8417 = vmatmul.mubr.bf16.vlgmr.msra.gmra.mxu1 %v220_v39  ;;  %12142 = vmatpush3.bf16.msra.mxu0 %v13613_v41  ;;  %v13667_v39 = vld [vmem:[#allocation6 + $0x290] sm:$0xff]   ;;  %v13669_v41 = vld [vmem:[#allocation6 + $0x208] sm:$0xff]  }
  0x63   :  { %12164 = vmatpush3.bf16.msra.mxu1 %v13615_v43  ;;  %12143 = vmatprep.subr.bf16.mxu0 %v13616_v44  ;;  %v13671_v43 = vld [vmem:[#allocation6 + $0x288] sm:$0xff]   ;;  %v13672_v44 = vld [vmem:[#allocation6 + $0x240] sm:$0xff]  }
  0x64   :  { %12165 = vmatprep.subr.bf16.mxu1 %v13618_v46  ;;  %8456 = vmatprep.mubr.bf16.mxu0 %v223_v8  ;;  %v13674_v46 = vld [vmem:[#allocation6 + $0x2c0] sm:$0xff]   ;;  %v13692_v8 = vld [vmem:[#allocation6 + $0x358] sm:$0xff]  }
  0x65   :  { %8496 = vmatprep.mubr.bf16.mxu1 %v225_v14  ;;  %v13698_v14 = vld [vmem:[#allocation6 + $0x3d0] sm:$0xff]  }
  0x66   :  { %12144 = vmatpush3.bf16.msra.mxu0 %v13617_v45  ;;  %v13673_v45 = vld [vmem:[#allocation6 + $0x200] sm:$0xff]  }
  0x67   :  { %12166 = vmatpush3.bf16.msra.mxu1 %v13619_v47  ;;  %12145 = vmatprep.subr.bf16.mxu0 %v13620_v48  ;;  %v102_v47 = vld [vmem:[#allocation3 + $0x48] sm:$0xff] }
  0x68   :  { %12167 = vmatprep.subr.bf16.mxu1 %v13622_v50  ;;  %v227_v48 = vpack.c.bf16 %v102_v47, %v102_v47  ;;  %v101_v50 = vld [vmem:[#allocation3 + $0x40] sm:$0xff]  ;;  %v13723_v47 = vld [vmem:[#allocation6 + $0x4a0] sm:$0xff]  }
  0x6a   :  { %12146 = vmatpush3.bf16.msra.mxu0 %v13621_v49  ;;  %v13675_v49 = vld [vmem:[#allocation6 + $0x280] sm:$0xff]  }
  0x6b   :  { %12168 = vmatpush3.bf16.msra.mxu1 %v13623_v51  ;;  %12147 = vmatprep.subr.bf16.mxu0 %v13624_v52  ;;  %v226_v51 = vpack.c.bf16 %v101_v50, %v101_v50  ;;  %v13676_v52 = vld [vmem:[#allocation6 + $0x378] sm:$0xff]  }
  0x6c   :  { %12169 = vmatprep.subr.bf16.mxu1 %v13626_v54  ;;  %v13726_v50 = vld [vmem:[#allocation6 + $0x4d8] sm:$0xff]  }
  0x6e   :  { %12148 = vmatpush3.bf16.msra.mxu0 %v13625_v53  ;;  %v104_v53 = vld [vmem:[#allocation3 + $0x58] sm:$0xff] }
  0x6f   :  { %12170 = vmatpush3.bf16.msra.mxu1 %v13627_v55  ;;  %12149 = vmatprep.subr.bf16.mxu0 %v13628_v56  ;;  %v229_v54 = vpack.c.bf16 %v104_v53, %v104_v53  ;;  %v13677_v55 = vld [vmem:[#allocation6 + $0x338] sm:$0xff]   ;;  %v103_v56 = vld [vmem:[#allocation3 + $0x50] sm:$0xff]  ;;  %v13729_v53 = vld [vmem:[#allocation6 + $0x410] sm:$0xff]  }
  0x70   :  { %12171 = vmatprep.subr.bf16.mxu1 %v13630_v58  ;;  %v13678_v58 = vld [vmem:[#allocation6 + $0x3f8] sm:$0xff]  }
  0x72   :  { %12150 = vmatpush3.bf16.msra.mxu0 %v13629_v57  ;;  %v228_v57 = vpack.c.bf16 %v103_v56, %v103_v56  ;;  %v13732_v56 = vld [vmem:[#allocation6 + $0x448] sm:$0xff]  }
  0x73   :  { %12172 = vmatpush3.bf16.msra.mxu1 %v13631_v59  ;;  %12151 = vmatprep.subr.bf16.mxu0 %v13632_v60  ;;  %v13679_v59 = vld [vmem:[#allocation6 + $0x3b8] sm:$0xff]   ;;  %v13680_v60 = vld [vmem:[#allocation6 + $0x370] sm:$0xff]  }
  0x74   :  { %12173 = vmatprep.subr.bf16.mxu1 %v13634_v62  ;;  %v13682_v62 = vld [vmem:[#allocation6 + $0x3f0] sm:$0xff]  }
  0x76   :  { %12152 = vmatpush3.bf16.msra.mxu0 %v13633_v61  ;;  %v13681_v61 = vld [vmem:[#allocation6 + $0x330] sm:$0xff]  }
  0x77   :  { %12174 = vmatpush3.bf16.msra.mxu1 %v13635_v63  ;;  %12153 = vmatprep.subr.bf16.mxu0 %v13636_v0  ;;  %v13683_v63 = vld [vmem:[#allocation6 + $0x3b0] sm:$0xff]   ;;  %v13684_v0 = vld [vmem:[#allocation6 + $0x368] sm:$0xff]  }
  0x78   :  { %12175 = vmatprep.subr.bf16.mxu1 %v13638_v2  ;;  %v13686_v2 = vld [vmem:[#allocation6 + $0x3e8] sm:$0xff]  }
  0x7a   :  { %12154 = vmatpush3.bf16.msra.mxu0 %v13637_v1  ;;  %v13685_v1 = vld [vmem:[#allocation6 + $0x328] sm:$0xff]  }
  0x7b   :  { %12176 = vmatpush3.bf16.msra.mxu1 %v13639_v3  ;;  %12155 = vmatprep.subr.bf16.mxu0 %v13640_v4  ;;  %v13687_v3 = vld [vmem:[#allocation6 + $0x3a8] sm:$0xff]   ;;  %v13688_v4 = vld [vmem:[#allocation6 + $0x360] sm:$0xff]  }
  0x7c   :  { %12177 = vmatprep.subr.bf16.mxu1 %v13642_v6  ;;  %v13690_v6 = vld [vmem:[#allocation6 + $0x3e0] sm:$0xff]  }
  0x7e   :  { %12156 = vmatpush3.bf16.msra.mxu0 %v13641_v5  ;;  %v13689_v5 = vld [vmem:[#allocation6 + $0x320] sm:$0xff]  }
  0x7f   :  { %12178 = vmatpush3.bf16.msra.mxu1 %v13643_v9  ;;  %12185 = vmatprep.subr.bf16.mxu0 %v13644_v12  ;;  %v13693_v9 = vld [vmem:[#allocation6 + $0x318] sm:$0xff]   ;;  %v13696_v12 = vld [vmem:[#allocation6 + $0x350] sm:$0xff]  }
  0x80   :  { %12207 = vmatprep.subr.bf16.mxu1 %v13646_v18  ;;  %v13702_v18 = vld [vmem:[#allocation6 + $0x3c8] sm:$0xff]  }
  0x81   :  { %8457 = vmatmul.mubr.bf16.vlgmr.msra.gmra.mxu0 %v222_v11  ;;  %v13695_v11 = vld [vmem:[#allocation6 + $0x398] sm:$0xff]  }
  0x82   :  { %12186 = vmatpush3.bf16.msra.mxu0 %v13645_v15  ;;  %8497 = vmatmul.mubr.bf16.vlgmr.msra.gmra.mxu1 %v224_v17  ;;  %v13699_v15 = vld [vmem:[#allocation6 + $0x390] sm:$0xff]   ;;  %v13701_v17 = vld [vmem:[#allocation6 + $0x308] sm:$0xff]  }
  0x83   :  { %12208 = vmatpush3.bf16.msra.mxu1 %v13647_v19  ;;  %12187 = vmatprep.subr.bf16.mxu0 %v13648_v20  ;;  %v13703_v19 = vld [vmem:[#allocation6 + $0x388] sm:$0xff]   ;;  %v13704_v20 = vld [vmem:[#allocation6 + $0x340] sm:$0xff]  }
  0x84   :  { %12209 = vmatprep.subr.bf16.mxu1 %v13650_v22  ;;  %8536 = vmatprep.mubr.bf16.mxu0 %v227_v48  ;;  %v13706_v22 = vld [vmem:[#allocation6 + $0x3c0] sm:$0xff]   ;;  %v13724_v48 = vld [vmem:[#allocation6 + $0x458] sm:$0xff]  }
  0x85   :  { %8576 = vmatprep.mubr.bf16.mxu1 %v229_v54  ;;  %v13730_v54 = vld [vmem:[#allocation6 + $0x4d0] sm:$0xff]  }
  0x86   :  { %12188 = vmatpush3.bf16.msra.mxu0 %v13649_v21  ;;  %v13705_v21 = vld [vmem:[#allocation6 + $0x300] sm:$0xff]  }
  0x87   :  { %12210 = vmatpush3.bf16.msra.mxu1 %v13651_v23  ;;  %12189 = vmatprep.subr.bf16.mxu0 %v13652_v24  ;;  %v106_v23 = vld [vmem:[#allocation3 + $0x68] sm:$0xff] }
  0x88   :  { %12211 = vmatprep.subr.bf16.mxu1 %v13654_v26  ;;  %v231_v24 = vpack.c.bf16 %v106_v23, %v106_v23  ;;  %v105_v26 = vld [vmem:[#allocation3 + $0x60] sm:$0xff]  ;;  %v13755_v23 = vld [vmem:[#allocation6 + $0x5a0] sm:$0xff]  }
  0x8a   :  { %12190 = vmatpush3.bf16.msra.mxu0 %v13653_v25  ;;  %v13707_v25 = vld [vmem:[#allocation6 + $0x380] sm:$0xff]  }
  0x8b   :  { %12212 = vmatpush3.bf16.msra.mxu1 %v13655_v27  ;;  %12191 = vmatprep.subr.bf16.mxu0 %v13656_v28  ;;  %v230_v27 = vpack.c.bf16 %v105_v26, %v105_v26  ;;  %v13708_v28 = vld [vmem:[#allocation6 + $0x478] sm:$0xff]  }
  0x8c   :  { %12213 = vmatprep.subr.bf16.mxu1 %v13658_v30  ;;  %v13758_v26 = vld [vmem:[#allocation6 + $0x5d8] sm:$0xff]  }
  0x8e   :  { %12192 = vmatpush3.bf16.msra.mxu0 %v13657_v29  ;;  %v108_v29 = vld [vmem:[#allocation3 + $0x78] sm:$0xff] }
  0x8f   :  { %12214 = vmatpush3.bf16.msra.mxu1 %v13659_v31  ;;  %12193 = vmatprep.subr.bf16.mxu0 %v13660_v32  ;;  %v233_v30 = vpack.c.bf16 %v108_v29, %v108_v29  ;;  %v13709_v31 = vld [vmem:[#allocation6 + $0x438] sm:$0xff]   ;;  %v107_v32 = vld [vmem:[#allocation3 + $0x70] sm:$0xff]  ;;  %v13761_v29 = vld [vmem:[#allocation6 + $0x510] sm:$0xff]  }
  0x90   :  { %12215 = vmatprep.subr.bf16.mxu1 %v13662_v34  ;;  %v13710_v34 = vld [vmem:[#allocation6 + $0x4f8] sm:$0xff]  }
  0x92   :  { %12194 = vmatpush3.bf16.msra.mxu0 %v13661_v33  ;;  %v232_v33 = vpack.c.bf16 %v107_v32, %v107_v32  ;;  %v13764_v32 = vld [vmem:[#allocation6 + $0x548] sm:$0xff]  }
  0x93   :  { %12216 = vmatpush3.bf16.msra.mxu1 %v13663_v35  ;;  %12195 = vmatprep.subr.bf16.mxu0 %v13664_v36  ;;  %v13711_v35 = vld [vmem:[#allocation6 + $0x4b8] sm:$0xff]   ;;  %v13712_v36 = vld [vmem:[#allocation6 + $0x470] sm:$0xff]  }
  0x94   :  { %12217 = vmatprep.subr.bf16.mxu1 %v13666_v38  ;;  %v13714_v38 = vld [vmem:[#allocation6 + $0x4f0] sm:$0xff]  }
  0x96   :  { %12196 = vmatpush3.bf16.msra.mxu0 %v13665_v37  ;;  %v13713_v37 = vld [vmem:[#allocation6 + $0x430] sm:$0xff]  }
  0x97   :  { %12218 = vmatpush3.bf16.msra.mxu1 %v13667_v39  ;;  %12197 = vmatprep.subr.bf16.mxu0 %v13668_v40  ;;  %v13715_v39 = vld [vmem:[#allocation6 + $0x4b0] sm:$0xff]   ;;  %v13716_v40 = vld [vmem:[#allocation6 + $0x468] sm:$0xff]  }
  0x98   :  { %12219 = vmatprep.subr.bf16.mxu1 %v13670_v42  ;;  %v13718_v42 = vld [vmem:[#allocation6 + $0x4e8] sm:$0xff]  }
  0x9a   :  { %12198 = vmatpush3.bf16.msra.mxu0 %v13669_v41  ;;  %v13717_v41 = vld [vmem:[#allocation6 + $0x428] sm:$0xff]  }
  0x9b   :  { %12220 = vmatpush3.bf16.msra.mxu1 %v13671_v43  ;;  %12199 = vmatprep.subr.bf16.mxu0 %v13672_v44  ;;  %v13719_v43 = vld [vmem:[#allocation6 + $0x4a8] sm:$0xff]   ;;  %v13720_v44 = vld [vmem:[#allocation6 + $0x460] sm:$0xff]  }
  0x9c   :  { %12221 = vmatprep.subr.bf16.mxu1 %v13674_v46  ;;  %v13722_v46 = vld [vmem:[#allocation6 + $0x4e0] sm:$0xff]  }
  0x9e   :  { %12200 = vmatpush3.bf16.msra.mxu0 %v13673_v45  ;;  %v13721_v45 = vld [vmem:[#allocation6 + $0x420] sm:$0xff]  }
  0x9f   :  { %12222 = vmatpush3.bf16.msra.mxu1 %v13675_v49  ;;  %12229 = vmatprep.subr.bf16.mxu0 %v13676_v52  ;;  %v13725_v49 = vld [vmem:[#allocation6 + $0x418] sm:$0xff]   ;;  %v13728_v52 = vld [vmem:[#allocation6 + $0x450] sm:$0xff]  }
  0xa0   :  { %12251 = vmatprep.subr.bf16.mxu1 %v13678_v58  ;;  %v13734_v58 = vld [vmem:[#allocation6 + $0x4c8] sm:$0xff]  }
  0xa1   :  { %8537 = vmatmul.mubr.bf16.vlgmr.msra.gmra.mxu0 %v226_v51  ;;  %v13727_v51 = vld [vmem:[#allocation6 + $0x498] sm:$0xff]  }
  0xa2   :  { %12230 = vmatpush3.bf16.msra.mxu0 %v13677_v55  ;;  %8577 = vmatmul.mubr.bf16.vlgmr.msra.gmra.mxu1 %v228_v57  ;;  %v13731_v55 = vld [vmem:[#allocation6 + $0x490] sm:$0xff]   ;;  %v13733_v57 = vld [vmem:[#allocation6 + $0x408] sm:$0xff]  }
  0xa3   :  { %12252 = vmatpush3.bf16.msra.mxu1 %v13679_v59  ;;  %12231 = vmatprep.subr.bf16.mxu0 %v13680_v60  ;;  %v13735_v59 = vld [vmem:[#allocation6 + $0x488] sm:$0xff]   ;;  %v13736_v60 = vld [vmem:[#allocation6 + $0x440] sm:$0xff]  }
  0xa4   :  { %12253 = vmatprep.subr.bf16.mxu1 %v13682_v62  ;;  %8616 = vmatprep.mubr.bf16.mxu0 %v231_v24  ;;  %v13738_v62 = vld [vmem:[#allocation6 + $0x4c0] sm:$0xff]   ;;  %v13756_v24 = vld [vmem:[#allocation6 + $0x558] sm:$0xff]  }
  0xa5   :  { %8656 = vmatprep.mubr.bf16.mxu1 %v233_v30  ;;  %v13762_v30 = vld [vmem:[#allocation6 + $0x5d0] sm:$0xff]  }
  0xa6   :  { %12232 = vmatpush3.bf16.msra.mxu0 %v13681_v61  ;;  %v13737_v61 = vld [vmem:[#allocation6 + $0x400] sm:$0xff]  }
  0xa7   :  { %12254 = vmatpush3.bf16.msra.mxu1 %v13683_v63  ;;  %12233 = vmatprep.subr.bf16.mxu0 %v13684_v0  ;;  %v110_v63 = vld [vmem:[#allocation3 + $0x88] sm:$0xff] }
  0xa8   :  { %12255 = vmatprep.subr.bf16.mxu1 %v13686_v2  ;;  %v235_v0 = vpack.c.bf16 %v110_v63, %v110_v63  ;;  %v109_v2 = vld [vmem:[#allocation3 + $0x80] sm:$0xff]  ;;  %v13787_v63 = vld [vmem:[#allocation6 + $0x6a0] sm:$0xff]  }
  0xaa   :  { %12234 = vmatpush3.bf16.msra.mxu0 %v13685_v1  ;;  %v13739_v1 = vld [vmem:[#allocation6 + $0x480] sm:$0xff]  }
  0xab   :  { %12256 = vmatpush3.bf16.msra.mxu1 %v13687_v3  ;;  %12235 = vmatprep.subr.bf16.mxu0 %v13688_v4  ;;  %v234_v3 = vpack.c.bf16 %v109_v2, %v109_v2  ;;  %v13740_v4 = vld [vmem:[#allocation6 + $0x578] sm:$0xff]  }
  0xac   :  { %12257 = vmatprep.subr.bf16.mxu1 %v13690_v6  ;;  %v13790_v2 = vld [vmem:[#allocation6 + $0x6d8] sm:$0xff]  }
  0xae   :  { %12236 = vmatpush3.bf16.msra.mxu0 %v13689_v5  ;;  %v112_v5 = vld [vmem:[#allocation3 + $0x98] sm:$0xff] }
  0xaf   :  { %12258 = vmatpush3.bf16.msra.mxu1 %v13691_v7  ;;  %12237 = vmatprep.subr.bf16.mxu0 %v13692_v8  ;;  %v237_v6 = vpack.c.bf16 %v112_v5, %v112_v5  ;;  %v13741_v7 = vld [vmem:[#allocation6 + $0x538] sm:$0xff]   ;;  %v111_v8 = vld [vmem:[#allocation3 + $0x90] sm:$0xff]  ;;  %v13793_v5 = vld [vmem:[#allocation6 + $0x610] sm:$0xff]  }
  0xb0   :  { %12259 = vmatprep.subr.bf16.mxu1 %v13694_v10  ;;  %v13742_v10 = vld [vmem:[#allocation6 + $0x5f8] sm:$0xff]  }
  0xb2   :  { %12238 = vmatpush3.bf16.msra.mxu0 %v13693_v9  ;;  %v236_v9 = vpack.c.bf16 %v111_v8, %v111_v8  ;;  %v13796_v8 = vld [vmem:[#allocation6 + $0x648] sm:$0xff]  }
  0xb3   :  { %12260 = vmatpush3.bf16.msra.mxu1 %v13695_v11  ;;  %12239 = vmatprep.subr.bf16.mxu0 %v13696_v12  ;;  %v13743_v11 = vld [vmem:[#allocation6 + $0x5b8] sm:$0xff]   ;;  %v13744_v12 = vld [vmem:[#allocation6 + $0x570] sm:$0xff]  }
  0xb4   :  { %12261 = vmatprep.subr.bf16.mxu1 %v13698_v14  ;;  %v13746_v14 = vld [vmem:[#allocation6 + $0x5f0] sm:$0xff]  }
  0xb6   :  { %12240 = vmatpush3.bf16.msra.mxu0 %v13697_v13  ;;  %v13745_v13 = vld [vmem:[#allocation6 + $0x530] sm:$0xff]  }
  0xb7   :  { %12262 = vmatpush3.bf16.msra.mxu1 %v13699_v15  ;;  %12241 = vmatprep.subr.bf16.mxu0 %v13700_v16  ;;  %v13747_v15 = vld [vmem:[#allocation6 + $0x5b0] sm:$0xff]   ;;  %v13748_v16 = vld [vmem:[#allocation6 + $0x568] sm:$0xff]  }
  0xb8   :  { %12263 = vmatprep.subr.bf16.mxu1 %v13702_v18  ;;  %v13750_v18 = vld [vmem:[#allocation6 + $0x5e8] sm:$0xff]  }
  0xba   :  { %12242 = vmatpush3.bf16.msra.mxu0 %v13701_v17  ;;  %v13749_v17 = vld [vmem:[#allocation6 + $0x528] sm:$0xff]  }
  0xbb   :  { %12264 = vmatpush3.bf16.msra.mxu1 %v13703_v19  ;;  %12243 = vmatprep.subr.bf16.mxu0 %v13704_v20  ;;  %v13751_v19 = vld [vmem:[#allocation6 + $0x5a8] sm:$0xff]   ;;  %v13752_v20 = vld [vmem:[#allocation6 + $0x560] sm:$0xff]  }
  0xbc   :  { %12265 = vmatprep.subr.bf16.mxu1 %v13706_v22  ;;  %v13754_v22 = vld [vmem:[#allocation6 + $0x5e0] sm:$0xff]  }
  0xbe   :  { %12244 = vmatpush3.bf16.msra.mxu0 %v13705_v21  ;;  %v13753_v21 = vld [vmem:[#allocation6 + $0x520] sm:$0xff]  }
  0xbf   :  { %12266 = vmatpush3.bf16.msra.mxu1 %v13707_v25  ;;  %12273 = vmatprep.subr.bf16.mxu0 %v13708_v28  ;;  %v13757_v25 = vld [vmem:[#allocation6 + $0x518] sm:$0xff]   ;;  %v13760_v28 = vld [vmem:[#allocation6 + $0x550] sm:$0xff]  }
  0xc0   :  { %12295 = vmatprep.subr.bf16.mxu1 %v13710_v34  ;;  %v13766_v34 = vld [vmem:[#allocation6 + $0x5c8] sm:$0xff]  }
  0xc1   :  { %8617 = vmatmul.mubr.bf16.vlgmr.msra.gmra.mxu0 %v230_v27  ;;  %v13759_v27 = vld [vmem:[#allocation6 + $0x598] sm:$0xff]  }
  0xc2   :  { %12274 = vmatpush3.bf16.msra.mxu0 %v13709_v31  ;;  %8657 = vmatmul.mubr.bf16.vlgmr.msra.gmra.mxu1 %v232_v33  ;;  %v13763_v31 = vld [vmem:[#allocation6 + $0x590] sm:$0xff]   ;;  %v13765_v33 = vld [vmem:[#allocation6 + $0x508] sm:$0xff]  }
  0xc3   :  { %12296 = vmatpush3.bf16.msra.mxu1 %v13711_v35  ;;  %12275 = vmatprep.subr.bf16.mxu0 %v13712_v36  ;;  %v13767_v35 = vld [vmem:[#allocation6 + $0x588] sm:$0xff]   ;;  %v13768_v36 = vld [vmem:[#allocation6 + $0x540] sm:$0xff]  }
  0xc4   :  { %12297 = vmatprep.subr.bf16.mxu1 %v13714_v38  ;;  %8696 = vmatprep.mubr.bf16.mxu0 %v235_v0  ;;  %v13770_v38 = vld [vmem:[#allocation6 + $0x5c0] sm:$0xff]   ;;  %v13788_v0 = vld [vmem:[#allocation6 + $0x658] sm:$0xff]  }
  0xc5   :  { %8736 = vmatprep.mubr.bf16.mxu1 %v237_v6  ;;  %v13794_v6 = vld [vmem:[#allocation6 + $0x6d0] sm:$0xff]  }
  0xc6   :  { %12276 = vmatpush3.bf16.msra.mxu0 %v13713_v37  ;;  %v13769_v37 = vld [vmem:[#allocation6 + $0x500] sm:$0xff]  }
  0xc7   :  { %12298 = vmatpush3.bf16.msra.mxu1 %v13715_v39  ;;  %12277 = vmatprep.subr.bf16.mxu0 %v13716_v40  ;;  %v114_v39 = vld [vmem:[#allocation3 + $0xa8] sm:$0xff] }
  0xc8   :  { %12299 = vmatprep.subr.bf16.mxu1 %v13718_v42  ;;  %v239_v40 = vpack.c.bf16 %v114_v39, %v114_v39  ;;  %v113_v42 = vld [vmem:[#allocation3 + $0xa0] sm:$0xff]  ;;  %v13808_v39 = vld [vmem:[#allocation6 + $0x770] sm:$0xff]  }
  0xca   :  { %12278 = vmatpush3.bf16.msra.mxu0 %v13717_v41  ;;  %v13771_v41 = vld [vmem:[#allocation6 + $0x580] sm:$0xff]  }
  0xcb   :  { %12300 = vmatpush3.bf16.msra.mxu1 %v13719_v43  ;;  %12279 = vmatprep.subr.bf16.mxu0 %v13720_v44  ;;  %v238_v43 = vpack.c.bf16 %v113_v42, %v113_v42  ;;  %v13772_v44 = vld [vmem:[#allocation6 + $0x678] sm:$0xff]   ;;  %v13811_v42 = vld [vmem:[#allocation6 + $0x7b0] sm:$0xff]  }
  0xcc   :  { %12301 = vmatprep.subr.bf16.mxu1 %v13722_v46 }
  0xce   :  { %12280 = vmatpush3.bf16.msra.mxu0 %v13721_v45  ;;  %v116_v45 = vld [vmem:[#allocation3 + $0xb8] sm:$0xff] }
  0xcf   :  { %12302 = vmatpush3.bf16.msra.mxu1 %v13723_v47  ;;  %12281 = vmatprep.subr.bf16.mxu0 %v13724_v48  ;;  %v241_v46 = vpack.c.bf16 %v116_v45, %v116_v45  ;;  %v13773_v47 = vld [vmem:[#allocation6 + $0x638] sm:$0xff]   ;;  %v115_v48 = vld [vmem:[#allocation3 + $0xb0] sm:$0xff] }
  0xd0   :  { %12303 = vmatprep.subr.bf16.mxu1 %v13726_v50  ;;  %v13774_v50 = vld [vmem:[#allocation6 + $0x6f8] sm:$0xff]   ;;  %v13814_v45 = vld [vmem:[#allocation6 + $0x7e8] sm:$0xff]  }
  0xd2   :  { %12282 = vmatpush3.bf16.msra.mxu0 %v13725_v49  ;;  %v240_v49 = vpack.c.bf16 %v115_v48, %v115_v48  ;;  %v13817_v48 = vld [vmem:[#allocation6 + $0x720] sm:$0xff]  }
  0xd3   :  { %12304 = vmatpush3.bf16.msra.mxu1 %v13727_v51  ;;  %12283 = vmatprep.subr.bf16.mxu0 %v13728_v52  ;;  %v13775_v51 = vld [vmem:[#allocation6 + $0x6b8] sm:$0xff]   ;;  %v13776_v52 = vld [vmem:[#allocation6 + $0x670] sm:$0xff]  }
  0xd4   :  { %12305 = vmatprep.subr.bf16.mxu1 %v13730_v54  ;;  %v13778_v54 = vld [vmem:[#allocation6 + $0x6f0] sm:$0xff]  }
  0xd6   :  { %12284 = vmatpush3.bf16.msra.mxu0 %v13729_v53  ;;  %v13777_v53 = vld [vmem:[#allocation6 + $0x630] sm:$0xff]  }
  0xd7   :  { %12306 = vmatpush3.bf16.msra.mxu1 %v13731_v55  ;;  %12285 = vmatprep.subr.bf16.mxu0 %v13732_v56  ;;  %v13779_v55 = vld [vmem:[#allocation6 + $0x6b0] sm:$0xff]   ;;  %v13780_v56 = vld [vmem:[#allocation6 + $0x668] sm:$0xff]  }
  0xd8   :  { %12307 = vmatprep.subr.bf16.mxu1 %v13734_v58  ;;  %v13782_v58 = vld [vmem:[#allocation6 + $0x6e8] sm:$0xff]  }
  0xda   :  { %12286 = vmatpush3.bf16.msra.mxu0 %v13733_v57  ;;  %v13781_v57 = vld [vmem:[#allocation6 + $0x628] sm:$0xff]  }
  0xdb   :  { %12308 = vmatpush3.bf16.msra.mxu1 %v13735_v59  ;;  %12287 = vmatprep.subr.bf16.mxu0 %v13736_v60  ;;  %v13783_v59 = vld [vmem:[#allocation6 + $0x6a8] sm:$0xff]   ;;  %v13784_v60 = vld [vmem:[#allocation6 + $0x660] sm:$0xff]  }
  0xdc   :  { %12309 = vmatprep.subr.bf16.mxu1 %v13738_v62  ;;  %v13786_v62 = vld [vmem:[#allocation6 + $0x6e0] sm:$0xff]  }
  0xde   :  { %12288 = vmatpush3.bf16.msra.mxu0 %v13737_v61  ;;  %v13785_v61 = vld [vmem:[#allocation6 + $0x620] sm:$0xff]  }
  0xdf   :  { %12310 = vmatpush3.bf16.msra.mxu1 %v13739_v1  ;;  %12317 = vmatprep.subr.bf16.mxu0 %v13740_v4  ;;  %v13789_v1 = vld [vmem:[#allocation6 + $0x618] sm:$0xff]   ;;  %v13792_v4 = vld [vmem:[#allocation6 + $0x650] sm:$0xff]  }
  0xe0   :  { %12339 = vmatprep.subr.bf16.mxu1 %v13742_v10  ;;  %v13798_v10 = vld [vmem:[#allocation6 + $0x6c8] sm:$0xff]  }
  0xe1   :  { %8697 = vmatmul.mubr.bf16.vlgmr.msra.gmra.mxu0 %v234_v3  ;;  %v13791_v3 = vld [vmem:[#allocation6 + $0x698] sm:$0xff]  }
  0xe2   :  { %12318 = vmatpush3.bf16.msra.mxu0 %v13741_v7  ;;  %8737 = vmatmul.mubr.bf16.vlgmr.msra.gmra.mxu1 %v236_v9  ;;  %v13795_v7 = vld [vmem:[#allocation6 + $0x690] sm:$0xff]   ;;  %v13797_v9 = vld [vmem:[#allocation6 + $0x608] sm:$0xff]  }
  0xe3   :  { %12340 = vmatpush3.bf16.msra.mxu1 %v13743_v11  ;;  %12319 = vmatprep.subr.bf16.mxu0 %v13744_v12  ;;  %v13799_v11 = vld [vmem:[#allocation6 + $0x688] sm:$0xff]   ;;  %v13800_v12 = vld [vmem:[#allocation6 + $0x640] sm:$0xff]  }
  0xe4   :  { %12341 = vmatprep.subr.bf16.mxu1 %v13746_v14  ;;  %8776 = vmatprep.mubr.bf16.mxu0 %v239_v40  ;;  %v13809_v40 = vld [vmem:[#allocation6 + $0x730] sm:$0xff]  }
  0xe5   :  { %8816 = vmatprep.mubr.bf16.mxu1 %v241_v46  ;;  %v13815_v46 = vld [vmem:[#allocation6 + $0x7a8] sm:$0xff]  }
  0xe6   :  { %12320 = vmatpush3.bf16.msra.mxu0 %v13745_v13 }
  0xe7   :  { %12342 = vmatpush3.bf16.msra.mxu1 %v13747_v15  ;;  %12321 = vmatprep.subr.bf16.mxu0 %v13748_v16  ;;  %v13801_v15 = vld [vmem:[#allocation6 + $0x600] sm:$0xff]  }
  0xe8   :  { %12343 = vmatprep.subr.bf16.mxu1 %v13750_v18  ;;  %v13802_v16 = vld [vmem:[#allocation6 + $0x6c0] sm:$0xff]  }
  0xea   :  { %12322 = vmatpush3.bf16.msra.mxu0 %v13749_v17 }
  0xeb   :  { %12344 = vmatpush3.bf16.msra.mxu1 %v13751_v19  ;;  %12323 = vmatprep.subr.bf16.mxu0 %v13752_v20  ;;  %v118_v19 = vld [vmem:[#allocation3 + $0xc8] sm:$0xff] }
  0xec   :  { %12345 = vmatprep.subr.bf16.mxu1 %v13754_v22  ;;  %v243_v22 = vpack.c.bf16 %v118_v19, %v118_v19 }
  0xee   :  { %12324 = vmatpush3.bf16.msra.mxu0 %v13753_v21 }
  0xef   :  { %12346 = vmatpush3.bf16.msra.mxu1 %v13755_v23  ;;  %12325 = vmatprep.subr.bf16.mxu0 %v13756_v24  ;;  %v13803_v23 = vld [vmem:[#allocation6 + $0x680] sm:$0xff]   ;;  %v117_v24 = vld [vmem:[#allocation3 + $0xc0] sm:$0xff] }
  0xf0   :  { %12347 = vmatprep.subr.bf16.mxu1 %v13758_v26 }
  0xf2   :  { %12326 = vmatpush3.bf16.msra.mxu0 %v13757_v25 }
  0xf3   :  { %12348 = vmatpush3.bf16.msra.mxu1 %v13759_v27  ;;  %12327 = vmatprep.subr.bf16.mxu0 %v13760_v28  ;;  %v242_v27 = vpack.c.bf16 %v117_v24, %v117_v24  ;;  %v13804_v28 = vld [vmem:[#allocation6 + $0x778] sm:$0xff]  }
  0xf4   :  { %12349 = vmatprep.subr.bf16.mxu1 %v13762_v30  ;;  %v13838_v24 = vld [vmem:[#allocation6 + $0x8f8] sm:$0xff]  }
  0xf6   :  { %12328 = vmatpush3.bf16.msra.mxu0 %v13761_v29  ;;  %v120_v29 = vld [vmem:[#allocation3 + $0xd8] sm:$0xff] }
  0xf7   :  { %12350 = vmatpush3.bf16.msra.mxu1 %v13763_v31  ;;  %12329 = vmatprep.subr.bf16.mxu0 %v13764_v32  ;;  %v245_v31 = vpack.c.bf16 %v120_v29, %v120_v29  ;;  %v13805_v32 = vld [vmem:[#allocation6 + $0x738] sm:$0xff]   ;;  %v13842_v29 = vld [vmem:[#allocation6 + $0x8f0] sm:$0xff]  }
  0xf8   :  { %12351 = vmatprep.subr.bf16.mxu1 %v13766_v34 }
  0xfa   :  { %12330 = vmatpush3.bf16.msra.mxu0 %v13765_v33 }
  0xfb   :  { %12352 = vmatpush3.bf16.msra.mxu1 %v13767_v35  ;;  %12331 = vmatprep.subr.bf16.mxu0 %v13768_v36  ;;  %v119_v35 = vld [vmem:[#allocation3 + $0xd0] sm:$0xff] }
  0xfc   :  { %12353 = vmatprep.subr.bf16.mxu1 %v13770_v38  ;;  %v244_v36 = vpack.c.bf16 %v119_v35, %v119_v35  ;;  %v13807_v38 = vld [vmem:[#allocation6 + $0x7b8] sm:$0xff]   ;;  %v13848_v35 = vld [vmem:[#allocation6 + $0x860] sm:$0xff]  }
  0xfe   :  { %12332 = vmatpush3.bf16.msra.mxu0 %v13769_v37  ;;  %v13806_v37 = vld [vmem:[#allocation6 + $0x7f8] sm:$0xff]  }
  0xff   :  { %12354 = vmatpush3.bf16.msra.mxu1 %v13771_v41  ;;  %12361 = vmatprep.subr.bf16.mxu0 %v13772_v44  ;;  %v13810_v41 = vld [vmem:[#allocation6 + $0x7f0] sm:$0xff]   ;;  %v13813_v44 = vld [vmem:[#allocation6 + $0x728] sm:$0xff]  }
 0x100   :  { %12383 = vmatprep.subr.bf16.mxu1 %v13774_v50  ;;  %v13819_v50 = vld [vmem:[#allocation6 + $0x7a0] sm:$0xff]  }
 0x101   :  { %8777 = vmatmul.mubr.bf16.vlgmr.msra.gmra.mxu0 %v238_v43  ;;  %v13812_v43 = vld [vmem:[#allocation6 + $0x768] sm:$0xff]  }
 0x102   :  { %12362 = vmatpush3.bf16.msra.mxu0 %v13773_v47  ;;  %8817 = vmatmul.mubr.bf16.vlgmr.msra.gmra.mxu1 %v240_v49  ;;  %v13816_v47 = vld [vmem:[#allocation6 + $0x760] sm:$0xff]  }
 0x103   :  { %12384 = vmatpush3.bf16.msra.mxu1 %v13775_v51  ;;  %12363 = vmatprep.subr.bf16.mxu0 %v13776_v52  ;;  %v13818_v49 = vld [vmem:[#allocation6 + $0x7e0] sm:$0xff]   ;;  %v13820_v51 = vld [vmem:[#allocation6 + $0x758] sm:$0xff]  }
 0x104   :  { %12385 = vmatprep.subr.bf16.mxu1 %v13778_v54  ;;  %8856 = vmatprep.mubr.bf16.mxu0 %v243_v22  ;;  %v13821_v52 = vld [vmem:[#allocation6 + $0x718] sm:$0xff]  }
 0x105   :  { %8896 = vmatprep.mubr.bf16.mxu1 %v245_v31  ;;  %v13823_v54 = vld [vmem:[#allocation6 + $0x798] sm:$0xff]   ;;  %v13844_v31 = vld [vmem:[#allocation6 + $0x868] sm:$0xff]  }
 0x106   :  { %12364 = vmatpush3.bf16.msra.mxu0 %v13777_v53  ;;  %v13822_v53 = vld [vmem:[#allocation6 + $0x7d8] sm:$0xff]  }
 0x107   :  { %12386 = vmatpush3.bf16.msra.mxu1 %v13779_v55  ;;  %12365 = vmatprep.subr.bf16.mxu0 %v13780_v56  ;;  %v13824_v55 = vld [vmem:[#allocation6 + $0x750] sm:$0xff]  }
 0x108   :  { %12387 = vmatprep.subr.bf16.mxu1 %v13782_v58  ;;  %v13825_v56 = vld [vmem:[#allocation6 + $0x710] sm:$0xff]  }
 0x109   :  { %v13827_v58 = vld [vmem:[#allocation6 + $0x790] sm:$0xff]  }
 0x10a   :  { %12366 = vmatpush3.bf16.msra.mxu0 %v13781_v57  ;;  %v13826_v57 = vld [vmem:[#allocation6 + $0x7d0] sm:$0xff]  }
 0x10b   :  { %12388 = vmatpush3.bf16.msra.mxu1 %v13783_v59  ;;  %12367 = vmatprep.subr.bf16.mxu0 %v13784_v60  ;;  %v13828_v59 = vld [vmem:[#allocation6 + $0x748] sm:$0xff]  }
 0x10c   :  { %12389 = vmatprep.subr.bf16.mxu1 %v13786_v62  ;;  %v13829_v60 = vld [vmem:[#allocation6 + $0x708] sm:$0xff]  }
 0x10d   :  { %v13831_v62 = vld [vmem:[#allocation6 + $0x788] sm:$0xff]  }
 0x10e   :  { %12368 = vmatpush3.bf16.msra.mxu0 %v13785_v61  ;;  %v13830_v61 = vld [vmem:[#allocation6 + $0x7c8] sm:$0xff]  }
 0x10f   :  { %12390 = vmatpush3.bf16.msra.mxu1 %v13787_v63  ;;  %12369 = vmatprep.subr.bf16.mxu0 %v13788_v0  ;;  %v13832_v0 = vld [vmem:[#allocation6 + $0x740] sm:$0xff]  }
 0x110   :  { %12391 = vmatprep.subr.bf16.mxu1 %v13790_v2 }
 0x112   :  { %12370 = vmatpush3.bf16.msra.mxu0 %v13789_v1  ;;  %v13833_v1 = vld [vmem:[#allocation6 + $0x700] sm:$0xff]  }
 0x113   :  { %12392 = vmatpush3.bf16.msra.mxu1 %v13791_v3  ;;  %12371 = vmatprep.subr.bf16.mxu0 %v13792_v4  ;;  %v13834_v4 = vld [vmem:[#allocation6 + $0x7c0] sm:$0xff]  }
 0x114   :  { %12393 = vmatprep.subr.bf16.mxu1 %v13794_v6 }
 0x116   :  { %12372 = vmatpush3.bf16.msra.mxu0 %v13793_v5  ;;  %v122_v5 = vld [vmem:[#allocation3 + $0xe8] sm:$0xff] }
 0x117   :  { %12394 = vmatpush3.bf16.msra.mxu1 %v13795_v7  ;;  %12373 = vmatprep.subr.bf16.mxu0 %v13796_v8  ;;  %v247_v7 = vpack.c.bf16 %v122_v5, %v122_v5  ;;  %v13835_v8 = vld [vmem:[#allocation6 + $0x780] sm:$0xff]  }
 0x118   :  { %12395 = vmatprep.subr.bf16.mxu1 %v13798_v10 }
 0x11a   :  { %12374 = vmatpush3.bf16.msra.mxu0 %v13797_v9  ;;  %v121_v9 = vld [vmem:[#allocation3 + $0xe0] sm:$0xff] }
 0x11b   :  { %12396 = vmatpush3.bf16.msra.mxu1 %v13799_v11  ;;  %12375 = vmatprep.subr.bf16.mxu0 %v13800_v12  ;;  %v246_v12 = vpack.c.bf16 %v121_v9, %v121_v9  ;;  %v127_v9 = vld [vmem:[#allocation3 + $0x110] sm:$0xff] }
 0x11c   :  { %12397 = vmatprep.subr.bf16.mxu1 %v13802_v16  ;;  %v124_v16 = vld [vmem:[#allocation3 + $0xf8] sm:$0xff] }
 0x11d   :  { %v249_v19 = vpack.c.bf16 %v124_v16, %v124_v16  ;;  %v13873_v16 = vld [vmem:[#allocation6 + $0x930] sm:$0xff]  }
 0x11e   :  { %12376 = vmatpush3.bf16.msra.mxu0 %v13801_v15 }
 0x11f   :  { %12398 = vmatpush3.bf16.msra.mxu1 %v13803_v23  ;;  %12405 = vmatprep.subr.bf16.mxu0 %v13804_v28  ;;  %v13841_v28 = vld [vmem:[#allocation6 + $0x830] sm:$0xff]  }
 0x120   :  { %12427 = vmatprep.subr.bf16.mxu1 %v13806_v37  ;;  %v13850_v37 = vld [vmem:[#allocation6 + $0x8e0] sm:$0xff]  }
 0x121   :  { %v12113_v13 = vpop.f32.mrf.mxu0  ;;  %8857 = vmatmul.mubr.bf16.vlgmr.msra.gmra.mxu0 %v242_v27  ;;  %v13840_v27 = vld [vmem:[#allocation6 + $0x870] sm:$0xff]  }
 0x122   :  { %v12135_v14 = vpop.f32.mrf.mxu1  ;;  %12406 = vmatpush3.bf16.msra.mxu0 %v13805_v32  ;;  %8897 = vmatmul.mubr.bf16.vlgmr.msra.gmra.mxu1 %v244_v36  ;;  %v13845_v32 = vld [vmem:[#allocation6 + $0x828] sm:$0xff]   ;;  %v13849_v36 = vld [vmem:[#allocation6 + $0x820] sm:$0xff]  }
 0x123   :  { %v12114_v17 = vpop.f32.mrf.mxu0  ;;  %12428 = vmatpush3.bf16.msra.mxu1 %v13807_v38  ;;  %12407 = vmatprep.subr.bf16.mxu0 %v13808_v39  ;;  %v13851_v38 = vld [vmem:[#allocation6 + $0x8a0] sm:$0xff]   ;;  %v13852_v39 = vld [vmem:[#allocation6 + $0x858] sm:$0xff]  }
 0x124   :  { %v12136_v18 = vpop.f32.mrf.mxu1  ;;  %v12115_v20 = vadd.f32 %v12114_v17, %v12113_v13  ;;  %12429 = vmatprep.subr.bf16.mxu1 %v13810_v41  ;;  %v13836_v13 = vld [vmem:[#allocation6 + $0x878] sm:$0xff]   ;;  %8936 = vmatprep.mubr.bf16.mxu0 %v247_v7 }
 0x125   :  { %v12137_v21 = vadd.f32 %v12136_v18, %v12135_v14  ;;  %v12116_v25 = vpop.f32.mrf.mxu0  ;;  %8976 = vmatprep.mubr.bf16.mxu1 %v249_v19  ;;  %v13854_v41 = vld [vmem:[#allocation6 + $0x8d8] sm:$0xff]   ;;  %v13876_v19 = vld [vmem:[#allocation6 + $0x968] sm:$0xff]  }
 0x126   :  { %v12138_v26 = vpop.f32.mrf.mxu1  ;;  %12408 = vmatpush3.bf16.msra.mxu0 %v13809_v40  ;;  %v13853_v40 = vld [vmem:[#allocation6 + $0x818] sm:$0xff]  }
 0x127   :  { %v14777_v30 = vadd.f32 %v12137_v21, %v12115_v20  ;;  %v12117_v33 = vpop.f32.mrf.mxu0  ;;  %12430 = vmatpush3.bf16.msra.mxu1 %v13811_v42  ;;  %12409 = vmatprep.subr.bf16.mxu0 %v13812_v43  ;;  %v13837_v20 = vld [vmem:[#allocation6 + $0x838] sm:$0xff]   ;;  %v123_v21 = vld [vmem:[#allocation3 + $0xf0] sm:$0xff]  ;;  %v13856_v43 = vld [vmem:[#allocation6 + $0x850] sm:$0xff]  }
 0x128   :  { %v12139_v34 = vpop.f32.mrf.mxu1  ;;  %12431 = vmatprep.subr.bf16.mxu1 %v13814_v45  ;;  %v248_v23 = vpack.c.bf16 %v123_v21, %v123_v21  ;;  %v13839_v26 = vld [vmem:[#allocation6 + $0x8b8] sm:$0xff]   ;;  %v13846_v33 = vld [vmem:[#allocation6 + $0x8e8] sm:$0xff]   ;;  %v13858_v45 = vld [vmem:[#allocation6 + $0x8d0] sm:$0xff]  }
 0x129   :  { %v13847_v34 = vld [vmem:[#allocation6 + $0x8a8] sm:$0xff]   ;;  %v13855_v42 = vld [vmem:[#allocation6 + $0x898] sm:$0xff]  }
 0x12a   :  { %12410 = vmatpush3.bf16.msra.mxu0 %v13813_v44  ;;  %v13857_v44 = vld [vmem:[#allocation6 + $0x810] sm:$0xff]   ;;  %v13878_v21 = vld [vmem:[#allocation6 + $0x9e8] sm:$0xff]  }
 0x12b   :  { %12432 = vmatpush3.bf16.msra.mxu1 %v13815_v46  ;;  %12411 = vmatprep.subr.bf16.mxu0 %v13816_v47  ;;  %v13859_v46 = vld [vmem:[#allocation6 + $0x890] sm:$0xff]   ;;  %v13860_v47 = vld [vmem:[#allocation6 + $0x848] sm:$0xff]  }
 0x12c   :  { %12433 = vmatprep.subr.bf16.mxu1 %v13818_v49  ;;  %v13862_v49 = vld [vmem:[#allocation6 + $0x8c8] sm:$0xff]  }
 0x12e   :  { %12412 = vmatpush3.bf16.msra.mxu0 %v13817_v48  ;;  %v13861_v48 = vld [vmem:[#allocation6 + $0x808] sm:$0xff]  }
 0x12f   :  { %12434 = vmatpush3.bf16.msra.mxu1 %v13819_v50  ;;  %12413 = vmatprep.subr.bf16.mxu0 %v13820_v51  ;;  %v13863_v50 = vld [vmem:[#allocation6 + $0x888] sm:$0xff]  }
 0x130   :  { %12435 = vmatprep.subr.bf16.mxu1 %v13822_v53  ;;  %v13865_v53 = vld [vmem:[#allocation6 + $0x800] sm:$0xff]  }
 0x132   :  { %12414 = vmatpush3.bf16.msra.mxu0 %v13821_v52  ;;  %v13864_v52 = vld [vmem:[#allocation6 + $0x840] sm:$0xff]  }
 0x133   :  { %12436 = vmatpush3.bf16.msra.mxu1 %v13823_v54  ;;  %12415 = vmatprep.subr.bf16.mxu0 %v13824_v55 }
 0x134   :  { %12437 = vmatprep.subr.bf16.mxu1 %v13826_v57  ;;  %v126_v57 = vld [vmem:[#allocation3 + $0x108] sm:$0xff] }
 0x136   :  { %12416 = vmatpush3.bf16.msra.mxu0 %v13825_v56  ;;  %v13866_v56 = vld [vmem:[#allocation6 + $0x8c0] sm:$0xff]  }
 0x137   :  { %12438 = vmatpush3.bf16.msra.mxu1 %v13827_v58  ;;  %12417 = vmatprep.subr.bf16.mxu0 %v13828_v59  ;;  %v251_v59 = vpack.c.bf16 %v126_v57, %v126_v57 }
 0x138   :  { %12439 = vmatprep.subr.bf16.mxu1 %v13830_v61 }
 0x13a   :  { %12418 = vmatpush3.bf16.msra.mxu0 %v13829_v60  ;;  %v13867_v60 = vld [vmem:[#allocation6 + $0x880] sm:$0xff]  }
 0x13b   :  { %12440 = vmatpush3.bf16.msra.mxu1 %v13831_v62  ;;  %12419 = vmatprep.subr.bf16.mxu0 %v13832_v0 }
 0x13c   :  { %12441 = vmatprep.subr.bf16.mxu1 %v13834_v4  ;;  %v128_v4 = vld [vmem:[#allocation3 + $0x118] sm:$0xff] }
 0x13d   :  { %v253_v7 = vpack.c.bf16 %v128_v4, %v128_v4  ;;  %v13905_v4 = vld [vmem:[#allocation6 + $0xa30] sm:$0xff]  }
 0x13e   :  { %12420 = vmatpush3.bf16.msra.mxu0 %v13833_v1 }
 0x13f   :  { %12442 = vmatpush3.bf16.msra.mxu1 %v13835_v8  ;;  %12449 = vmatprep.subr.bf16.mxu0 %v13836_v13  ;;  %v13869_v8 = vld [vmem:[#allocation6 + $0x938] sm:$0xff]  }
 0x140   :  { %12471 = vmatprep.subr.bf16.mxu1 %v13838_v24  ;;  %v13881_v24 = vld [vmem:[#allocation6 + $0x920] sm:$0xff]  }
 0x141   :  { %v12157_v63 = vpop.f32.mrf.mxu0  ;;  %8937 = vmatmul.mubr.bf16.vlgmr.msra.gmra.mxu0 %v246_v12  ;;  %v13870_v12 = vld [vmem:[#allocation6 + $0x9f8] sm:$0xff]  }
 0x142   :  { %v12179_v3 = vpop.f32.mrf.mxu1  ;;  %12450 = vmatpush3.bf16.msra.mxu0 %v13837_v20  ;;  %8977 = vmatmul.mubr.bf16.vlgmr.msra.gmra.mxu1 %v248_v23  ;;  %v13877_v20 = vld [vmem:[#allocation6 + $0x928] sm:$0xff]   ;;  %v13880_v23 = vld [vmem:[#allocation6 + $0x960] sm:$0xff]  }
 0x143   :  { %v12158_v2 = vpop.f32.mrf.mxu0  ;;  %12472 = vmatpush3.bf16.msra.mxu1 %v13839_v26  ;;  %12451 = vmatprep.subr.bf16.mxu0 %v13840_v27  ;;  %v13883_v26 = vld [vmem:[#allocation6 + $0x9a0] sm:$0xff]   ;;  %v13884_v27 = vld [vmem:[#allocation6 + $0x958] sm:$0xff]  }
 0x144   :  { %v12159_v6 = vadd.f32 %v12158_v2, %v12157_v63  ;;  %v12180_v11 = vpop.f32.mrf.mxu1  ;;  %12473 = vmatprep.subr.bf16.mxu1 %v13842_v29  ;;  %v125_v63 = vld [vmem:[#allocation3 + $0x100] sm:$0xff]  ;;  %9016 = vmatprep.mubr.bf16.mxu0 %v251_v59 }
 0x145   :  { %v12160_v10 = vpop.f32.mrf.mxu0  ;;  %v12181_v15 = vadd.f32 %v12180_v11, %v12179_v3  ;;  %v250_v2 = vpack.c.bf16 %v125_v63, %v125_v63  ;;  %v13868_v3 = vld [vmem:[#allocation6 + $0x978] sm:$0xff]   ;;  %v252_v11 = vpack.c.bf16 %v127_v9, %v127_v9  ;;  %9056 = vmatprep.mubr.bf16.mxu1 %v253_v7  ;;  %v13908_v7 = vld [vmem:[#allocation6 + $0xa68] sm:$0xff]  }
 0x146   :  { %v8459_v14 = vadd.f32 %v12159_v6, %v14777_v30  ;;  %v12182_v18 = vpop.f32.mrf.mxu1  ;;  %12452 = vmatpush3.bf16.msra.mxu0 %v13841_v28  ;;  %v13843_v30 = vld [vmem:[#allocation6 + $0x8b0] sm:$0xff]   ;;  %v13885_v28 = vld [vmem:[#allocation6 + $0x918] sm:$0xff]   ;;  %v13910_v9 = vld [vmem:[#allocation6 + $0xae8] sm:$0xff]  }
 0x147   :  { %v12161_v17 = vpop.f32.mrf.mxu0  ;;  %12474 = vmatpush3.bf16.msra.mxu1 %v13843_v30  ;;  %12453 = vmatprep.subr.bf16.mxu0 %v13844_v31  ;;  %v13875_v18 = vld [vmem:[#allocation6 + $0x9b0] sm:$0xff]   ;;  %v13886_v29 = vld [vmem:[#allocation6 + $0x9d8] sm:$0xff]  }
 0x148   :  { %v14780_v22 = vadd.f32 %v12181_v15, %v8459_v14  ;;  %v12183_v25 = vpop.f32.mrf.mxu1  ;;  %12475 = vmatprep.subr.bf16.mxu1 %v13846_v33  ;;  %v13871_v14 = vld [vmem:[#allocation6 + $0x9b8] sm:$0xff]   ;;  %v13872_v15 = vld [vmem:[#allocation6 + $0x970] sm:$0xff]  }
 0x149   :  { %v13874_v17 = vld [vmem:[#allocation6 + $0x9f0] sm:$0xff]   ;;  %v13882_v25 = vld [vmem:[#allocation6 + $0x9e0] sm:$0xff]   ;;  %v13887_v30 = vld [vmem:[#allocation6 + $0x998] sm:$0xff]  }
 0x14a   :  { %12454 = vmatpush3.bf16.msra.mxu0 %v13845_v32  ;;  %v13888_v31 = vld [vmem:[#allocation6 + $0x950] sm:$0xff]   ;;  %v13901_v59 = vld [vmem:[#allocation6 + $0xa38] sm:$0xff]  }
 0x14b   :  { %12476 = vmatpush3.bf16.msra.mxu1 %v13847_v34  ;;  %12455 = vmatprep.subr.bf16.mxu0 %v13848_v35  ;;  %v13889_v32 = vld [vmem:[#allocation6 + $0x910] sm:$0xff]   ;;  %v13892_v35 = vld [vmem:[#allocation6 + $0x948] sm:$0xff]  }
 0x14c   :  { %12477 = vmatprep.subr.bf16.mxu1 %v13850_v37  ;;  %v13890_v33 = vld [vmem:[#allocation6 + $0x9d0] sm:$0xff]   ;;  %v13894_v37 = vld [vmem:[#allocation6 + $0x9c8] sm:$0xff]  }
 0x14d   :  { %v13891_v34 = vld [vmem:[#allocation6 + $0x990] sm:$0xff]  }
 0x14e   :  { %12456 = vmatpush3.bf16.msra.mxu0 %v13849_v36  ;;  %v13893_v36 = vld [vmem:[#allocation6 + $0x908] sm:$0xff]  }
 0x14f   :  { %12478 = vmatpush3.bf16.msra.mxu1 %v13851_v38  ;;  %12457 = vmatprep.subr.bf16.mxu0 %v13852_v39  ;;  %v13895_v38 = vld [vmem:[#allocation6 + $0x988] sm:$0xff]  }
 0x150   :  { %12479 = vmatprep.subr.bf16.mxu1 %v13854_v41  ;;  %v13897_v41 = vld [vmem:[#allocation6 + $0x900] sm:$0xff]  }
 0x152   :  { %12458 = vmatpush3.bf16.msra.mxu0 %v13853_v40  ;;  %v13896_v40 = vld [vmem:[#allocation6 + $0x940] sm:$0xff]  }
 0x153   :  { %12480 = vmatpush3.bf16.msra.mxu1 %v13855_v42  ;;  %12459 = vmatprep.subr.bf16.mxu0 %v13856_v43  ;;  %v13898_v43 = vld [vmem:[#allocation6 + $0x9c0] sm:$0xff]  }
 0x154   :  { %12481 = vmatprep.subr.bf16.mxu1 %v13858_v45 }
 0x156   :  { %12460 = vmatpush3.bf16.msra.mxu0 %v13857_v44 }
 0x157   :  { %12482 = vmatpush3.bf16.msra.mxu1 %v13859_v46  ;;  %12461 = vmatprep.subr.bf16.mxu0 %v13860_v47  ;;  %v130_v46 = vld [vmem:[#allocation3 + $0x128] sm:$0xff] }
 0x158   :  { %12483 = vmatprep.subr.bf16.mxu1 %v13862_v49  ;;  %v13899_v49 = vld [vmem:[#allocation6 + $0x980] sm:$0xff]  }
 0x15a   :  { %12462 = vmatpush3.bf16.msra.mxu0 %v13861_v48  ;;  %v255_v48 = vpack.c.bf16 %v130_v46, %v130_v46 }
 0x15b   :  { %12484 = vmatpush3.bf16.msra.mxu1 %v13863_v50  ;;  %12463 = vmatprep.subr.bf16.mxu0 %v13864_v52  ;;  %v129_v50 = vld [vmem:[#allocation3 + $0x120] sm:$0xff] }
 0x15c   :  { %12485 = vmatprep.subr.bf16.mxu1 %v13866_v56 }
 0x15e   :  { %12464 = vmatpush3.bf16.msra.mxu0 %v13865_v53  ;;  %v254_v53 = vpack.c.bf16 %v129_v50, %v129_v50 }
 0x15f   :  { %12486 = vmatpush3.bf16.msra.mxu1 %v13867_v60  ;;  %12493 = vmatprep.subr.bf16.mxu0 %v13868_v3  ;;  %v13904_v3 = vld [vmem:[#allocation6 + $0xa70] sm:$0xff]  }
 0x160   :  { %12515 = vmatprep.subr.bf16.mxu1 %v13870_v12  ;;  %v13913_v12 = vld [vmem:[#allocation6 + $0xa20] sm:$0xff]  }
 0x161   :  { %v12201_v51 = vpop.f32.mrf.mxu0  ;;  %9017 = vmatmul.mubr.bf16.vlgmr.msra.gmra.mxu0 %v250_v2  ;;  %v13903_v2 = vld [vmem:[#allocation6 + $0xab8] sm:$0xff]  }
 0x162   :  { %v12223_v55 = vpop.f32.mrf.mxu1  ;;  %12494 = vmatpush3.bf16.msra.mxu0 %v13869_v8  ;;  %9057 = vmatmul.mubr.bf16.vlgmr.msra.gmra.mxu1 %v252_v11  ;;  %v13909_v8 = vld [vmem:[#allocation6 + $0xa28] sm:$0xff]   ;;  %v13912_v11 = vld [vmem:[#allocation6 + $0xa60] sm:$0xff]  }
 0x163   :  { %v12202_v54 = vpop.f32.mrf.mxu0  ;;  %12516 = vmatpush3.bf16.msra.mxu1 %v13871_v14  ;;  %12495 = vmatprep.subr.bf16.mxu0 %v13872_v15  ;;  %v13915_v14 = vld [vmem:[#allocation6 + $0xaa0] sm:$0xff]   ;;  %v13916_v15 = vld [vmem:[#allocation6 + $0xa58] sm:$0xff]  }
 0x164   :  { %v12203_v58 = vadd.f32 %v12202_v54, %v12201_v51  ;;  %v12224_v62 = vpop.f32.mrf.mxu1  ;;  %12517 = vmatprep.subr.bf16.mxu1 %v13874_v17  ;;  %v13900_v54 = vld [vmem:[#allocation6 + $0xa78] sm:$0xff]   ;;  %9096 = vmatprep.mubr.bf16.mxu0 %v255_v48 }
 0x165   :  { %v12204_v61 = vpop.f32.mrf.mxu0  ;;  %v12225_v1 = vadd.f32 %v12224_v62, %v12223_v55  ;;  %v132_v55 = vld [vmem:[#allocation3 + $0x138] sm:$0xff]  ;;  %v13918_v17 = vld [vmem:[#allocation6 + $0xad8] sm:$0xff]  }
 0x166   :  { %v8539_v0 = vadd.f32 %v12203_v58, %v14780_v22  ;;  %v12226_v6 = vpop.f32.mrf.mxu1  ;;  %12496 = vmatpush3.bf16.msra.mxu0 %v13873_v16  ;;  %v13879_v22 = vld [vmem:[#allocation6 + $0x9a8] sm:$0xff]   ;;  %v257_v58 = vpack.c.bf16 %v132_v55, %v132_v55  ;;  %v13917_v16 = vld [vmem:[#allocation6 + $0xa18] sm:$0xff]   ;;  %v13936_v55 = vld [vmem:[#allocation6 + $0xb70] sm:$0xff]  }
 0x167   :  { %v12205_v5 = vpop.f32.mrf.mxu0  ;;  %12518 = vmatpush3.bf16.msra.mxu1 %v13875_v18  ;;  %12497 = vmatprep.subr.bf16.mxu0 %v13876_v19  ;;  %v131_v61 = vld [vmem:[#allocation3 + $0x130] sm:$0xff]  ;;  %v13907_v6 = vld [vmem:[#allocation6 + $0xab0] sm:$0xff]   ;;  %v13919_v18 = vld [vmem:[#allocation6 + $0xa98] sm:$0xff]  }
 0x168   :  { %v14783_v10 = vadd.f32 %v12225_v1, %v8539_v0  ;;  %v12227_v13 = vpop.f32.mrf.mxu1  ;;  %12519 = vmatprep.subr.bf16.mxu1 %v13878_v21  ;;  %9136 = vmatprep.mubr.bf16.mxu1 %v257_v58  ;;  %v256_v63 = vpack.c.bf16 %v131_v61, %v131_v61  ;;  %v13902_v0 = vld [vmem:[#allocation6 + $0xaf8] sm:$0xff]   ;;  %v13906_v5 = vld [vmem:[#allocation6 + $0xaf0] sm:$0xff]   ;;  %v13942_v61 = vld [vmem:[#allocation6 + $0xbe8] sm:$0xff]  }
 0x169   :  { %v13914_v13 = vld [vmem:[#allocation6 + $0xae0] sm:$0xff]   ;;  %v13920_v19 = vld [vmem:[#allocation6 + $0xa50] sm:$0xff]   ;;  %v13933_v48 = vld [vmem:[#allocation6 + $0xb38] sm:$0xff]  }
 0x16a   :  { %12498 = vmatpush3.bf16.msra.mxu0 %v13877_v20  ;;  %v13921_v20 = vld [vmem:[#allocation6 + $0xa10] sm:$0xff]  }
 0x16b   :  { %12520 = vmatpush3.bf16.msra.mxu1 %v13879_v22  ;;  %12499 = vmatprep.subr.bf16.mxu0 %v13880_v23  ;;  %v13922_v21 = vld [vmem:[#allocation6 + $0xad0] sm:$0xff]   ;;  %v13924_v23 = vld [vmem:[#allocation6 + $0xa48] sm:$0xff]  }
 0x16c   :  { %12521 = vmatprep.subr.bf16.mxu1 %v13882_v25  ;;  %v13923_v22 = vld [vmem:[#allocation6 + $0xa90] sm:$0xff]   ;;  %v13926_v25 = vld [vmem:[#allocation6 + $0xac8] sm:$0xff]  }
 0x16d   :  { %v13939_v58 = vld [vmem:[#allocation6 + $0xbb0] sm:$0xff]  }
 0x16e   :  { %12500 = vmatpush3.bf16.msra.mxu0 %v13881_v24  ;;  %v13925_v24 = vld [vmem:[#allocation6 + $0xa08] sm:$0xff]  }
 0x16f   :  { %12522 = vmatpush3.bf16.msra.mxu1 %v13883_v26  ;;  %12501 = vmatprep.subr.bf16.mxu0 %v13884_v27  ;;  %v13927_v27 = vld [vmem:[#allocation6 + $0xa88] sm:$0xff]  }
 0x170   :  { %12523 = vmatprep.subr.bf16.mxu1 %v13886_v29 }
 0x172   :  { %12502 = vmatpush3.bf16.msra.mxu0 %v13885_v28  ;;  %v13928_v28 = vld [vmem:[#allocation6 + $0xa40] sm:$0xff]  }
 0x173   :  { %12524 = vmatpush3.bf16.msra.mxu1 %v13887_v30  ;;  %12503 = vmatprep.subr.bf16.mxu0 %v13888_v31  ;;  %v13929_v30 = vld [vmem:[#allocation6 + $0xa00] sm:$0xff]  }
 0x174   :  { %12525 = vmatprep.subr.bf16.mxu1 %v13890_v33  ;;  %v13930_v33 = vld [vmem:[#allocation6 + $0xac0] sm:$0xff]  }
 0x176   :  { %12504 = vmatpush3.bf16.msra.mxu0 %v13889_v32 }
 0x177   :  { %12526 = vmatpush3.bf16.msra.mxu1 %v13891_v34  ;;  %12505 = vmatprep.subr.bf16.mxu0 %v13892_v35  ;;  %v134_v34 = vld [vmem:[#allocation3 + $0x148] sm:$0xff] }
 0x178   :  { %12527 = vmatprep.subr.bf16.mxu1 %v13894_v37  ;;  %v13931_v37 = vld [vmem:[#allocation6 + $0xa80] sm:$0xff]  }
 0x17a   :  { %12506 = vmatpush3.bf16.msra.mxu0 %v13893_v36  ;;  %v259_v36 = vpack.c.bf16 %v134_v34, %v134_v34 }
 0x17b   :  { %12528 = vmatpush3.bf16.msra.mxu1 %v13895_v38  ;;  %12507 = vmatprep.subr.bf16.mxu0 %v13896_v40  ;;  %v133_v38 = vld [vmem:[#allocation3 + $0x140] sm:$0xff] }
 0x17c   :  { %12529 = vmatprep.subr.bf16.mxu1 %v13898_v43 }
 0x17e   :  { %12508 = vmatpush3.bf16.msra.mxu0 %v13897_v41  ;;  %v258_v41 = vpack.c.bf16 %v133_v38, %v133_v38 }
 0x17f   :  { %12530 = vmatpush3.bf16.msra.mxu1 %v13899_v49  ;;  %12537 = vmatprep.subr.bf16.mxu0 %v13900_v54  ;;  %v135_v49 = vld [vmem:[#allocation3 + $0x150] sm:$0xff]  ;;  %v13935_v54 = vld [vmem:[#allocation6 + $0xbb8] sm:$0xff]  }
 0x180   :  { %12559 = vmatprep.subr.bf16.mxu1 %v13902_v0  ;;  %v13945_v0 = vld [vmem:[#allocation6 + $0xb20] sm:$0xff]  }
 0x181   :  { %v12245_v39 = vpop.f32.mrf.mxu0  ;;  %9097 = vmatmul.mubr.bf16.vlgmr.msra.gmra.mxu0 %v254_v53 }
 0x182   :  { %v12267_v45 = vpop.f32.mrf.mxu1  ;;  %12538 = vmatpush3.bf16.msra.mxu0 %v13901_v59  ;;  %9137 = vmatmul.mubr.bf16.vlgmr.msra.gmra.mxu1 %v256_v63  ;;  %v13940_v59 = vld [vmem:[#allocation6 + $0xb68] sm:$0xff]   ;;  %v13944_v63 = vld [vmem:[#allocation6 + $0xb60] sm:$0xff]  }
 0x183   :  { %v12246_v42 = vpop.f32.mrf.mxu0  ;;  %12560 = vmatpush3.bf16.msra.mxu1 %v13903_v2  ;;  %12539 = vmatprep.subr.bf16.mxu0 %v13904_v3  ;;  %v13947_v2 = vld [vmem:[#allocation6 + $0xba0] sm:$0xff]   ;;  %v13948_v3 = vld [vmem:[#allocation6 + $0xb58] sm:$0xff]  }
 0x184   :  { %v12247_v44 = vadd.f32 %v12246_v42, %v12245_v39  ;;  %v12268_v52 = vpop.f32.mrf.mxu1  ;;  %12561 = vmatprep.subr.bf16.mxu1 %v13906_v5  ;;  %v13932_v42 = vld [vmem:[#allocation6 + $0xb78] sm:$0xff]   ;;  %9176 = vmatprep.mubr.bf16.mxu0 %v259_v36 }
 0x185   :  { %v12248_v47 = vpop.f32.mrf.mxu0  ;;  %v12269_v56 = vadd.f32 %v12268_v52, %v12267_v45  ;;  %v136_v45 = vld [vmem:[#allocation3 + $0x158] sm:$0xff]  ;;  %v13934_v52 = vld [vmem:[#allocation6 + $0xbf8] sm:$0xff]  }
 0x186   :  { %v8619_v51 = vadd.f32 %v12247_v44, %v14783_v10  ;;  %v12270_v60 = vpop.f32.mrf.mxu1  ;;  %12540 = vmatpush3.bf16.msra.mxu0 %v13905_v4  ;;  %v13911_v10 = vld [vmem:[#allocation6 + $0xaa8] sm:$0xff]   ;;  %v261_v47 = vpack.c.bf16 %v136_v45, %v136_v45  ;;  %v13949_v4 = vld [vmem:[#allocation6 + $0xb18] sm:$0xff]   ;;  %v13970_v45 = vld [vmem:[#allocation6 + $0xcf0] sm:$0xff]  }
 0x187   :  { %v12249_v57 = vpop.f32.mrf.mxu0  ;;  %12562 = vmatpush3.bf16.msra.mxu1 %v13907_v6  ;;  %12541 = vmatprep.subr.bf16.mxu0 %v13908_v7  ;;  %v13941_v60 = vld [vmem:[#allocation6 + $0xb28] sm:$0xff]   ;;  %v13950_v5 = vld [vmem:[#allocation6 + $0xbd8] sm:$0xff]   ;;  %v13952_v7 = vld [vmem:[#allocation6 + $0xb50] sm:$0xff]  }
 0x188   :  { %v14786_v62 = vadd.f32 %v12269_v56, %v8619_v51  ;;  %v12271_v1 = vpop.f32.mrf.mxu1  ;;  %12563 = vmatprep.subr.bf16.mxu1 %v13910_v9  ;;  %v260_v51 = vpack.c.bf16 %v135_v49, %v135_v49  ;;  %9216 = vmatprep.mubr.bf16.mxu1 %v261_v47  ;;  %v13937_v56 = vld [vmem:[#allocation6 + $0xb30] sm:$0xff]   ;;  %v13951_v6 = vld [vmem:[#allocation6 + $0xb98] sm:$0xff]   ;;  %v13972_v47 = vld [vmem:[#allocation6 + $0xc68] sm:$0xff]  }
 0x189   :  { %v13938_v57 = vld [vmem:[#allocation6 + $0xbf0] sm:$0xff]   ;;  %v13946_v1 = vld [vmem:[#allocation6 + $0xbe0] sm:$0xff]   ;;  %v13965_v36 = vld [vmem:[#allocation6 + $0xc38] sm:$0xff]  }
 0x18a   :  { %12542 = vmatpush3.bf16.msra.mxu0 %v13909_v8  ;;  %v13953_v8 = vld [vmem:[#allocation6 + $0xb10] sm:$0xff]   ;;  %v13974_v49 = vld [vmem:[#allocation6 + $0xce8] sm:$0xff]  }
 0x18b   :  { %12564 = vmatpush3.bf16.msra.mxu1 %v13911_v10  ;;  %12543 = vmatprep.subr.bf16.mxu0 %v13912_v11  ;;  %v13954_v9 = vld [vmem:[#allocation6 + $0xbd0] sm:$0xff]   ;;  %v13956_v11 = vld [vmem:[#allocation6 + $0xb48] sm:$0xff]  }
 0x18c   :  { %12565 = vmatprep.subr.bf16.mxu1 %v13914_v13  ;;  %v13955_v10 = vld [vmem:[#allocation6 + $0xb90] sm:$0xff]   ;;  %v13958_v13 = vld [vmem:[#allocation6 + $0xbc8] sm:$0xff]  }
 0x18e   :  { %12544 = vmatpush3.bf16.msra.mxu0 %v13913_v12  ;;  %v13957_v12 = vld [vmem:[#allocation6 + $0xb08] sm:$0xff]  }
 0x18f   :  { %12566 = vmatpush3.bf16.msra.mxu1 %v13915_v14  ;;  %12545 = vmatprep.subr.bf16.mxu0 %v13916_v15  ;;  %v13959_v14 = vld [vmem:[#allocation6 + $0xb88] sm:$0xff]  }
 0x190   :  { %12567 = vmatprep.subr.bf16.mxu1 %v13918_v17  ;;  %v13961_v17 = vld [vmem:[#allocation6 + $0xb00] sm:$0xff]  }
 0x192   :  { %12546 = vmatpush3.bf16.msra.mxu0 %v13917_v16  ;;  %v13960_v16 = vld [vmem:[#allocation6 + $0xb40] sm:$0xff]  }
 0x193   :  { %12568 = vmatpush3.bf16.msra.mxu1 %v13919_v18  ;;  %12547 = vmatprep.subr.bf16.mxu0 %v13920_v19 }
 0x194   :  { %12569 = vmatprep.subr.bf16.mxu1 %v13922_v21  ;;  %v138_v21 = vld [vmem:[#allocation3 + $0x168] sm:$0xff] }
 0x196   :  { %12548 = vmatpush3.bf16.msra.mxu0 %v13921_v20  ;;  %v13962_v20 = vld [vmem:[#allocation6 + $0xbc0] sm:$0xff]  }
 0x197   :  { %12570 = vmatpush3.bf16.msra.mxu1 %v13923_v22  ;;  %12549 = vmatprep.subr.bf16.mxu0 %v13924_v23  ;;  %v263_v23 = vpack.c.bf16 %v138_v21, %v138_v21 }
 0x198   :  { %12571 = vmatprep.subr.bf16.mxu1 %v13926_v25 }
 0x19a   :  { %12550 = vmatpush3.bf16.msra.mxu0 %v13925_v24  ;;  %v13963_v24 = vld [vmem:[#allocation6 + $0xb80] sm:$0xff]  }
 0x19b   :  { %12572 = vmatpush3.bf16.msra.mxu1 %v13927_v27  ;;  %12551 = vmatprep.subr.bf16.mxu0 %v13928_v28  ;;  %v137_v27 = vld [vmem:[#allocation3 + $0x160] sm:$0xff] }
 0x19c   :  { %12573 = vmatprep.subr.bf16.mxu1 %v13930_v33 }
 0x19e   :  { %12552 = vmatpush3.bf16.msra.mxu0 %v13929_v30  ;;  %v262_v30 = vpack.c.bf16 %v137_v27, %v137_v27 }
 0x19f   :  { %12574 = vmatpush3.bf16.msra.mxu1 %v13931_v37  ;;  %12581 = vmatprep.subr.bf16.mxu0 %v13932_v42  ;;  %v139_v37 = vld [vmem:[#allocation3 + $0x170] sm:$0xff]  ;;  %v13967_v42 = vld [vmem:[#allocation6 + $0xcb8] sm:$0xff]  }
 0x1a0   :  { %12603 = vmatprep.subr.bf16.mxu1 %v13934_v52  ;;  %v13977_v52 = vld [vmem:[#allocation6 + $0xc20] sm:$0xff]  }
 0x1a1   :  { %v12289_v26 = vpop.f32.mrf.mxu0  ;;  %9177 = vmatmul.mubr.bf16.vlgmr.msra.gmra.mxu0 %v258_v41 }
 0x1a2   :  { %v12311_v32 = vpop.f32.mrf.mxu1  ;;  %12582 = vmatpush3.bf16.msra.mxu0 %v13933_v48  ;;  %9217 = vmatmul.mubr.bf16.vlgmr.msra.gmra.mxu1 %v260_v51  ;;  %v13973_v48 = vld [vmem:[#allocation6 + $0xc28] sm:$0xff]   ;;  %v13976_v51 = vld [vmem:[#allocation6 + $0xc60] sm:$0xff]  }
 0x1a3   :  { %v12290_v29 = vpop.f32.mrf.mxu0  ;;  %12604 = vmatpush3.bf16.msra.mxu1 %v13935_v54  ;;  %12583 = vmatprep.subr.bf16.mxu0 %v13936_v55  ;;  %v13979_v54 = vld [vmem:[#allocation6 + $0xca0] sm:$0xff]   ;;  %v13980_v55 = vld [vmem:[#allocation6 + $0xc58] sm:$0xff]  }
 0x1a4   :  { %v12291_v31 = vadd.f32 %v12290_v29, %v12289_v26  ;;  %v12312_v40 = vpop.f32.mrf.mxu1  ;;  %12605 = vmatprep.subr.bf16.mxu1 %v13938_v57  ;;  %9256 = vmatprep.mubr.bf16.mxu0 %v263_v23  ;;  %v13982_v57 = vld [vmem:[#allocation6 + $0xcd8] sm:$0xff]  }
 0x1a5   :  { %v12292_v35 = vpop.f32.mrf.mxu0  ;;  %v12313_v43 = vadd.f32 %v12312_v40, %v12311_v32  ;;  %v140_v32 = vld [vmem:[#allocation3 + $0x178] sm:$0xff]  ;;  %v13966_v40 = vld [vmem:[#allocation6 + $0xcf8] sm:$0xff]  }
 0x1a6   :  { %v8699_v39 = vadd.f32 %v12291_v31, %v14786_v62  ;;  %v12314_v46 = vpop.f32.mrf.mxu1  ;;  %12584 = vmatpush3.bf16.msra.mxu0 %v13937_v56  ;;  %v13943_v62 = vld [vmem:[#allocation6 + $0xba8] sm:$0xff]   ;;  %v13964_v31 = vld [vmem:[#allocation6 + $0xc78] sm:$0xff]   ;;  %v265_v35 = vpack.c.bf16 %v140_v32, %v140_v32  ;;  %v14001_v32 = vld [vmem:[#allocation6 + $0xd30] sm:$0xff]  }
 0x1a7   :  { %v12293_v44 = vpop.f32.mrf.mxu0  ;;  %12606 = vmatpush3.bf16.msra.mxu1 %v13939_v58  ;;  %12585 = vmatprep.subr.bf16.mxu0 %v13940_v59  ;;  %v13971_v46 = vld [vmem:[#allocation6 + $0xcb0] sm:$0xff]   ;;  %v13981_v56 = vld [vmem:[#allocation6 + $0xc18] sm:$0xff]  }
 0x1a8   :  { %v14789_v50 = vadd.f32 %v12313_v43, %v8699_v39  ;;  %v12315_v53 = vpop.f32.mrf.mxu1  ;;  %12607 = vmatprep.subr.bf16.mxu1 %v13942_v61  ;;  %v264_v39 = vpack.c.bf16 %v139_v37, %v139_v37  ;;  %9296 = vmatprep.mubr.bf16.mxu1 %v265_v35  ;;  %v13968_v43 = vld [vmem:[#allocation6 + $0xc70] sm:$0xff]   ;;  %v13983_v58 = vld [vmem:[#allocation6 + $0xc98] sm:$0xff]   ;;  %v14004_v35 = vld [vmem:[#allocation6 + $0xd68] sm:$0xff]  }
 0x1a9   :  { %v13969_v44 = vld [vmem:[#allocation6 + $0xc30] sm:$0xff]   ;;  %v13978_v53 = vld [vmem:[#allocation6 + $0xce0] sm:$0xff]   ;;  %v13997_v23 = vld [vmem:[#allocation6 + $0xd38] sm:$0xff]  }
 0x1aa   :  { %12586 = vmatpush3.bf16.msra.mxu0 %v13941_v60  ;;  %v13984_v59 = vld [vmem:[#allocation6 + $0xc50] sm:$0xff]   ;;  %v14006_v37 = vld [vmem:[#allocation6 + $0xde8] sm:$0xff]  }
 0x1ab   :  { %12608 = vmatpush3.bf16.msra.mxu1 %v13943_v62  ;;  %12587 = vmatprep.subr.bf16.mxu0 %v13944_v63  ;;  %v13985_v60 = vld [vmem:[#allocation6 + $0xc10] sm:$0xff]   ;;  %v13988_v63 = vld [vmem:[#allocation6 + $0xc48] sm:$0xff]  }
 0x1ac   :  { %12609 = vmatprep.subr.bf16.mxu1 %v13946_v1  ;;  %v13986_v61 = vld [vmem:[#allocation6 + $0xcd0] sm:$0xff]   ;;  %v13990_v1 = vld [vmem:[#allocation6 + $0xcc8] sm:$0xff]  }
 0x1ad   :  { %v13987_v62 = vld [vmem:[#allocation6 + $0xc90] sm:$0xff]  }
 0x1ae   :  { %12588 = vmatpush3.bf16.msra.mxu0 %v13945_v0  ;;  %v13989_v0 = vld [vmem:[#allocation6 + $0xc08] sm:$0xff]  }
 0x1af   :  { %12610 = vmatpush3.bf16.msra.mxu1 %v13947_v2  ;;  %12589 = vmatprep.subr.bf16.mxu0 %v13948_v3  ;;  %v13991_v2 = vld [vmem:[#allocation6 + $0xc88] sm:$0xff]  }
 0x1b0   :  { %12611 = vmatprep.subr.bf16.mxu1 %v13950_v5  ;;  %v13993_v5 = vld [vmem:[#allocation6 + $0xc00] sm:$0xff]  }
 0x1b2   :  { %12590 = vmatpush3.bf16.msra.mxu0 %v13949_v4  ;;  %v13992_v4 = vld [vmem:[#allocation6 + $0xc40] sm:$0xff]  }
 0x1b3   :  { %12612 = vmatpush3.bf16.msra.mxu1 %v13951_v6  ;;  %12591 = vmatprep.subr.bf16.mxu0 %v13952_v7  ;;  %v13994_v7 = vld [vmem:[#allocation6 + $0xcc0] sm:$0xff]  }
 0x1b4   :  { %12613 = vmatprep.subr.bf16.mxu1 %v13954_v9 }
 0x1b6   :  { %12592 = vmatpush3.bf16.msra.mxu0 %v13953_v8 }
 0x1b7   :  { %12614 = vmatpush3.bf16.msra.mxu1 %v13955_v10  ;;  %12593 = vmatprep.subr.bf16.mxu0 %v13956_v11  ;;  %v142_v10 = vld [vmem:[#allocation3 + $0x188] sm:$0xff] }
 0x1b8   :  { %12615 = vmatprep.subr.bf16.mxu1 %v13958_v13  ;;  %v13995_v13 = vld [vmem:[#allocation6 + $0xc80] sm:$0xff]  }
 0x1ba   :  { %12594 = vmatpush3.bf16.msra.mxu0 %v13957_v12  ;;  %v267_v12 = vpack.c.bf16 %v142_v10, %v142_v10 }
 0x1bb   :  { %12616 = vmatpush3.bf16.msra.mxu1 %v13959_v14  ;;  %12595 = vmatprep.subr.bf16.mxu0 %v13960_v16  ;;  %v141_v14 = vld [vmem:[#allocation3 + $0x180] sm:$0xff] }
 0x1bc   :  { %12617 = vmatprep.subr.bf16.mxu1 %v13962_v20 }
 0x1be   :  { %12596 = vmatpush3.bf16.msra.mxu0 %v13961_v17  ;;  %v266_v17 = vpack.c.bf16 %v141_v14, %v141_v14 }
 0x1bf   :  { %12618 = vmatpush3.bf16.msra.mxu1 %v13963_v24  ;;  %12625 = vmatprep.subr.bf16.mxu0 %v13964_v31  ;;  %v14000_v31 = vld [vmem:[#allocation6 + $0xd70] sm:$0xff]  }
 0x1c0   :  { %12647 = vmatprep.subr.bf16.mxu1 %v13966_v40  ;;  %v14009_v40 = vld [vmem:[#allocation6 + $0xd20] sm:$0xff]  }
 0x1c1   :  { %v12333_v15 = vpop.f32.mrf.mxu0  ;;  %9257 = vmatmul.mubr.bf16.vlgmr.msra.gmra.mxu0 %v262_v30  ;;  %v13999_v30 = vld [vmem:[#allocation6 + $0xdb8] sm:$0xff]  }
 0x1c2   :  { %v12355_v19 = vpop.f32.mrf.mxu1  ;;  %12626 = vmatpush3.bf16.msra.mxu0 %v13965_v36  ;;  %9297 = vmatmul.mubr.bf16.vlgmr.msra.gmra.mxu1 %v264_v39  ;;  %v14005_v36 = vld [vmem:[#allocation6 + $0xd28] sm:$0xff]   ;;  %v14008_v39 = vld [vmem:[#allocation6 + $0xd60] sm:$0xff]  }
 0x1c3   :  { %v12334_v18 = vpop.f32.mrf.mxu0  ;;  %12648 = vmatpush3.bf16.msra.mxu1 %v13967_v42  ;;  %12627 = vmatprep.subr.bf16.mxu0 %v13968_v43  ;;  %v14011_v42 = vld [vmem:[#allocation6 + $0xda0] sm:$0xff]   ;;  %v14012_v43 = vld [vmem:[#allocation6 + $0xd58] sm:$0xff]  }
 0x1c4   :  { %v12335_v22 = vadd.f32 %v12334_v18, %v12333_v15  ;;  %v12356_v26 = vpop.f32.mrf.mxu1  ;;  %12649 = vmatprep.subr.bf16.mxu1 %v13970_v45  ;;  %v13996_v18 = vld [vmem:[#allocation6 + $0xd78] sm:$0xff]   ;;  %9336 = vmatprep.mubr.bf16.mxu0 %v267_v12 }
 0x1c5   :  { %v12336_v25 = vpop.f32.mrf.mxu0  ;;  %v12357_v29 = vadd.f32 %v12356_v26, %v12355_v19  ;;  %v144_v19 = vld [vmem:[#allocation3 + $0x198] sm:$0xff]  ;;  %v14014_v45 = vld [vmem:[#allocation6 + $0xdd8] sm:$0xff]  }
 0x1c6   :  { %v8779_v28 = vadd.f32 %v12335_v22, %v14789_v50  ;;  %v12358_v34 = vpop.f32.mrf.mxu1  ;;  %12628 = vmatpush3.bf16.msra.mxu0 %v13969_v44  ;;  %v13975_v50 = vld [vmem:[#allocation6 + $0xca8] sm:$0xff]   ;;  %v269_v22 = vpack.c.bf16 %v144_v19, %v144_v19  ;;  %v14013_v44 = vld [vmem:[#allocation6 + $0xd18] sm:$0xff]   ;;  %v14032_v19 = vld [vmem:[#allocation6 + $0xe70] sm:$0xff]  }
 0x1c7   :  { %v12337_v33 = vpop.f32.mrf.mxu0  ;;  %12650 = vmatpush3.bf16.msra.mxu1 %v13971_v46  ;;  %12629 = vmatprep.subr.bf16.mxu0 %v13972_v47  ;;  %v143_v25 = vld [vmem:[#allocation3 + $0x190] sm:$0xff]  ;;  %v14003_v34 = vld [vmem:[#allocation6 + $0xdb0] sm:$0xff]   ;;  %v14015_v46 = vld [vmem:[#allocation6 + $0xd98] sm:$0xff]  }
 0x1c8   :  { %v14792_v38 = vadd.f32 %v12357_v29, %v8779_v28  ;;  %v12359_v41 = vpop.f32.mrf.mxu1  ;;  %12651 = vmatprep.subr.bf16.mxu1 %v13974_v49  ;;  %9376 = vmatprep.mubr.bf16.mxu1 %v269_v22  ;;  %v268_v27 = vpack.c.bf16 %v143_v25, %v143_v25  ;;  %v13998_v28 = vld [vmem:[#allocation6 + $0xdf8] sm:$0xff]   ;;  %v14002_v33 = vld [vmem:[#allocation6 + $0xdf0] sm:$0xff]   ;;  %v14038_v25 = vld [vmem:[#allocation6 + $0xee8] sm:$0xff]  }
 0x1c9   :  { %v14010_v41 = vld [vmem:[#allocation6 + $0xde0] sm:$0xff]   ;;  %v14016_v47 = vld [vmem:[#allocation6 + $0xd50] sm:$0xff]   ;;  %v14029_v12 = vld [vmem:[#allocation6 + $0xe38] sm:$0xff]  }
 0x1ca   :  { %12630 = vmatpush3.bf16.msra.mxu0 %v13973_v48  ;;  %v14017_v48 = vld [vmem:[#allocation6 + $0xd10] sm:$0xff]  }
 0x1cb   :  { %12652 = vmatpush3.bf16.msra.mxu1 %v13975_v50  ;;  %12631 = vmatprep.subr.bf16.mxu0 %v13976_v51  ;;  %v14018_v49 = vld [vmem:[#allocation6 + $0xdd0] sm:$0xff]   ;;  %v14020_v51 = vld [vmem:[#allocation6 + $0xd48] sm:$0xff]  }
 0x1cc   :  { %12653 = vmatprep.subr.bf16.mxu1 %v13978_v53  ;;  %v14019_v50 = vld [vmem:[#allocation6 + $0xd90] sm:$0xff]   ;;  %v14022_v53 = vld [vmem:[#allocation6 + $0xdc8] sm:$0xff]  }
 0x1cd   :  { %v14035_v22 = vld [vmem:[#allocation6 + $0xeb0] sm:$0xff]  }
 0x1ce   :  { %12632 = vmatpush3.bf16.msra.mxu0 %v13977_v52  ;;  %v14021_v52 = vld [vmem:[#allocation6 + $0xd08] sm:$0xff]  }
 0x1cf   :  { %12654 = vmatpush3.bf16.msra.mxu1 %v13979_v54  ;;  %12633 = vmatprep.subr.bf16.mxu0 %v13980_v55  ;;  %v14023_v55 = vld [vmem:[#allocation6 + $0xd88] sm:$0xff]  }
 0x1d0   :  { %12655 = vmatprep.subr.bf16.mxu1 %v13982_v57 }
 0x1d2   :  { %12634 = vmatpush3.bf16.msra.mxu0 %v13981_v56  ;;  %v14024_v56 = vld [vmem:[#allocation6 + $0xd40] sm:$0xff]  }
 0x1d3   :  { %12656 = vmatpush3.bf16.msra.mxu1 %v13983_v58  ;;  %12635 = vmatprep.subr.bf16.mxu0 %v13984_v59  ;;  %v14025_v58 = vld [vmem:[#allocation6 + $0xd00] sm:$0xff]  }
 0x1d4   :  { %12657 = vmatprep.subr.bf16.mxu1 %v13986_v61  ;;  %v14026_v61 = vld [vmem:[#allocation6 + $0xdc0] sm:$0xff]  }
 0x1d6   :  { %12636 = vmatpush3.bf16.msra.mxu0 %v13985_v60 }
 0x1d7   :  { %12658 = vmatpush3.bf16.msra.mxu1 %v13987_v62  ;;  %12637 = vmatprep.subr.bf16.mxu0 %v13988_v63  ;;  %v146_v62 = vld [vmem:[#allocation3 + $0x1a8] sm:$0xff] }
 0x1d8   :  { %12659 = vmatprep.subr.bf16.mxu1 %v13990_v1  ;;  %v14027_v1 = vld [vmem:[#allocation6 + $0xd80] sm:$0xff]  }
 0x1da   :  { %12638 = vmatpush3.bf16.msra.mxu0 %v13989_v0  ;;  %v271_v0 = vpack.c.bf16 %v146_v62, %v146_v62 }
 0x1db   :  { %12660 = vmatpush3.bf16.msra.mxu1 %v13991_v2  ;;  %12639 = vmatprep.subr.bf16.mxu0 %v13992_v4  ;;  %v145_v2 = vld [vmem:[#allocation3 + $0x1a0] sm:$0xff] }
 0x1dc   :  { %12661 = vmatprep.subr.bf16.mxu1 %v13994_v7 }
 0x1de   :  { %12640 = vmatpush3.bf16.msra.mxu0 %v13993_v5  ;;  %v270_v5 = vpack.c.bf16 %v145_v2, %v145_v2 }
 0x1df   :  { %12662 = vmatpush3.bf16.msra.mxu1 %v13995_v13  ;;  %12669 = vmatprep.subr.bf16.mxu0 %v13996_v18  ;;  %v147_v13 = vld [vmem:[#allocation3 + $0x1b0] sm:$0xff]  ;;  %v14031_v18 = vld [vmem:[#allocation6 + $0xeb8] sm:$0xff]  }
 0x1e0   :  { %12691 = vmatprep.subr.bf16.mxu1 %v13998_v28  ;;  %v14041_v28 = vld [vmem:[#allocation6 + $0xe20] sm:$0xff]  }
 0x1e1   :  { %v12377_v3 = vpop.f32.mrf.mxu0  ;;  %9337 = vmatmul.mubr.bf16.vlgmr.msra.gmra.mxu0 %v266_v17 }
 0x1e2   :  { %v12399_v9 = vpop.f32.mrf.mxu1  ;;  %12670 = vmatpush3.bf16.msra.mxu0 %v13997_v23  ;;  %9377 = vmatmul.mubr.bf16.vlgmr.msra.gmra.mxu1 %v268_v27  ;;  %v14036_v23 = vld [vmem:[#allocation6 + $0xe68] sm:$0xff]   ;;  %v14040_v27 = vld [vmem:[#allocation6 + $0xe60] sm:$0xff]  }
 0x1e3   :  { %v12378_v6 = vpop.f32.mrf.mxu0  ;;  %12692 = vmatpush3.bf16.msra.mxu1 %v13999_v30  ;;  %12671 = vmatprep.subr.bf16.mxu0 %v14000_v31  ;;  %v14043_v30 = vld [vmem:[#allocation6 + $0xea0] sm:$0xff]   ;;  %v14044_v31 = vld [vmem:[#allocation6 + $0xe58] sm:$0xff]  }
 0x1e4   :  { %v12379_v8 = vadd.f32 %v12378_v6, %v12377_v3  ;;  %v12400_v16 = vpop.f32.mrf.mxu1  ;;  %12693 = vmatprep.subr.bf16.mxu1 %v14002_v33  ;;  %v14028_v6 = vld [vmem:[#allocation6 + $0xe78] sm:$0xff]   ;;  %9416 = vmatprep.mubr.bf16.mxu0 %v271_v0 }
 0x1e5   :  { %v12380_v11 = vpop.f32.mrf.mxu0  ;;  %v12401_v20 = vadd.f32 %v12400_v16, %v12399_v9  ;;  %v148_v9 = vld [vmem:[#allocation3 + $0x1b8] sm:$0xff]  ;;  %v14030_v16 = vld [vmem:[#allocation6 + $0xef8] sm:$0xff]  }
 0x1e6   :  { %v8859_v15 = vadd.f32 %v12379_v8, %v14792_v38  ;;  %v12402_v24 = vpop.f32.mrf.mxu1  ;;  %12672 = vmatpush3.bf16.msra.mxu0 %v14001_v32  ;;  %v14007_v38 = vld [vmem:[#allocation6 + $0xda8] sm:$0xff]   ;;  %v273_v11 = vpack.c.bf16 %v148_v9, %v148_v9  ;;  %v14045_v32 = vld [vmem:[#allocation6 + $0xe18] sm:$0xff]   ;;  %v14066_v9 = vld [vmem:[#allocation6 + $0xff0] sm:$0xff]  }
 0x1e7   :  { %v12381_v21 = vpop.f32.mrf.mxu0  ;;  %12694 = vmatpush3.bf16.msra.mxu1 %v14003_v34  ;;  %12673 = vmatprep.subr.bf16.mxu0 %v14004_v35  ;;  %v14037_v24 = vld [vmem:[#allocation6 + $0xe28] sm:$0xff]   ;;  %v14046_v33 = vld [vmem:[#allocation6 + $0xed8] sm:$0xff]   ;;  %v14048_v35 = vld [vmem:[#allocation6 + $0xe50] sm:$0xff]  }
 0x1e8   :  { %v14795_v26 = vadd.f32 %v12401_v20, %v8859_v15  ;;  %v12403_v29 = vpop.f32.mrf.mxu1  ;;  %12695 = vmatprep.subr.bf16.mxu1 %v14006_v37  ;;  %v272_v15 = vpack.c.bf16 %v147_v13, %v147_v13  ;;  %9456 = vmatprep.mubr.bf16.mxu1 %v273_v11  ;;  %v14033_v20 = vld [vmem:[#allocation6 + $0xe30] sm:$0xff]   ;;  %v14047_v34 = vld [vmem:[#allocation6 + $0xe98] sm:$0xff]   ;;  %v14068_v11 = vld [vmem:[#allocation6 + $0xf68] sm:$0xff]  }
 0x1e9   :  { %v14034_v21 = vld [vmem:[#allocation6 + $0xef0] sm:$0xff]   ;;  %v14042_v29 = vld [vmem:[#allocation6 + $0xee0] sm:$0xff]   ;;  %v14061_v0 = vld [vmem:[#allocation6 + $0xf38] sm:$0xff]  }
 0x1ea   :  { %12674 = vmatpush3.bf16.msra.mxu0 %v14005_v36  ;;  %v14049_v36 = vld [vmem:[#allocation6 + $0xe10] sm:$0xff]   ;;  %v14070_v13 = vld [vmem:[#allocation6 + $0xfe8] sm:$0xff]  }
 0x1eb   :  { %12696 = vmatpush3.bf16.msra.mxu1 %v14007_v38  ;;  %12675 = vmatprep.subr.bf16.mxu0 %v14008_v39  ;;  %v14050_v37 = vld [vmem:[#allocation6 + $0xed0] sm:$0xff]   ;;  %v14052_v39 = vld [vmem:[#allocation6 + $0xe48] sm:$0xff]  }
 0x1ec   :  { %12697 = vmatprep.subr.bf16.mxu1 %v14010_v41  ;;  %v14051_v38 = vld [vmem:[#allocation6 + $0xe90] sm:$0xff]   ;;  %v14054_v41 = vld [vmem:[#allocation6 + $0xec8] sm:$0xff]  }
 0x1ee   :  { %12676 = vmatpush3.bf16.msra.mxu0 %v14009_v40  ;;  %v14053_v40 = vld [vmem:[#allocation6 + $0xe08] sm:$0xff]  }
 0x1ef   :  { %12698 = vmatpush3.bf16.msra.mxu1 %v14011_v42  ;;  %12677 = vmatprep.subr.bf16.mxu0 %v14012_v43  ;;  %v14055_v42 = vld [vmem:[#allocation6 + $0xe88] sm:$0xff]  }
 0x1f0   :  { %12699 = vmatprep.subr.bf16.mxu1 %v14014_v45  ;;  %v14057_v45 = vld [vmem:[#allocation6 + $0xe00] sm:$0xff]  }
 0x1f2   :  { %12678 = vmatpush3.bf16.msra.mxu0 %v14013_v44  ;;  %v14056_v44 = vld [vmem:[#allocation6 + $0xe40] sm:$0xff]  }
 0x1f3   :  { %12700 = vmatpush3.bf16.msra.mxu1 %v14015_v46  ;;  %12679 = vmatprep.subr.bf16.mxu0 %v14016_v47 }
 0x1f4   :  { %12701 = vmatprep.subr.bf16.mxu1 %v14018_v49  ;;  %v150_v49 = vld [vmem:[#allocation3 + $0x1c8] sm:$0xff] }
 0x1f6   :  { %12680 = vmatpush3.bf16.msra.mxu0 %v14017_v48  ;;  %v14058_v48 = vld [vmem:[#allocation6 + $0xec0] sm:$0xff]  }
 0x1f7   :  { %12702 = vmatpush3.bf16.msra.mxu1 %v14019_v50  ;;  %12681 = vmatprep.subr.bf16.mxu0 %v14020_v51  ;;  %v275_v51 = vpack.c.bf16 %v150_v49, %v150_v49 }
 0x1f8   :  { %12703 = vmatprep.subr.bf16.mxu1 %v14022_v53 }
 0x1fa   :  { %12682 = vmatpush3.bf16.msra.mxu0 %v14021_v52  ;;  %v14059_v52 = vld [vmem:[#allocation6 + $0xe80] sm:$0xff]  }
 0x1fb   :  { %12704 = vmatpush3.bf16.msra.mxu1 %v14023_v55  ;;  %12683 = vmatprep.subr.bf16.mxu0 %v14024_v56  ;;  %v149_v55 = vld [vmem:[#allocation3 + $0x1c0] sm:$0xff] }
 0x1fc   :  { %12705 = vmatprep.subr.bf16.mxu1 %v14026_v61 }
 0x1fe   :  { %12684 = vmatpush3.bf16.msra.mxu0 %v14025_v58  ;;  %v274_v58 = vpack.c.bf16 %v149_v55, %v149_v55 }
 0x1ff   :  { %12706 = vmatpush3.bf16.msra.mxu1 %v14027_v1  ;;  %12713 = vmatprep.subr.bf16.mxu0 %v14028_v6  ;;  %v151_v1 = vld [vmem:[#allocation3 + $0x1d0] sm:$0xff]  ;;  %v14063_v6 = vld [vmem:[#allocation6 + $0xfb8] sm:$0xff]  }
 0x200   :  { %12735 = vmatprep.subr.bf16.mxu1 %v14030_v16  ;;  %v14073_v16 = vld [vmem:[#allocation6 + $0xf20] sm:$0xff]  }
 0x201   :  { %v12421_v54 = vpop.f32.mrf.mxu0  ;;  %9417 = vmatmul.mubr.bf16.vlgmr.msra.gmra.mxu0 %v270_v5 }
 0x202   :  { %v12443_v60 = vpop.f32.mrf.mxu1  ;;  %12714 = vmatpush3.bf16.msra.mxu0 %v14029_v12  ;;  %9457 = vmatmul.mubr.bf16.vlgmr.msra.gmra.mxu1 %v272_v15  ;;  %v14069_v12 = vld [vmem:[#allocation6 + $0xf28] sm:$0xff]   ;;  %v14072_v15 = vld [vmem:[#allocation6 + $0xf60] sm:$0xff]  }
 0x203   :  { %v12422_v57 = vpop.f32.mrf.mxu0  ;;  %12736 = vmatpush3.bf16.msra.mxu1 %v14031_v18  ;;  %12715 = vmatprep.subr.bf16.mxu0 %v14032_v19  ;;  %v14075_v18 = vld [vmem:[#allocation6 + $0xfa0] sm:$0xff]   ;;  %v14076_v19 = vld [vmem:[#allocation6 + $0xf58] sm:$0xff]  }
 0x204   :  { %v12423_v59 = vadd.f32 %v12422_v57, %v12421_v54  ;;  %v12444_v4 = vpop.f32.mrf.mxu1  ;;  %12737 = vmatprep.subr.bf16.mxu1 %v14034_v21  ;;  %9496 = vmatprep.mubr.bf16.mxu0 %v275_v51  ;;  %v14078_v21 = vld [vmem:[#allocation6 + $0xfd8] sm:$0xff]  }
 0x205   :  { %v12424_v63 = vpop.f32.mrf.mxu0  ;;  %v12445_v7 = vadd.f32 %v12444_v4, %v12443_v60  ;;  %v152_v60 = vld [vmem:[#allocation3 + $0x1d8] sm:$0xff]  ;;  %v14062_v4 = vld [vmem:[#allocation6 + $0xff8] sm:$0xff]  }
 0x206   :  { %v8939_v3 = vadd.f32 %v12423_v59, %v14795_v26  ;;  %v12446_v10 = vpop.f32.mrf.mxu1  ;;  %12716 = vmatpush3.bf16.msra.mxu0 %v14033_v20  ;;  %v14039_v26 = vld [vmem:[#allocation6 + $0xea8] sm:$0xff]   ;;  %v14060_v59 = vld [vmem:[#allocation6 + $0xf78] sm:$0xff]   ;;  %v277_v63 = vpack.c.bf16 %v152_v60, %v152_v60  ;;  %v14097_v60 = vld [vmem:[#allocation6 + $0x1030] sm:$0xff]  }
 0x207   :  { %v12425_v8 = vpop.f32.mrf.mxu0  ;;  %12738 = vmatpush3.bf16.msra.mxu1 %v14035_v22  ;;  %12717 = vmatprep.subr.bf16.mxu0 %v14036_v23  ;;  %v14067_v10 = vld [vmem:[#allocation6 + $0xfb0] sm:$0xff]   ;;  %v14077_v20 = vld [vmem:[#allocation6 + $0xf18] sm:$0xff]  }
 0x208   :  { %v14798_v14 = vadd.f32 %v12445_v7, %v8939_v3  ;;  %v12447_v17 = vpop.f32.mrf.mxu1  ;;  %12739 = vmatprep.subr.bf16.mxu1 %v14038_v25  ;;  %v276_v3 = vpack.c.bf16 %v151_v1, %v151_v1  ;;  %9536 = vmatprep.mubr.bf16.mxu1 %v277_v63  ;;  %v14064_v7 = vld [vmem:[#allocation6 + $0xf70] sm:$0xff]   ;;  %v14079_v22 = vld [vmem:[#allocation6 + $0xf98] sm:$0xff]   ;;  %v14100_v63 = vld [vmem:[#allocation6 + $0x1068] sm:$0xff]  }
 0x209   :  { %v14065_v8 = vld [vmem:[#allocation6 + $0xf30] sm:$0xff]   ;;  %v14074_v17 = vld [vmem:[#allocation6 + $0xfe0] sm:$0xff]   ;;  %v14093_v51 = vld [vmem:[#allocation6 + $0x1038] sm:$0xff]  }
 0x20a   :  { %12718 = vmatpush3.bf16.msra.mxu0 %v14037_v24  ;;  %v14080_v23 = vld [vmem:[#allocation6 + $0xf50] sm:$0xff]   ;;  %v14102_v1 = vld [vmem:[#allocation6 + $0x10e8] sm:$0xff]  }
 0x20b   :  { %12740 = vmatpush3.bf16.msra.mxu1 %v14039_v26  ;;  %12719 = vmatprep.subr.bf16.mxu0 %v14040_v27  ;;  %v14081_v24 = vld [vmem:[#allocation6 + $0xf10] sm:$0xff]   ;;  %v14084_v27 = vld [vmem:[#allocation6 + $0xf48] sm:$0xff]  }
 0x20c   :  { %12741 = vmatprep.subr.bf16.mxu1 %v14042_v29  ;;  %v14082_v25 = vld [vmem:[#allocation6 + $0xfd0] sm:$0xff]   ;;  %v14086_v29 = vld [vmem:[#allocation6 + $0xfc8] sm:$0xff]  }
 0x20d   :  { %v14083_v26 = vld [vmem:[#allocation6 + $0xf90] sm:$0xff]  }
 0x20e   :  { %12720 = vmatpush3.bf16.msra.mxu0 %v14041_v28  ;;  %v14085_v28 = vld [vmem:[#allocation6 + $0xf08] sm:$0xff]  }
 0x20f   :  { %12742 = vmatpush3.bf16.msra.mxu1 %v14043_v30  ;;  %12721 = vmatprep.subr.bf16.mxu0 %v14044_v31  ;;  %v14087_v30 = vld [vmem:[#allocation6 + $0xf88] sm:$0xff]  }
 0x210   :  { %12743 = vmatprep.subr.bf16.mxu1 %v14046_v33  ;;  %v14089_v33 = vld [vmem:[#allocation6 + $0xf00] sm:$0xff]  }
 0x212   :  { %12722 = vmatpush3.bf16.msra.mxu0 %v14045_v32  ;;  %v14088_v32 = vld [vmem:[#allocation6 + $0xf40] sm:$0xff]  }
 0x213   :  { %12744 = vmatpush3.bf16.msra.mxu1 %v14047_v34  ;;  %12723 = vmatprep.subr.bf16.mxu0 %v14048_v35  ;;  %v14090_v35 = vld [vmem:[#allocation6 + $0xfc0] sm:$0xff]  }
 0x214   :  { %12745 = vmatprep.subr.bf16.mxu1 %v14050_v37 }
 0x216   :  { %12724 = vmatpush3.bf16.msra.mxu0 %v14049_v36 }
 0x217   :  { %12746 = vmatpush3.bf16.msra.mxu1 %v14051_v38  ;;  %12725 = vmatprep.subr.bf16.mxu0 %v14052_v39  ;;  %v154_v38 = vld [vmem:[#allocation3 + $0x1e8] sm:$0xff] }
 0x218   :  { %12747 = vmatprep.subr.bf16.mxu1 %v14054_v41  ;;  %v14091_v41 = vld [vmem:[#allocation6 + $0xf80] sm:$0xff]  }
 0x21a   :  { %12726 = vmatpush3.bf16.msra.mxu0 %v14053_v40  ;;  %v279_v40 = vpack.c.bf16 %v154_v38, %v154_v38 }
 0x21b   :  { %12748 = vmatpush3.bf16.msra.mxu1 %v14055_v42  ;;  %12727 = vmatprep.subr.bf16.mxu0 %v14056_v44  ;;  %v153_v42 = vld [vmem:[#allocation3 + $0x1e0] sm:$0xff] }
 0x21c   :  { %12749 = vmatprep.subr.bf16.mxu1 %v14058_v48 }
 0x21e   :  { %12728 = vmatpush3.bf16.msra.mxu0 %v14057_v45  ;;  %v278_v45 = vpack.c.bf16 %v153_v42, %v153_v42 }
 0x21f   :  { %12750 = vmatpush3.bf16.msra.mxu1 %v14059_v52  ;;  %12757 = vmatprep.subr.bf16.mxu0 %v14060_v59  ;;  %v14096_v59 = vld [vmem:[#allocation6 + $0x1070] sm:$0xff]  }
 0x220   :  { %12779 = vmatprep.subr.bf16.mxu1 %v14062_v4  ;;  %v14105_v4 = vld [vmem:[#allocation6 + $0x1020] sm:$0xff]  }
 0x221   :  { %v12465_v43 = vpop.f32.mrf.mxu0  ;;  %9497 = vmatmul.mubr.bf16.vlgmr.msra.gmra.mxu0 %v274_v58  ;;  %v14095_v58 = vld [vmem:[#allocation6 + $0x10b8] sm:$0xff]  }
 0x222   :  { %v12487_v47 = vpop.f32.mrf.mxu1  ;;  %12758 = vmatpush3.bf16.msra.mxu0 %v14061_v0  ;;  %9537 = vmatmul.mubr.bf16.vlgmr.msra.gmra.mxu1 %v276_v3  ;;  %v14101_v0 = vld [vmem:[#allocation6 + $0x1028] sm:$0xff]   ;;  %v14104_v3 = vld [vmem:[#allocation6 + $0x1060] sm:$0xff]  }
 0x223   :  { %v12466_v46 = vpop.f32.mrf.mxu0  ;;  %12780 = vmatpush3.bf16.msra.mxu1 %v14063_v6  ;;  %12759 = vmatprep.subr.bf16.mxu0 %v14064_v7  ;;  %v14107_v6 = vld [vmem:[#allocation6 + $0x10a0] sm:$0xff]   ;;  %v14108_v7 = vld [vmem:[#allocation6 + $0x1058] sm:$0xff]  }
 0x224   :  { %v12467_v50 = vadd.f32 %v12466_v46, %v12465_v43  ;;  %v12488_v54 = vpop.f32.mrf.mxu1  ;;  %12781 = vmatprep.subr.bf16.mxu1 %v14066_v9  ;;  %v14092_v46 = vld [vmem:[#allocation6 + $0x1078] sm:$0xff]   ;;  %9576 = vmatprep.mubr.bf16.mxu0 %v279_v40 }
 0x225   :  { %v12468_v53 = vpop.f32.mrf.mxu0  ;;  %v12489_v57 = vadd.f32 %v12488_v54, %v12487_v47  ;;  %v156_v47 = vld [vmem:[#allocation3 + $0x1f8] sm:$0xff]  ;;  %v14110_v9 = vld [vmem:[#allocation6 + $0x10d8] sm:$0xff]  }
 0x226   :  { %v9019_v56 = vadd.f32 %v12467_v50, %v14798_v14  ;;  %v12490_v62 = vpop.f32.mrf.mxu1  ;;  %12760 = vmatpush3.bf16.msra.mxu0 %v14065_v8  ;;  %v14071_v14 = vld [vmem:[#allocation6 + $0xfa8] sm:$0xff]   ;;  %v281_v50 = vpack.c.bf16 %v156_v47, %v156_v47  ;;  %v14109_v8 = vld [vmem:[#allocation6 + $0x1018] sm:$0xff]   ;;  %v14128_v47 = vld [vmem:[#allocation6 + $0x1170] sm:$0xff]  }
 0x227   :  { %v12469_v61 = vpop.f32.mrf.mxu0  ;;  %12782 = vmatpush3.bf16.msra.mxu1 %v14067_v10  ;;  %12761 = vmatprep.subr.bf16.mxu0 %v14068_v11  ;;  %v155_v53 = vld [vmem:[#allocation3 + $0x1f0] sm:$0xff]  ;;  %v14099_v62 = vld [vmem:[#allocation6 + $0x10b0] sm:$0xff]   ;;  %v14111_v10 = vld [vmem:[#allocation6 + $0x1098] sm:$0xff]  }
 0x228   :  { %v14801_v2 = vadd.f32 %v12489_v57, %v9019_v56  ;;  %v12491_v5 = vpop.f32.mrf.mxu1  ;;  %12783 = vmatprep.subr.bf16.mxu1 %v14070_v13  ;;  %9616 = vmatprep.mubr.bf16.mxu1 %v281_v50  ;;  %v280_v55 = vpack.c.bf16 %v155_v53, %v155_v53  ;;  %v14094_v56 = vld [vmem:[#allocation6 + $0x10f8] sm:$0xff]   ;;  %v14098_v61 = vld [vmem:[#allocation6 + $0x10f0] sm:$0xff]   ;;  %v14134_v53 = vld [vmem:[#allocation6 + $0x11e8] sm:$0xff]  }
 0x229   :  { %v14106_v5 = vld [vmem:[#allocation6 + $0x10e0] sm:$0xff]   ;;  %v14112_v11 = vld [vmem:[#allocation6 + $0x1050] sm:$0xff]   ;;  %v14125_v40 = vld [vmem:[#allocation6 + $0x1138] sm:$0xff]  }
 0x22a   :  { %12762 = vmatpush3.bf16.msra.mxu0 %v14069_v12  ;;  %v14113_v12 = vld [vmem:[#allocation6 + $0x1010] sm:$0xff]  }
 0x22b   :  { %12784 = vmatpush3.bf16.msra.mxu1 %v14071_v14  ;;  %12763 = vmatprep.subr.bf16.mxu0 %v14072_v15  ;;  %v14114_v13 = vld [vmem:[#allocation6 + $0x10d0] sm:$0xff]   ;;  %v14116_v15 = vld [vmem:[#allocation6 + $0x1048] sm:$0xff]  }
 0x22c   :  { %12785 = vmatprep.subr.bf16.mxu1 %v14074_v17  ;;  %v14115_v14 = vld [vmem:[#allocation6 + $0x1090] sm:$0xff]   ;;  %v14118_v17 = vld [vmem:[#allocation6 + $0x10c8] sm:$0xff]  }
 0x22d   :  { %v14131_v50 = vld [vmem:[#allocation6 + $0x11b0] sm:$0xff]  }
 0x22e   :  { %12764 = vmatpush3.bf16.msra.mxu0 %v14073_v16  ;;  %v14117_v16 = vld [vmem:[#allocation6 + $0x1008] sm:$0xff]  }
 0x22f   :  { %12786 = vmatpush3.bf16.msra.mxu1 %v14075_v18  ;;  %12765 = vmatprep.subr.bf16.mxu0 %v14076_v19  ;;  %v14119_v19 = vld [vmem:[#allocation6 + $0x1088] sm:$0xff]  }
 0x230   :  { %12787 = vmatprep.subr.bf16.mxu1 %v14078_v21 }
 0x232   :  { %12766 = vmatpush3.bf16.msra.mxu0 %v14077_v20  ;;  %v14120_v20 = vld [vmem:[#allocation6 + $0x1040] sm:$0xff]  }
 0x233   :  { %12788 = vmatpush3.bf16.msra.mxu1 %v14079_v22  ;;  %12767 = vmatprep.subr.bf16.mxu0 %v14080_v23  ;;  %v14121_v22 = vld [vmem:[#allocation6 + $0x1000] sm:$0xff]  }
 0x234   :  { %12789 = vmatprep.subr.bf16.mxu1 %v14082_v25  ;;  %v14122_v25 = vld [vmem:[#allocation6 + $0x10c0] sm:$0xff]  }
 0x236   :  { %12768 = vmatpush3.bf16.msra.mxu0 %v14081_v24 }
 0x237   :  { %12790 = vmatpush3.bf16.msra.mxu1 %v14083_v26  ;;  %12769 = vmatprep.subr.bf16.mxu0 %v14084_v27  ;;  %v158_v26 = vld [vmem:[#allocation3 + $0x208] sm:$0xff] }
 0x238   :  { %12791 = vmatprep.subr.bf16.mxu1 %v14086_v29  ;;  %v14123_v29 = vld [vmem:[#allocation6 + $0x1080] sm:$0xff]  }
 0x23a   :  { %12770 = vmatpush3.bf16.msra.mxu0 %v14085_v28  ;;  %v283_v28 = vpack.c.bf16 %v158_v26, %v158_v26 }
 0x23b   :  { %12792 = vmatpush3.bf16.msra.mxu1 %v14087_v30  ;;  %12771 = vmatprep.subr.bf16.mxu0 %v14088_v32  ;;  %v157_v30 = vld [vmem:[#allocation3 + $0x200] sm:$0xff] }
 0x23c   :  { %12793 = vmatprep.subr.bf16.mxu1 %v14090_v35 }
 0x23e   :  { %12772 = vmatpush3.bf16.msra.mxu0 %v14089_v33  ;;  %v282_v33 = vpack.c.bf16 %v157_v30, %v157_v30 }
 0x23f   :  { %12794 = vmatpush3.bf16.msra.mxu1 %v14091_v41  ;;  %12801 = vmatprep.subr.bf16.mxu0 %v14092_v46  ;;  %v159_v41 = vld [vmem:[#allocation3 + $0x210] sm:$0xff]  ;;  %v14127_v46 = vld [vmem:[#allocation6 + $0x11b8] sm:$0xff]  }
 0x240   :  { %12823 = vmatprep.subr.bf16.mxu1 %v14094_v56  ;;  %v14137_v56 = vld [vmem:[#allocation6 + $0x1120] sm:$0xff]  }
 0x241   :  { %v12509_v31 = vpop.f32.mrf.mxu0  ;;  %9577 = vmatmul.mubr.bf16.vlgmr.msra.gmra.mxu0 %v278_v45 }
 0x242   :  { %v12531_v37 = vpop.f32.mrf.mxu1  ;;  %12802 = vmatpush3.bf16.msra.mxu0 %v14093_v51  ;;  %9617 = vmatmul.mubr.bf16.vlgmr.msra.gmra.mxu1 %v280_v55  ;;  %v14132_v51 = vld [vmem:[#allocation6 + $0x1168] sm:$0xff]   ;;  %v14136_v55 = vld [vmem:[#allocation6 + $0x1160] sm:$0xff]  }
 0x243   :  { %v12510_v34 = vpop.f32.mrf.mxu0  ;;  %12824 = vmatpush3.bf16.msra.mxu1 %v14095_v58  ;;  %12803 = vmatprep.subr.bf16.mxu0 %v14096_v59  ;;  %v14139_v58 = vld [vmem:[#allocation6 + $0x11a0] sm:$0xff]   ;;  %v14140_v59 = vld [vmem:[#allocation6 + $0x1158] sm:$0xff]  }
 0x244   :  { %v12511_v36 = vadd.f32 %v12510_v34, %v12509_v31  ;;  %v12532_v44 = vpop.f32.mrf.mxu1  ;;  %12825 = vmatprep.subr.bf16.mxu1 %v14098_v61  ;;  %v14124_v34 = vld [vmem:[#allocation6 + $0x1178] sm:$0xff]   ;;  %9656 = vmatprep.mubr.bf16.mxu0 %v283_v28 }
 0x245   :  { %v12512_v39 = vpop.f32.mrf.mxu0  ;;  %v12533_v48 = vadd.f32 %v12532_v44, %v12531_v37  ;;  %v160_v37 = vld [vmem:[#allocation3 + $0x218] sm:$0xff]  ;;  %v14126_v44 = vld [vmem:[#allocation6 + $0x11f8] sm:$0xff]  }
 0x246   :  { %v9099_v43 = vadd.f32 %v12511_v36, %v14801_v2  ;;  %v12534_v52 = vpop.f32.mrf.mxu1  ;;  %12804 = vmatpush3.bf16.msra.mxu0 %v14097_v60  ;;  %v14103_v2 = vld [vmem:[#allocation6 + $0x10a8] sm:$0xff]   ;;  %v285_v39 = vpack.c.bf16 %v160_v37, %v160_v37  ;;  %v14141_v60 = vld [vmem:[#allocation6 + $0x1118] sm:$0xff]   ;;  %v14162_v37 = vld [vmem:[#allocation6 + $0x12f0] sm:$0xff]  }
 0x247   :  { %v12513_v49 = vpop.f32.mrf.mxu0  ;;  %12826 = vmatpush3.bf16.msra.mxu1 %v14099_v62  ;;  %12805 = vmatprep.subr.bf16.mxu0 %v14100_v63  ;;  %v14133_v52 = vld [vmem:[#allocation6 + $0x1128] sm:$0xff]   ;;  %v14142_v61 = vld [vmem:[#allocation6 + $0x11d8] sm:$0xff]   ;;  %v14144_v63 = vld [vmem:[#allocation6 + $0x1150] sm:$0xff]  }
 0x248   :  { %v14804_v54 = vadd.f32 %v12533_v48, %v9099_v43  ;;  %v12535_v57 = vpop.f32.mrf.mxu1  ;;  %12827 = vmatprep.subr.bf16.mxu1 %v14102_v1  ;;  %v284_v43 = vpack.c.bf16 %v159_v41, %v159_v41  ;;  %9696 = vmatprep.mubr.bf16.mxu1 %v285_v39  ;;  %v14129_v48 = vld [vmem:[#allocation6 + $0x1130] sm:$0xff]   ;;  %v14143_v62 = vld [vmem:[#allocation6 + $0x1198] sm:$0xff]   ;;  %v14164_v39 = vld [vmem:[#allocation6 + $0x1268] sm:$0xff]  }
 0x249   :  { %v14130_v49 = vld [vmem:[#allocation6 + $0x11f0] sm:$0xff]   ;;  %v14138_v57 = vld [vmem:[#allocation6 + $0x11e0] sm:$0xff]   ;;  %v14157_v28 = vld [vmem:[#allocation6 + $0x1238] sm:$0xff]  }
 0x24a   :  { %12806 = vmatpush3.bf16.msra.mxu0 %v14101_v0  ;;  %v14145_v0 = vld [vmem:[#allocation6 + $0x1110] sm:$0xff]   ;;  %v14166_v41 = vld [vmem:[#allocation6 + $0x12e8] sm:$0xff]  }
 0x24b   :  { %12828 = vmatpush3.bf16.msra.mxu1 %v14103_v2  ;;  %12807 = vmatprep.subr.bf16.mxu0 %v14104_v3  ;;  %v14146_v1 = vld [vmem:[#allocation6 + $0x11d0] sm:$0xff]   ;;  %v14148_v3 = vld [vmem:[#allocation6 + $0x1148] sm:$0xff]  }
 0x24c   :  { %12829 = vmatprep.subr.bf16.mxu1 %v14106_v5  ;;  %v14147_v2 = vld [vmem:[#allocation6 + $0x1190] sm:$0xff]   ;;  %v14150_v5 = vld [vmem:[#allocation6 + $0x11c8] sm:$0xff]  }
 0x24e   :  { %12808 = vmatpush3.bf16.msra.mxu0 %v14105_v4  ;;  %v14149_v4 = vld [vmem:[#allocation6 + $0x1108] sm:$0xff]  }
 0x24f   :  { %12830 = vmatpush3.bf16.msra.mxu1 %v14107_v6  ;;  %12809 = vmatprep.subr.bf16.mxu0 %v14108_v7  ;;  %v14151_v6 = vld [vmem:[#allocation6 + $0x1188] sm:$0xff]  }
 0x250   :  { %12831 = vmatprep.subr.bf16.mxu1 %v14110_v9  ;;  %v14153_v9 = vld [vmem:[#allocation6 + $0x1100] sm:$0xff]  }
 0x252   :  { %12810 = vmatpush3.bf16.msra.mxu0 %v14109_v8  ;;  %v14152_v8 = vld [vmem:[#allocation6 + $0x1140] sm:$0xff]  }
 0x253   :  { %12832 = vmatpush3.bf16.msra.mxu1 %v14111_v10  ;;  %12811 = vmatprep.subr.bf16.mxu0 %v14112_v11 }
 0x254   :  { %12833 = vmatprep.subr.bf16.mxu1 %v14114_v13  ;;  %v162_v13 = vld [vmem:[#allocation3 + $0x228] sm:$0xff] }
 0x256   :  { %12812 = vmatpush3.bf16.msra.mxu0 %v14113_v12  ;;  %v14154_v12 = vld [vmem:[#allocation6 + $0x11c0] sm:$0xff]  }
 0x257   :  { %12834 = vmatpush3.bf16.msra.mxu1 %v14115_v14  ;;  %12813 = vmatprep.subr.bf16.mxu0 %v14116_v15  ;;  %v287_v15 = vpack.c.bf16 %v162_v13, %v162_v13 }
 0x258   :  { %12835 = vmatprep.subr.bf16.mxu1 %v14118_v17 }
 0x25a   :  { %12814 = vmatpush3.bf16.msra.mxu0 %v14117_v16  ;;  %v14155_v16 = vld [vmem:[#allocation6 + $0x1180] sm:$0xff]  }
 0x25b   :  { %12836 = vmatpush3.bf16.msra.mxu1 %v14119_v19  ;;  %12815 = vmatprep.subr.bf16.mxu0 %v14120_v20  ;;  %v161_v19 = vld [vmem:[#allocation3 + $0x220] sm:$0xff] }
 0x25c   :  { %12837 = vmatprep.subr.bf16.mxu1 %v14122_v25 }
 0x25e   :  { %12816 = vmatpush3.bf16.msra.mxu0 %v14121_v22  ;;  %v286_v22 = vpack.c.bf16 %v161_v19, %v161_v19 }
 0x25f   :  { %12838 = vmatpush3.bf16.msra.mxu1 %v14123_v29  ;;  %12845 = vmatprep.subr.bf16.mxu0 %v14124_v34  ;;  %v163_v29 = vld [vmem:[#allocation3 + $0x230] sm:$0xff]  ;;  %v14159_v34 = vld [vmem:[#allocation6 + $0x12b8] sm:$0xff]  }
 0x260   :  { %12867 = vmatprep.subr.bf16.mxu1 %v14126_v44  ;;  %v14169_v44 = vld [vmem:[#allocation6 + $0x1220] sm:$0xff]  }
 0x261   :  { %v12553_v18 = vpop.f32.mrf.mxu0  ;;  %9657 = vmatmul.mubr.bf16.vlgmr.msra.gmra.mxu0 %v282_v33 }
 0x262   :  { %v12575_v24 = vpop.f32.mrf.mxu1  ;;  %12846 = vmatpush3.bf16.msra.mxu0 %v14125_v40  ;;  %9697 = vmatmul.mubr.bf16.vlgmr.msra.gmra.mxu1 %v284_v43  ;;  %v14165_v40 = vld [vmem:[#allocation6 + $0x1228] sm:$0xff]   ;;  %v14168_v43 = vld [vmem:[#allocation6 + $0x1260] sm:$0xff]  }
 0x263   :  { %v12554_v21 = vpop.f32.mrf.mxu0  ;;  %12868 = vmatpush3.bf16.msra.mxu1 %v14127_v46  ;;  %12847 = vmatprep.subr.bf16.mxu0 %v14128_v47  ;;  %v14171_v46 = vld [vmem:[#allocation6 + $0x12a0] sm:$0xff]   ;;  %v14172_v47 = vld [vmem:[#allocation6 + $0x1258] sm:$0xff]  }
 0x264   :  { %v12555_v23 = vadd.f32 %v12554_v21, %v12553_v18  ;;  %v12576_v32 = vpop.f32.mrf.mxu1  ;;  %12869 = vmatprep.subr.bf16.mxu1 %v14130_v49  ;;  %9736 = vmatprep.mubr.bf16.mxu0 %v287_v15  ;;  %v14174_v49 = vld [vmem:[#allocation6 + $0x12d8] sm:$0xff]  }
 0x265   :  { %v12556_v27 = vpop.f32.mrf.mxu0  ;;  %v12577_v35 = vadd.f32 %v12576_v32, %v12575_v24  ;;  %v164_v24 = vld [vmem:[#allocation3 + $0x238] sm:$0xff]  ;;  %v14158_v32 = vld [vmem:[#allocation6 + $0x12f8] sm:$0xff]  }
 0x266   :  { %v9179_v31 = vadd.f32 %v12555_v23, %v14804_v54  ;;  %v12578_v38 = vpop.f32.mrf.mxu1  ;;  %12848 = vmatpush3.bf16.msra.mxu0 %v14129_v48  ;;  %v14135_v54 = vld [vmem:[#allocation6 + $0x11a8] sm:$0xff]   ;;  %v14156_v23 = vld [vmem:[#allocation6 + $0x1278] sm:$0xff]   ;;  %v289_v27 = vpack.c.bf16 %v164_v24, %v164_v24  ;;  %v14193_v24 = vld [vmem:[#allocation6 + $0x1330] sm:$0xff]  }
 0x267   :  { %v12557_v36 = vpop.f32.mrf.mxu0  ;;  %12870 = vmatpush3.bf16.msra.mxu1 %v14131_v50  ;;  %12849 = vmatprep.subr.bf16.mxu0 %v14132_v51  ;;  %v14163_v38 = vld [vmem:[#allocation6 + $0x12b0] sm:$0xff]   ;;  %v14173_v48 = vld [vmem:[#allocation6 + $0x1218] sm:$0xff]  }
 0x268   :  { %v14807_v42 = vadd.f32 %v12577_v35, %v9179_v31  ;;  %v12579_v45 = vpop.f32.mrf.mxu1  ;;  %12871 = vmatprep.subr.bf16.mxu1 %v14134_v53  ;;  %v288_v31 = vpack.c.bf16 %v163_v29, %v163_v29  ;;  %9776 = vmatprep.mubr.bf16.mxu1 %v289_v27  ;;  %v14160_v35 = vld [vmem:[#allocation6 + $0x1270] sm:$0xff]   ;;  %v14175_v50 = vld [vmem:[#allocation6 + $0x1298] sm:$0xff]   ;;  %v14196_v27 = vld [vmem:[#allocation6 + $0x1368] sm:$0xff]  }
 0x269   :  { %v14161_v36 = vld [vmem:[#allocation6 + $0x1230] sm:$0xff]   ;;  %v14170_v45 = vld [vmem:[#allocation6 + $0x12e0] sm:$0xff]   ;;  %v14189_v15 = vld [vmem:[#allocation6 + $0x1338] sm:$0xff]  }
 0x26a   :  { %12850 = vmatpush3.bf16.msra.mxu0 %v14133_v52  ;;  %v14176_v51 = vld [vmem:[#allocation6 + $0x1250] sm:$0xff]   ;;  %v14198_v29 = vld [vmem:[#allocation6 + $0x13e8] sm:$0xff]  }
 0x26b   :  { %12872 = vmatpush3.bf16.msra.mxu1 %v14135_v54  ;;  %12851 = vmatprep.subr.bf16.mxu0 %v14136_v55  ;;  %v14177_v52 = vld [vmem:[#allocation6 + $0x1210] sm:$0xff]   ;;  %v14180_v55 = vld [vmem:[#allocation6 + $0x1248] sm:$0xff]  }
 0x26c   :  { %12873 = vmatprep.subr.bf16.mxu1 %v14138_v57  ;;  %v14178_v53 = vld [vmem:[#allocation6 + $0x12d0] sm:$0xff]   ;;  %v14182_v57 = vld [vmem:[#allocation6 + $0x12c8] sm:$0xff]  }
 0x26d   :  { %v14179_v54 = vld [vmem:[#allocation6 + $0x1290] sm:$0xff]  }
 0x26e   :  { %12852 = vmatpush3.bf16.msra.mxu0 %v14137_v56  ;;  %v14181_v56 = vld [vmem:[#allocation6 + $0x1208] sm:$0xff]  }
 0x26f   :  { %12874 = vmatpush3.bf16.msra.mxu1 %v14139_v58  ;;  %12853 = vmatprep.subr.bf16.mxu0 %v14140_v59  ;;  %v14183_v58 = vld [vmem:[#allocation6 + $0x1288] sm:$0xff]  }
 0x270   :  { %12875 = vmatprep.subr.bf16.mxu1 %v14142_v61  ;;  %v14185_v61 = vld [vmem:[#allocation6 + $0x1200] sm:$0xff]  }
 0x272   :  { %12854 = vmatpush3.bf16.msra.mxu0 %v14141_v60  ;;  %v14184_v60 = vld [vmem:[#allocation6 + $0x1240] sm:$0xff]  }
 0x273   :  { %12876 = vmatpush3.bf16.msra.mxu1 %v14143_v62  ;;  %12855 = vmatprep.subr.bf16.mxu0 %v14144_v63  ;;  %v14186_v63 = vld [vmem:[#allocation6 + $0x12c0] sm:$0xff]  }
 0x274   :  { %12877 = vmatprep.subr.bf16.mxu1 %v14146_v1 }
 0x276   :  { %12856 = vmatpush3.bf16.msra.mxu0 %v14145_v0 }
 0x277   :  { %12878 = vmatpush3.bf16.msra.mxu1 %v14147_v2  ;;  %12857 = vmatprep.subr.bf16.mxu0 %v14148_v3  ;;  %v166_v2 = vld [vmem:[#allocation3 + $0x248] sm:$0xff] }
 0x278   :  { %12879 = vmatprep.subr.bf16.mxu1 %v14150_v5  ;;  %v14187_v5 = vld [vmem:[#allocation6 + $0x1280] sm:$0xff]  }
 0x27a   :  { %12858 = vmatpush3.bf16.msra.mxu0 %v14149_v4  ;;  %v291_v4 = vpack.c.bf16 %v166_v2, %v166_v2 }
 0x27b   :  { %12880 = vmatpush3.bf16.msra.mxu1 %v14151_v6  ;;  %12859 = vmatprep.subr.bf16.mxu0 %v14152_v8  ;;  %v165_v6 = vld [vmem:[#allocation3 + $0x240] sm:$0xff] }
 0x27c   :  { %12881 = vmatprep.subr.bf16.mxu1 %v14154_v12 }
 0x27e   :  { %12860 = vmatpush3.bf16.msra.mxu0 %v14153_v9  ;;  %v290_v9 = vpack.c.bf16 %v165_v6, %v165_v6 }
 0x27f   :  { %12882 = vmatpush3.bf16.msra.mxu1 %v14155_v16  ;;  %12889 = vmatprep.subr.bf16.mxu0 %v14156_v23  ;;  %v14192_v23 = vld [vmem:[#allocation6 + $0x1370] sm:$0xff]  }
 0x280   :  { %12911 = vmatprep.subr.bf16.mxu1 %v14158_v32  ;;  %v14201_v32 = vld [vmem:[#allocation6 + $0x1320] sm:$0xff]  }
 0x281   :  { %v12597_v7 = vpop.f32.mrf.mxu0  ;;  %9737 = vmatmul.mubr.bf16.vlgmr.msra.gmra.mxu0 %v286_v22  ;;  %v14191_v22 = vld [vmem:[#allocation6 + $0x13b8] sm:$0xff]  }
 0x282   :  { %v12619_v11 = vpop.f32.mrf.mxu1  ;;  %12890 = vmatpush3.bf16.msra.mxu0 %v14157_v28  ;;  %9777 = vmatmul.mubr.bf16.vlgmr.msra.gmra.mxu1 %v288_v31  ;;  %v14197_v28 = vld [vmem:[#allocation6 + $0x1328] sm:$0xff]   ;;  %v14200_v31 = vld [vmem:[#allocation6 + $0x1360] sm:$0xff]  }
 0x283   :  { %v12598_v10 = vpop.f32.mrf.mxu0  ;;  %12912 = vmatpush3.bf16.msra.mxu1 %v14159_v34  ;;  %12891 = vmatprep.subr.bf16.mxu0 %v14160_v35  ;;  %v14203_v34 = vld [vmem:[#allocation6 + $0x13a0] sm:$0xff]   ;;  %v14204_v35 = vld [vmem:[#allocation6 + $0x1358] sm:$0xff]  }
 0x284   :  { %v12599_v14 = vadd.f32 %v12598_v10, %v12597_v7  ;;  %v12620_v18 = vpop.f32.mrf.mxu1  ;;  %12913 = vmatprep.subr.bf16.mxu1 %v14162_v37  ;;  %v14188_v10 = vld [vmem:[#allocation6 + $0x1378] sm:$0xff]   ;;  %9816 = vmatprep.mubr.bf16.mxu0 %v291_v4 }
 0x285   :  { %v12600_v17 = vpop.f32.mrf.mxu0  ;;  %v12621_v21 = vadd.f32 %v12620_v18, %v12619_v11  ;;  %v168_v11 = vld [vmem:[#allocation3 + $0x258] sm:$0xff]  ;;  %v14206_v37 = vld [vmem:[#allocation6 + $0x13d8] sm:$0xff]  }
 0x286   :  { %v9259_v20 = vadd.f32 %v12599_v14, %v14807_v42  ;;  %v12622_v26 = vpop.f32.mrf.mxu1  ;;  %12892 = vmatpush3.bf16.msra.mxu0 %v14161_v36  ;;  %v14167_v42 = vld [vmem:[#allocation6 + $0x12a8] sm:$0xff]   ;;  %v293_v14 = vpack.c.bf16 %v168_v11, %v168_v11  ;;  %v14205_v36 = vld [vmem:[#allocation6 + $0x1318] sm:$0xff]   ;;  %v14224_v11 = vld [vmem:[#allocation6 + $0x1470] sm:$0xff]  }
 0x287   :  { %v12601_v25 = vpop.f32.mrf.mxu0  ;;  %12914 = vmatpush3.bf16.msra.mxu1 %v14163_v38  ;;  %12893 = vmatprep.subr.bf16.mxu0 %v14164_v39  ;;  %v167_v17 = vld [vmem:[#allocation3 + $0x250] sm:$0xff]  ;;  %v14195_v26 = vld [vmem:[#allocation6 + $0x13b0] sm:$0xff]   ;;  %v14207_v38 = vld [vmem:[#allocation6 + $0x1398] sm:$0xff]  }
 0x288   :  { %v14810_v30 = vadd.f32 %v12621_v21, %v9259_v20  ;;  %v12623_v33 = vpop.f32.mrf.mxu1  ;;  %12915 = vmatprep.subr.bf16.mxu1 %v14166_v41  ;;  %9856 = vmatprep.mubr.bf16.mxu1 %v293_v14  ;;  %v292_v19 = vpack.c.bf16 %v167_v17, %v167_v17  ;;  %v14190_v20 = vld [vmem:[#allocation6 + $0x13f8] sm:$0xff]   ;;  %v14194_v25 = vld [vmem:[#allocation6 + $0x13f0] sm:$0xff]   ;;  %v14230_v17 = vld [vmem:[#allocation6 + $0x14e8] sm:$0xff]  }
 0x289   :  { %v14202_v33 = vld [vmem:[#allocation6 + $0x13e0] sm:$0xff]   ;;  %v14208_v39 = vld [vmem:[#allocation6 + $0x1350] sm:$0xff]   ;;  %v14221_v4 = vld [vmem:[#allocation6 + $0x1438] sm:$0xff]  }
 0x28a   :  { %12894 = vmatpush3.bf16.msra.mxu0 %v14165_v40  ;;  %v14209_v40 = vld [vmem:[#allocation6 + $0x1310] sm:$0xff]  }
 0x28b   :  { %12916 = vmatpush3.bf16.msra.mxu1 %v14167_v42  ;;  %12895 = vmatprep.subr.bf16.mxu0 %v14168_v43  ;;  %v14210_v41 = vld [vmem:[#allocation6 + $0x13d0] sm:$0xff]   ;;  %v14212_v43 = vld [vmem:[#allocation6 + $0x1348] sm:$0xff]  }
 0x28c   :  { %12917 = vmatprep.subr.bf16.mxu1 %v14170_v45  ;;  %v14211_v42 = vld [vmem:[#allocation6 + $0x1390] sm:$0xff]   ;;  %v14214_v45 = vld [vmem:[#allocation6 + $0x13c8] sm:$0xff]  }
 0x28d   :  { %v14227_v14 = vld [vmem:[#allocation6 + $0x14b0] sm:$0xff]  }
 0x28e   :  { %12896 = vmatpush3.bf16.msra.mxu0 %v14169_v44  ;;  %v14213_v44 = vld [vmem:[#allocation6 + $0x1308] sm:$0xff]  }
 0x28f   :  { %12918 = vmatpush3.bf16.msra.mxu1 %v14171_v46  ;;  %12897 = vmatprep.subr.bf16.mxu0 %v14172_v47  ;;  %v14215_v47 = vld [vmem:[#allocation6 + $0x1388] sm:$0xff]  }
 0x290   :  { %12919 = vmatprep.subr.bf16.mxu1 %v14174_v49 }
 0x292   :  { %12898 = vmatpush3.bf16.msra.mxu0 %v14173_v48  ;;  %v14216_v48 = vld [vmem:[#allocation6 + $0x1340] sm:$0xff]  }
 0x293   :  { %12920 = vmatpush3.bf16.msra.mxu1 %v14175_v50  ;;  %12899 = vmatprep.subr.bf16.mxu0 %v14176_v51  ;;  %v14217_v50 = vld [vmem:[#allocation6 + $0x1300] sm:$0xff]  }
 0x294   :  { %12921 = vmatprep.subr.bf16.mxu1 %v14178_v53  ;;  %v14218_v53 = vld [vmem:[#allocation6 + $0x13c0] sm:$0xff]  }
 0x296   :  { %12900 = vmatpush3.bf16.msra.mxu0 %v14177_v52 }
 0x297   :  { %12922 = vmatpush3.bf16.msra.mxu1 %v14179_v54  ;;  %12901 = vmatprep.subr.bf16.mxu0 %v14180_v55  ;;  %v170_v54 = vld [vmem:[#allocation3 + $0x268] sm:$0xff] }
 0x298   :  { %12923 = vmatprep.subr.bf16.mxu1 %v14182_v57  ;;  %v14219_v57 = vld [vmem:[#allocation6 + $0x1380] sm:$0xff]  }
 0x29a   :  { %12902 = vmatpush3.bf16.msra.mxu0 %v14181_v56  ;;  %v295_v56 = vpack.c.bf16 %v170_v54, %v170_v54 }
 0x29b   :  { %12924 = vmatpush3.bf16.msra.mxu1 %v14183_v58  ;;  %12903 = vmatprep.subr.bf16.mxu0 %v14184_v60  ;;  %v169_v58 = vld [vmem:[#allocation3 + $0x260] sm:$0xff] }
 0x29c   :  { %12925 = vmatprep.subr.bf16.mxu1 %v14186_v63 }
 0x29e   :  { %12904 = vmatpush3.bf16.msra.mxu0 %v14185_v61  ;;  %v294_v61 = vpack.c.bf16 %v169_v58, %v169_v58 }
 0x29f   :  { %12926 = vmatpush3.bf16.msra.mxu1 %v14187_v5  ;;  %12933 = vmatprep.subr.bf16.mxu0 %v14188_v10  ;;  %v171_v5 = vld [vmem:[#allocation3 + $0x270] sm:$0xff]  ;;  %v14223_v10 = vld [vmem:[#allocation6 + $0x14b8] sm:$0xff]  }
 0x2a0   :  { %12955 = vmatprep.subr.bf16.mxu1 %v14190_v20  ;;  %v14233_v20 = vld [vmem:[#allocation6 + $0x1420] sm:$0xff]  }
 0x2a1   :  { %v12641_v59 = vpop.f32.mrf.mxu0  ;;  %9817 = vmatmul.mubr.bf16.vlgmr.msra.gmra.mxu0 %v290_v9 }
 0x2a2   :  { %v12663_v1 = vpop.f32.mrf.mxu1  ;;  %12934 = vmatpush3.bf16.msra.mxu0 %v14189_v15  ;;  %9857 = vmatmul.mubr.bf16.vlgmr.msra.gmra.mxu1 %v292_v19  ;;  %v14228_v15 = vld [vmem:[#allocation6 + $0x1468] sm:$0xff]   ;;  %v14232_v19 = vld [vmem:[#allocation6 + $0x1460] sm:$0xff]  }
 0x2a3   :  { %v12642_v62 = vpop.f32.mrf.mxu0  ;;  %12956 = vmatpush3.bf16.msra.mxu1 %v14191_v22  ;;  %12935 = vmatprep.subr.bf16.mxu0 %v14192_v23  ;;  %v14235_v22 = vld [vmem:[#allocation6 + $0x14a0] sm:$0xff]   ;;  %v14236_v23 = vld [vmem:[#allocation6 + $0x1458] sm:$0xff]  }
 0x2a4   :  { %v12643_v0 = vadd.f32 %v12642_v62, %v12641_v59  ;;  %v12664_v8 = vpop.f32.mrf.mxu1  ;;  %12957 = vmatprep.subr.bf16.mxu1 %v14194_v25  ;;  %v14220_v62 = vld [vmem:[#allocation6 + $0x1478] sm:$0xff]   ;;  %9896 = vmatprep.mubr.bf16.mxu0 %v295_v56 }
 0x2a5   :  { %v12644_v3 = vpop.f32.mrf.mxu0  ;;  %v12665_v12 = vadd.f32 %v12664_v8, %v12663_v1  ;;  %v172_v1 = vld [vmem:[#allocation3 + $0x278] sm:$0xff]  ;;  %v14222_v8 = vld [vmem:[#allocation6 + $0x14f8] sm:$0xff]  }
 0x2a6   :  { %v9339_v7 = vadd.f32 %v12643_v0, %v14810_v30  ;;  %v12666_v16 = vpop.f32.mrf.mxu1  ;;  %12936 = vmatpush3.bf16.msra.mxu0 %v14193_v24  ;;  %v14199_v30 = vld [vmem:[#allocation6 + $0x13a8] sm:$0xff]   ;;  %v297_v3 = vpack.c.bf16 %v172_v1, %v172_v1  ;;  %v14237_v24 = vld [vmem:[#allocation6 + $0x1418] sm:$0xff]   ;;  %v14258_v1 = vld [vmem:[#allocation6 + $0x15f0] sm:$0xff]  }
 0x2a7   :  { %v12645_v13 = vpop.f32.mrf.mxu0  ;;  %12958 = vmatpush3.bf16.msra.mxu1 %v14195_v26  ;;  %12937 = vmatprep.subr.bf16.mxu0 %v14196_v27  ;;  %v14229_v16 = vld [vmem:[#allocation6 + $0x1428] sm:$0xff]   ;;  %v14238_v25 = vld [vmem:[#allocation6 + $0x14d8] sm:$0xff]   ;;  %v14240_v27 = vld [vmem:[#allocation6 + $0x1450] sm:$0xff]  }
 0x2a8   :  { %v14813_v18 = vadd.f32 %v12665_v12, %v9339_v7  ;;  %v12667_v21 = vpop.f32.mrf.mxu1  ;;  %12959 = vmatprep.subr.bf16.mxu1 %v14198_v29  ;;  %v296_v7 = vpack.c.bf16 %v171_v5, %v171_v5  ;;  %9936 = vmatprep.mubr.bf16.mxu1 %v297_v3  ;;  %v14225_v12 = vld [vmem:[#allocation6 + $0x1430] sm:$0xff]   ;;  %v14239_v26 = vld [vmem:[#allocation6 + $0x1498] sm:$0xff]   ;;  %v14260_v3 = vld [vmem:[#allocation6 + $0x1568] sm:$0xff]  }
 0x2a9   :  { %v14226_v13 = vld [vmem:[#allocation6 + $0x14f0] sm:$0xff]   ;;  %v14234_v21 = vld [vmem:[#allocation6 + $0x14e0] sm:$0xff]   ;;  %v14253_v56 = vld [vmem:[#allocation6 + $0x1538] sm:$0xff]  }
 0x2aa   :  { %12938 = vmatpush3.bf16.msra.mxu0 %v14197_v28  ;;  %v14241_v28 = vld [vmem:[#allocation6 + $0x1410] sm:$0xff]   ;;  %v14262_v5 = vld [vmem:[#allocation6 + $0x15e8] sm:$0xff]  }
 0x2ab   :  { %12960 = vmatpush3.bf16.msra.mxu1 %v14199_v30  ;;  %12939 = vmatprep.subr.bf16.mxu0 %v14200_v31  ;;  %v14242_v29 = vld [vmem:[#allocation6 + $0x14d0] sm:$0xff]   ;;  %v14244_v31 = vld [vmem:[#allocation6 + $0x1448] sm:$0xff]  }
 0x2ac   :  { %12961 = vmatprep.subr.bf16.mxu1 %v14202_v33  ;;  %v14243_v30 = vld [vmem:[#allocation6 + $0x1490] sm:$0xff]   ;;  %v14246_v33 = vld [vmem:[#allocation6 + $0x14c8] sm:$0xff]  }
 0x2ae   :  { %12940 = vmatpush3.bf16.msra.mxu0 %v14201_v32  ;;  %v14245_v32 = vld [vmem:[#allocation6 + $0x1408] sm:$0xff]  }
 0x2af   :  { %12962 = vmatpush3.bf16.msra.mxu1 %v14203_v34  ;;  %12941 = vmatprep.subr.bf16.mxu0 %v14204_v35  ;;  %v14247_v34 = vld [vmem:[#allocation6 + $0x1488] sm:$0xff]  }
 0x2b0   :  { %12963 = vmatprep.subr.bf16.mxu1 %v14206_v37  ;;  %v14249_v37 = vld [vmem:[#allocation6 + $0x1400] sm:$0xff]  }
 0x2b2   :  { %12942 = vmatpush3.bf16.msra.mxu0 %v14205_v36  ;;  %v14248_v36 = vld [vmem:[#allocation6 + $0x1440] sm:$0xff]  }
 0x2b3   :  { %12964 = vmatpush3.bf16.msra.mxu1 %v14207_v38  ;;  %12943 = vmatprep.subr.bf16.mxu0 %v14208_v39 }
 0x2b4   :  { %12965 = vmatprep.subr.bf16.mxu1 %v14210_v41  ;;  %v174_v41 = vld [vmem:[#allocation3 + $0x288] sm:$0xff] }
 0x2b6   :  { %12944 = vmatpush3.bf16.msra.mxu0 %v14209_v40  ;;  %v14250_v40 = vld [vmem:[#allocation6 + $0x14c0] sm:$0xff]  }
 0x2b7   :  { %12966 = vmatpush3.bf16.msra.mxu1 %v14211_v42  ;;  %12945 = vmatprep.subr.bf16.mxu0 %v14212_v43  ;;  %v299_v43 = vpack.c.bf16 %v174_v41, %v174_v41 }
 0x2b8   :  { %12967 = vmatprep.subr.bf16.mxu1 %v14214_v45 }
 0x2ba   :  { %12946 = vmatpush3.bf16.msra.mxu0 %v14213_v44  ;;  %v14251_v44 = vld [vmem:[#allocation6 + $0x1480] sm:$0xff]  }
 0x2bb   :  { %12968 = vmatpush3.bf16.msra.mxu1 %v14215_v47  ;;  %12947 = vmatprep.subr.bf16.mxu0 %v14216_v48  ;;  %v173_v47 = vld [vmem:[#allocation3 + $0x280] sm:$0xff] }
 0x2bc   :  { %12969 = vmatprep.subr.bf16.mxu1 %v14218_v53 }
 0x2be   :  { %12948 = vmatpush3.bf16.msra.mxu0 %v14217_v50  ;;  %v298_v50 = vpack.c.bf16 %v173_v47, %v173_v47 }
 0x2bf   :  { %12970 = vmatpush3.bf16.msra.mxu1 %v14219_v57  ;;  %12977 = vmatprep.subr.bf16.mxu0 %v14220_v62  ;;  %v175_v57 = vld [vmem:[#allocation3 + $0x290] sm:$0xff]  ;;  %v14255_v62 = vld [vmem:[#allocation6 + $0x15b8] sm:$0xff]  }
 0x2c0   :  { %12999 = vmatprep.subr.bf16.mxu1 %v14222_v8  ;;  %v14265_v8 = vld [vmem:[#allocation6 + $0x1520] sm:$0xff]  }
 0x2c1   :  { %v12685_v46 = vpop.f32.mrf.mxu0  ;;  %9897 = vmatmul.mubr.bf16.vlgmr.msra.gmra.mxu0 %v294_v61 }
 0x2c2   :  { %v12707_v52 = vpop.f32.mrf.mxu1  ;;  %12978 = vmatpush3.bf16.msra.mxu0 %v14221_v4  ;;  %9937 = vmatmul.mubr.bf16.vlgmr.msra.gmra.mxu1 %v296_v7  ;;  %v14261_v4 = vld [vmem:[#allocation6 + $0x1528] sm:$0xff]   ;;  %v14264_v7 = vld [vmem:[#allocation6 + $0x1560] sm:$0xff]  }
 0x2c3   :  { %v12686_v49 = vpop.f32.mrf.mxu0  ;;  %13000 = vmatpush3.bf16.msra.mxu1 %v14223_v10  ;;  %12979 = vmatprep.subr.bf16.mxu0 %v14224_v11  ;;  %v14267_v10 = vld [vmem:[#allocation6 + $0x15a0] sm:$0xff]   ;;  %v14268_v11 = vld [vmem:[#allocation6 + $0x1558] sm:$0xff]  }
 0x2c4   :  { %v12687_v51 = vadd.f32 %v12686_v49, %v12685_v46  ;;  %v12708_v60 = vpop.f32.mrf.mxu1  ;;  %13001 = vmatprep.subr.bf16.mxu1 %v14226_v13  ;;  %9976 = vmatprep.mubr.bf16.mxu0 %v299_v43  ;;  %v14270_v13 = vld [vmem:[#allocation6 + $0x15d8] sm:$0xff]  }
 0x2c5   :  { %v12688_v55 = vpop.f32.mrf.mxu0  ;;  %v12709_v63 = vadd.f32 %v12708_v60, %v12707_v52  ;;  %v176_v52 = vld [vmem:[#allocation3 + $0x298] sm:$0xff]  ;;  %v14254_v60 = vld [vmem:[#allocation6 + $0x15f8] sm:$0xff]  }
 0x2c6   :  { %v9419_v59 = vadd.f32 %v12687_v51, %v14813_v18  ;;  %v12710_v2 = vpop.f32.mrf.mxu1  ;;  %12980 = vmatpush3.bf16.msra.mxu0 %v14225_v12  ;;  %v14231_v18 = vld [vmem:[#allocation6 + $0x14a8] sm:$0xff]   ;;  %v14252_v51 = vld [vmem:[#allocation6 + $0x1578] sm:$0xff]   ;;  %v301_v55 = vpack.c.bf16 %v176_v52, %v176_v52  ;;  %v14289_v52 = vld [vmem:[#allocation6 + $0x1630] sm:$0xff]  }
 0x2c7   :  { %v12689_v0 = vpop.f32.mrf.mxu0  ;;  %13002 = vmatpush3.bf16.msra.mxu1 %v14227_v14  ;;  %12981 = vmatprep.subr.bf16.mxu0 %v14228_v15  ;;  %v14259_v2 = vld [vmem:[#allocation6 + $0x15b0] sm:$0xff]   ;;  %v14269_v12 = vld [vmem:[#allocation6 + $0x1518] sm:$0xff]  }
 0x2c8   :  { %v14816_v6 = vadd.f32 %v12709_v63, %v9419_v59  ;;  %v12711_v9 = vpop.f32.mrf.mxu1  ;;  %13003 = vmatprep.subr.bf16.mxu1 %v14230_v17  ;;  %v300_v59 = vpack.c.bf16 %v175_v57, %v175_v57  ;;  %10016 = vmatprep.mubr.bf16.mxu1 %v301_v55  ;;  %v14256_v63 = vld [vmem:[#allocation6 + $0x1570] sm:$0xff]   ;;  %v14271_v14 = vld [vmem:[#allocation6 + $0x1598] sm:$0xff]   ;;  %v14292_v55 = vld [vmem:[#allocation6 + $0x1668] sm:$0xff]  }
 0x2c9   :  { %v14257_v0 = vld [vmem:[#allocation6 + $0x1530] sm:$0xff]   ;;  %v14266_v9 = vld [vmem:[#allocation6 + $0x15e0] sm:$0xff]   ;;  %v14285_v43 = vld [vmem:[#allocation6 + $0x1638] sm:$0xff]  }
 0x2ca   :  { %12982 = vmatpush3.bf16.msra.mxu0 %v14229_v16  ;;  %v14272_v15 = vld [vmem:[#allocation6 + $0x1550] sm:$0xff]   ;;  %v14294_v57 = vld [vmem:[#allocation6 + $0x16e8] sm:$0xff]  }
 0x2cb   :  { %13004 = vmatpush3.bf16.msra.mxu1 %v14231_v18  ;;  %12983 = vmatprep.subr.bf16.mxu0 %v14232_v19  ;;  %v14273_v16 = vld [vmem:[#allocation6 + $0x1510] sm:$0xff]   ;;  %v14276_v19 = vld [vmem:[#allocation6 + $0x1548] sm:$0xff]  }
 0x2cc   :  { %13005 = vmatprep.subr.bf16.mxu1 %v14234_v21  ;;  %v14274_v17 = vld [vmem:[#allocation6 + $0x15d0] sm:$0xff]   ;;  %v14278_v21 = vld [vmem:[#allocation6 + $0x15c8] sm:$0xff]  }
 0x2cd   :  { %v14275_v18 = vld [vmem:[#allocation6 + $0x1590] sm:$0xff]  }
 0x2ce   :  { %12984 = vmatpush3.bf16.msra.mxu0 %v14233_v20  ;;  %v14277_v20 = vld [vmem:[#allocation6 + $0x1508] sm:$0xff]  }
 0x2cf   :  { %13006 = vmatpush3.bf16.msra.mxu1 %v14235_v22  ;;  %12985 = vmatprep.subr.bf16.mxu0 %v14236_v23  ;;  %v14279_v22 = vld [vmem:[#allocation6 + $0x1588] sm:$0xff]  }
 0x2d0   :  { %13007 = vmatprep.subr.bf16.mxu1 %v14238_v25  ;;  %v14281_v25 = vld [vmem:[#allocation6 + $0x1500] sm:$0xff]  }
 0x2d2   :  { %12986 = vmatpush3.bf16.msra.mxu0 %v14237_v24  ;;  %v14280_v24 = vld [vmem:[#allocation6 + $0x1540] sm:$0xff]  }
 0x2d3   :  { %13008 = vmatpush3.bf16.msra.mxu1 %v14239_v26  ;;  %12987 = vmatprep.subr.bf16.mxu0 %v14240_v27  ;;  %v14282_v27 = vld [vmem:[#allocation6 + $0x15c0] sm:$0xff]  }
 0x2d4   :  { %13009 = vmatprep.subr.bf16.mxu1 %v14242_v29 }
 0x2d6   :  { %12988 = vmatpush3.bf16.msra.mxu0 %v14241_v28 }
 0x2d7   :  { %13010 = vmatpush3.bf16.msra.mxu1 %v14243_v30  ;;  %12989 = vmatprep.subr.bf16.mxu0 %v14244_v31  ;;  %v178_v30 = vld [vmem:[#allocation3 + $0x2a8] sm:$0xff] }
 0x2d8   :  { %13011 = vmatprep.subr.bf16.mxu1 %v14246_v33  ;;  %v14283_v33 = vld [vmem:[#allocation6 + $0x1580] sm:$0xff]  }
 0x2da   :  { %12990 = vmatpush3.bf16.msra.mxu0 %v14245_v32  ;;  %v303_v32 = vpack.c.bf16 %v178_v30, %v178_v30 }
 0x2db   :  { %13012 = vmatpush3.bf16.msra.mxu1 %v14247_v34  ;;  %12991 = vmatprep.subr.bf16.mxu0 %v14248_v36  ;;  %v177_v34 = vld [vmem:[#allocation3 + $0x2a0] sm:$0xff] }
 0x2dc   :  { %13013 = vmatprep.subr.bf16.mxu1 %v14250_v40 }
 0x2de   :  { %12992 = vmatpush3.bf16.msra.mxu0 %v14249_v37  ;;  %v302_v37 = vpack.c.bf16 %v177_v34, %v177_v34 }
 0x2df   :  { %13014 = vmatpush3.bf16.msra.mxu1 %v14251_v44  ;;  %13021 = vmatprep.subr.bf16.mxu0 %v14252_v51  ;;  %v14288_v51 = vld [vmem:[#allocation6 + $0x1670] sm:$0xff]  }
 0x2e0   :  { %13043 = vmatprep.subr.bf16.mxu1 %v14254_v60  ;;  %v14297_v60 = vld [vmem:[#allocation6 + $0x1620] sm:$0xff]  }
 0x2e1   :  { %v12729_v35 = vpop.f32.mrf.mxu0  ;;  %9977 = vmatmul.mubr.bf16.vlgmr.msra.gmra.mxu0 %v298_v50  ;;  %v14287_v50 = vld [vmem:[#allocation6 + $0x16b8] sm:$0xff]  }
 0x2e2   :  { %v12751_v39 = vpop.f32.mrf.mxu1  ;;  %13022 = vmatpush3.bf16.msra.mxu0 %v14253_v56  ;;  %10017 = vmatmul.mubr.bf16.vlgmr.msra.gmra.mxu1 %v300_v59  ;;  %v14293_v56 = vld [vmem:[#allocation6 + $0x1628] sm:$0xff]   ;;  %v14296_v59 = vld [vmem:[#allocation6 + $0x1660] sm:$0xff]  }
 0x2e3   :  { %v12730_v38 = vpop.f32.mrf.mxu0  ;;  %13044 = vmatpush3.bf16.msra.mxu1 %v14255_v62  ;;  %13023 = vmatprep.subr.bf16.mxu0 %v14256_v63  ;;  %v14299_v62 = vld [vmem:[#allocation6 + $0x16a0] sm:$0xff]   ;;  %v14300_v63 = vld [vmem:[#allocation6 + $0x1658] sm:$0xff]  }
 0x2e4   :  { %v12731_v42 = vadd.f32 %v12730_v38, %v12729_v35  ;;  %v12752_v46 = vpop.f32.mrf.mxu1  ;;  %13045 = vmatprep.subr.bf16.mxu1 %v14258_v1  ;;  %v14284_v38 = vld [vmem:[#allocation6 + $0x1678] sm:$0xff]   ;;  %10056 = vmatprep.mubr.bf16.mxu0 %v303_v32 }
 0x2e5   :  { %v12732_v45 = vpop.f32.mrf.mxu0  ;;  %v12753_v49 = vadd.f32 %v12752_v46, %v12751_v39  ;;  %v180_v39 = vld [vmem:[#allocation3 + $0x2b8] sm:$0xff]  ;;  %v14302_v1 = vld [vmem:[#allocation6 + $0x16d8] sm:$0xff]  }
 0x2e6   :  { %v9499_v48 = vadd.f32 %v12731_v42, %v14816_v6  ;;  %v12754_v54 = vpop.f32.mrf.mxu1  ;;  %13024 = vmatpush3.bf16.msra.mxu0 %v14257_v0  ;;  %v14263_v6 = vld [vmem:[#allocation6 + $0x15a8] sm:$0xff]   ;;  %v305_v42 = vpack.c.bf16 %v180_v39, %v180_v39  ;;  %v14301_v0 = vld [vmem:[#allocation6 + $0x1618] sm:$0xff]   ;;  %v14320_v39 = vld [vmem:[#allocation6 + $0x1770] sm:$0xff]  }
 0x2e7   :  { %v12733_v53 = vpop.f32.mrf.mxu0  ;;  %13046 = vmatpush3.bf16.msra.mxu1 %v14259_v2  ;;  %13025 = vmatprep.subr.bf16.mxu0 %v14260_v3  ;;  %v179_v45 = vld [vmem:[#allocation3 + $0x2b0] sm:$0xff]  ;;  %v14291_v54 = vld [vmem:[#allocation6 + $0x16b0] sm:$0xff]   ;;  %v14303_v2 = vld [vmem:[#allocation6 + $0x1698] sm:$0xff]  }
 0x2e8   :  { %v14819_v58 = vadd.f32 %v12753_v49, %v9499_v48  ;;  %v12755_v61 = vpop.f32.mrf.mxu1  ;;  %13047 = vmatprep.subr.bf16.mxu1 %v14262_v5  ;;  %10096 = vmatprep.mubr.bf16.mxu1 %v305_v42  ;;  %v304_v47 = vpack.c.bf16 %v179_v45, %v179_v45  ;;  %v14286_v48 = vld [vmem:[#allocation6 + $0x16f8] sm:$0xff]   ;;  %v14290_v53 = vld [vmem:[#allocation6 + $0x16f0] sm:$0xff]   ;;  %v14326_v45 = vld [vmem:[#allocation6 + $0x17e8] sm:$0xff]  }
 0x2e9   :  { %v14298_v61 = vld [vmem:[#allocation6 + $0x16e0] sm:$0xff]   ;;  %v14304_v3 = vld [vmem:[#allocation6 + $0x1650] sm:$0xff]   ;;  %v14317_v32 = vld [vmem:[#allocation6 + $0x1738] sm:$0xff]  }
 0x2ea   :  { %13026 = vmatpush3.bf16.msra.mxu0 %v14261_v4  ;;  %v14305_v4 = vld [vmem:[#allocation6 + $0x1610] sm:$0xff]  }
 0x2eb   :  { %13048 = vmatpush3.bf16.msra.mxu1 %v14263_v6  ;;  %13027 = vmatprep.subr.bf16.mxu0 %v14264_v7  ;;  %v14306_v5 = vld [vmem:[#allocation6 + $0x16d0] sm:$0xff]   ;;  %v14308_v7 = vld [vmem:[#allocation6 + $0x1648] sm:$0xff]  }
 0x2ec   :  { %13049 = vmatprep.subr.bf16.mxu1 %v14266_v9  ;;  %v14307_v6 = vld [vmem:[#allocation6 + $0x1690] sm:$0xff]   ;;  %v14310_v9 = vld [vmem:[#allocation6 + $0x16c8] sm:$0xff]  }
 0x2ed   :  { %v14323_v42 = vld [vmem:[#allocation6 + $0x17b0] sm:$0xff]  }
 0x2ee   :  { %13028 = vmatpush3.bf16.msra.mxu0 %v14265_v8  ;;  %v14309_v8 = vld [vmem:[#allocation6 + $0x1608] sm:$0xff]  }
 0x2ef   :  { %13050 = vmatpush3.bf16.msra.mxu1 %v14267_v10  ;;  %13029 = vmatprep.subr.bf16.mxu0 %v14268_v11  ;;  %v14311_v11 = vld [vmem:[#allocation6 + $0x1688] sm:$0xff]  }
 0x2f0   :  { %13051 = vmatprep.subr.bf16.mxu1 %v14270_v13 }
 0x2f2   :  { %13030 = vmatpush3.bf16.msra.mxu0 %v14269_v12  ;;  %v14312_v12 = vld [vmem:[#allocation6 + $0x1640] sm:$0xff]  }
 0x2f3   :  { %13052 = vmatpush3.bf16.msra.mxu1 %v14271_v14  ;;  %13031 = vmatprep.subr.bf16.mxu0 %v14272_v15  ;;  %v14313_v14 = vld [vmem:[#allocation6 + $0x1600] sm:$0xff]  }
 0x2f4   :  { %13053 = vmatprep.subr.bf16.mxu1 %v14274_v17  ;;  %v14314_v17 = vld [vmem:[#allocation6 + $0x16c0] sm:$0xff]  }
 0x2f6   :  { %13032 = vmatpush3.bf16.msra.mxu0 %v14273_v16 }
 0x2f7   :  { %13054 = vmatpush3.bf16.msra.mxu1 %v14275_v18  ;;  %13033 = vmatprep.subr.bf16.mxu0 %v14276_v19  ;;  %v182_v18 = vld [vmem:[#allocation3 + $0x2c8] sm:$0xff] }
 0x2f8   :  { %13055 = vmatprep.subr.bf16.mxu1 %v14278_v21  ;;  %v14315_v21 = vld [vmem:[#allocation6 + $0x1680] sm:$0xff]  }
 0x2fa   :  { %13034 = vmatpush3.bf16.msra.mxu0 %v14277_v20  ;;  %v307_v20 = vpack.c.bf16 %v182_v18, %v182_v18 }
 0x2fb   :  { %13056 = vmatpush3.bf16.msra.mxu1 %v14279_v22  ;;  %13035 = vmatprep.subr.bf16.mxu0 %v14280_v24  ;;  %v181_v22 = vld [vmem:[#allocation3 + $0x2c0] sm:$0xff] }
 0x2fc   :  { %13057 = vmatprep.subr.bf16.mxu1 %v14282_v27 }
 0x2fe   :  { %13036 = vmatpush3.bf16.msra.mxu0 %v14281_v25  ;;  %v306_v25 = vpack.c.bf16 %v181_v22, %v181_v22 }
 0x2ff   :  { %13058 = vmatpush3.bf16.msra.mxu1 %v14283_v33  ;;  %13065 = vmatprep.subr.bf16.mxu0 %v14284_v38  ;;  %v183_v33 = vld [vmem:[#allocation3 + $0x2d0] sm:$0xff]  ;;  %v14319_v38 = vld [vmem:[#allocation6 + $0x17b8] sm:$0xff]  }
 0x300   :  { %13087 = vmatprep.subr.bf16.mxu1 %v14286_v48  ;;  %v14329_v48 = vld [vmem:[#allocation6 + $0x1720] sm:$0xff]  }
 0x301   :  { %v12773_v23 = vpop.f32.mrf.mxu0  ;;  %10057 = vmatmul.mubr.bf16.vlgmr.msra.gmra.mxu0 %v302_v37 }
 0x302   :  { %v12795_v29 = vpop.f32.mrf.mxu1  ;;  %13066 = vmatpush3.bf16.msra.mxu0 %v14285_v43  ;;  %10097 = vmatmul.mubr.bf16.vlgmr.msra.gmra.mxu1 %v304_v47  ;;  %v14324_v43 = vld [vmem:[#allocation6 + $0x1768] sm:$0xff]   ;;  %v14328_v47 = vld [vmem:[#allocation6 + $0x1760] sm:$0xff]  }
 0x303   :  { %v12774_v26 = vpop.f32.mrf.mxu0  ;;  %13088 = vmatpush3.bf16.msra.mxu1 %v14287_v50  ;;  %13067 = vmatprep.subr.bf16.mxu0 %v14288_v51  ;;  %v14331_v50 = vld [vmem:[#allocation6 + $0x17a0] sm:$0xff]   ;;  %v14332_v51 = vld [vmem:[#allocation6 + $0x1758] sm:$0xff]  }
 0x304   :  { %v12775_v28 = vadd.f32 %v12774_v26, %v12773_v23  ;;  %v12796_v36 = vpop.f32.mrf.mxu1  ;;  %13089 = vmatprep.subr.bf16.mxu1 %v14290_v53  ;;  %v14316_v26 = vld [vmem:[#allocation6 + $0x1778] sm:$0xff]   ;;  %10136 = vmatprep.mubr.bf16.mxu0 %v307_v20 }
 0x305   :  { %v12776_v31 = vpop.f32.mrf.mxu0  ;;  %v12797_v40 = vadd.f32 %v12796_v36, %v12795_v29  ;;  %v184_v29 = vld [vmem:[#allocation3 + $0x2d8] sm:$0xff]  ;;  %v14318_v36 = vld [vmem:[#allocation6 + $0x17f8] sm:$0xff]  }
 0x306   :  { %v9579_v35 = vadd.f32 %v12775_v28, %v14819_v58  ;;  %v12798_v44 = vpop.f32.mrf.mxu1  ;;  %13068 = vmatpush3.bf16.msra.mxu0 %v14289_v52  ;;  %v14295_v58 = vld [vmem:[#allocation6 + $0x16a8] sm:$0xff]   ;;  %v309_v31 = vpack.c.bf16 %v184_v29, %v184_v29  ;;  %v14333_v52 = vld [vmem:[#allocation6 + $0x1718] sm:$0xff]   ;;  %v14354_v29 = vld [vmem:[#allocation6 + $0x18f0] sm:$0xff]  }
 0x307   :  { %v12777_v41 = vpop.f32.mrf.mxu0  ;;  %13090 = vmatpush3.bf16.msra.mxu1 %v14291_v54  ;;  %13069 = vmatprep.subr.bf16.mxu0 %v14292_v55  ;;  %v14325_v44 = vld [vmem:[#allocation6 + $0x1728] sm:$0xff]   ;;  %v14334_v53 = vld [vmem:[#allocation6 + $0x17d8] sm:$0xff]   ;;  %v14336_v55 = vld [vmem:[#allocation6 + $0x1750] sm:$0xff]  }
 0x308   :  { %v14822_v46 = vadd.f32 %v12797_v40, %v9579_v35  ;;  %v12799_v49 = vpop.f32.mrf.mxu1  ;;  %13091 = vmatprep.subr.bf16.mxu1 %v14294_v57  ;;  %v308_v35 = vpack.c.bf16 %v183_v33, %v183_v33  ;;  %10176 = vmatprep.mubr.bf16.mxu1 %v309_v31  ;;  %v14321_v40 = vld [vmem:[#allocation6 + $0x1730] sm:$0xff]   ;;  %v14335_v54 = vld [vmem:[#allocation6 + $0x1798] sm:$0xff]   ;;  %v14356_v31 = vld [vmem:[#allocation6 + $0x1868] sm:$0xff]  }
 0x309   :  { %v14322_v41 = vld [vmem:[#allocation6 + $0x17f0] sm:$0xff]   ;;  %v14330_v49 = vld [vmem:[#allocation6 + $0x17e0] sm:$0xff]   ;;  %v14349_v20 = vld [vmem:[#allocation6 + $0x1838] sm:$0xff]  }
 0x30a   :  { %13070 = vmatpush3.bf16.msra.mxu0 %v14293_v56  ;;  %v14337_v56 = vld [vmem:[#allocation6 + $0x1710] sm:$0xff]   ;;  %v14358_v33 = vld [vmem:[#allocation6 + $0x18e8] sm:$0xff]  }
 0x30b   :  { %13092 = vmatpush3.bf16.msra.mxu1 %v14295_v58  ;;  %13071 = vmatprep.subr.bf16.mxu0 %v14296_v59  ;;  %v14338_v57 = vld [vmem:[#allocation6 + $0x17d0] sm:$0xff]   ;;  %v14340_v59 = vld [vmem:[#allocation6 + $0x1748] sm:$0xff]  }
 0x30c   :  { %13093 = vmatprep.subr.bf16.mxu1 %v14298_v61  ;;  %v14339_v58 = vld [vmem:[#allocation6 + $0x1790] sm:$0xff]   ;;  %v14342_v61 = vld [vmem:[#allocation6 + $0x17c8] sm:$0xff]  }
 0x30e   :  { %13072 = vmatpush3.bf16.msra.mxu0 %v14297_v60  ;;  %v14341_v60 = vld [vmem:[#allocation6 + $0x1708] sm:$0xff]  }
 0x30f   :  { %13094 = vmatpush3.bf16.msra.mxu1 %v14299_v62  ;;  %13073 = vmatprep.subr.bf16.mxu0 %v14300_v63  ;;  %v14343_v62 = vld [vmem:[#allocation6 + $0x1788] sm:$0xff]  }
 0x310   :  { %13095 = vmatprep.subr.bf16.mxu1 %v14302_v1  ;;  %v14345_v1 = vld [vmem:[#allocation6 + $0x1700] sm:$0xff]  }
 0x312   :  { %13074 = vmatpush3.bf16.msra.mxu0 %v14301_v0  ;;  %v14344_v0 = vld [vmem:[#allocation6 + $0x1740] sm:$0xff]  }
 0x313   :  { %13096 = vmatpush3.bf16.msra.mxu1 %v14303_v2  ;;  %13075 = vmatprep.subr.bf16.mxu0 %v14304_v3 }
 0x314   :  { %13097 = vmatprep.subr.bf16.mxu1 %v14306_v5  ;;  %v186_v5 = vld [vmem:[#allocation3 + $0x2e8] sm:$0xff] }
 0x316   :  { %13076 = vmatpush3.bf16.msra.mxu0 %v14305_v4  ;;  %v14346_v4 = vld [vmem:[#allocation6 + $0x17c0] sm:$0xff]  }
 0x317   :  { %13098 = vmatpush3.bf16.msra.mxu1 %v14307_v6  ;;  %13077 = vmatprep.subr.bf16.mxu0 %v14308_v7  ;;  %v311_v7 = vpack.c.bf16 %v186_v5, %v186_v5 }
 0x318   :  { %13099 = vmatprep.subr.bf16.mxu1 %v14310_v9 }
 0x31a   :  { %13078 = vmatpush3.bf16.msra.mxu0 %v14309_v8  ;;  %v14347_v8 = vld [vmem:[#allocation6 + $0x1780] sm:$0xff]  }
 0x31b   :  { %13100 = vmatpush3.bf16.msra.mxu1 %v14311_v11  ;;  %13079 = vmatprep.subr.bf16.mxu0 %v14312_v12  ;;  %v185_v11 = vld [vmem:[#allocation3 + $0x2e0] sm:$0xff] }
 0x31c   :  { %13101 = vmatprep.subr.bf16.mxu1 %v14314_v17 }
 0x31e   :  { %13080 = vmatpush3.bf16.msra.mxu0 %v14313_v14  ;;  %v310_v14 = vpack.c.bf16 %v185_v11, %v185_v11 }
 0x31f   :  { %13102 = vmatpush3.bf16.msra.mxu1 %v14315_v21  ;;  %13109 = vmatprep.subr.bf16.mxu0 %v14316_v26  ;;  %v187_v21 = vld [vmem:[#allocation3 + $0x2f0] sm:$0xff]  ;;  %v14351_v26 = vld [vmem:[#allocation6 + $0x18b8] sm:$0xff]  }
 0x320   :  { %13131 = vmatprep.subr.bf16.mxu1 %v14318_v36  ;;  %v14361_v36 = vld [vmem:[#allocation6 + $0x1820] sm:$0xff]  }
 0x321   :  { %v12817_v10 = vpop.f32.mrf.mxu0  ;;  %10137 = vmatmul.mubr.bf16.vlgmr.msra.gmra.mxu0 %v306_v25 }
 0x322   :  { %v12839_v16 = vpop.f32.mrf.mxu1  ;;  %13110 = vmatpush3.bf16.msra.mxu0 %v14317_v32  ;;  %10177 = vmatmul.mubr.bf16.vlgmr.msra.gmra.mxu1 %v308_v35  ;;  %v14357_v32 = vld [vmem:[#allocation6 + $0x1828] sm:$0xff]   ;;  %v14360_v35 = vld [vmem:[#allocation6 + $0x1860] sm:$0xff]  }
 0x323   :  { %v12818_v13 = vpop.f32.mrf.mxu0  ;;  %13132 = vmatpush3.bf16.msra.mxu1 %v14319_v38  ;;  %13111 = vmatprep.subr.bf16.mxu0 %v14320_v39  ;;  %v14363_v38 = vld [vmem:[#allocation6 + $0x18a0] sm:$0xff]   ;;  %v14364_v39 = vld [vmem:[#allocation6 + $0x1858] sm:$0xff]  }
 0x324   :  { %v12819_v15 = vadd.f32 %v12818_v13, %v12817_v10  ;;  %v12840_v24 = vpop.f32.mrf.mxu1  ;;  %13133 = vmatprep.subr.bf16.mxu1 %v14322_v41  ;;  %10216 = vmatprep.mubr.bf16.mxu0 %v311_v7  ;;  %v14366_v41 = vld [vmem:[#allocation6 + $0x18d8] sm:$0xff]  }
 0x325   :  { %v12820_v19 = vpop.f32.mrf.mxu0  ;;  %v12841_v27 = vadd.f32 %v12840_v24, %v12839_v16  ;;  %v188_v16 = vld [vmem:[#allocation3 + $0x2f8] sm:$0xff]  ;;  %v14350_v24 = vld [vmem:[#allocation6 + $0x18f8] sm:$0xff]  }
 0x326   :  { %v9659_v23 = vadd.f32 %v12819_v15, %v14822_v46  ;;  %v12842_v30 = vpop.f32.mrf.mxu1  ;;  %13112 = vmatpush3.bf16.msra.mxu0 %v14321_v40  ;;  %v14327_v46 = vld [vmem:[#allocation6 + $0x17a8] sm:$0xff]   ;;  %v14348_v15 = vld [vmem:[#allocation6 + $0x1878] sm:$0xff]   ;;  %v313_v19 = vpack.c.bf16 %v188_v16, %v188_v16  ;;  %v14385_v16 = vld [vmem:[#allocation6 + $0x1930] sm:$0xff]  }
 0x327   :  { %v12821_v28 = vpop.f32.mrf.mxu0  ;;  %13134 = vmatpush3.bf16.msra.mxu1 %v14323_v42  ;;  %13113 = vmatprep.subr.bf16.mxu0 %v14324_v43  ;;  %v14355_v30 = vld [vmem:[#allocation6 + $0x18b0] sm:$0xff]   ;;  %v14365_v40 = vld [vmem:[#allocation6 + $0x1818] sm:$0xff]  }
 0x328   :  { %v14825_v34 = vadd.f32 %v12841_v27, %v9659_v23  ;;  %v12843_v37 = vpop.f32.mrf.mxu1  ;;  %13135 = vmatprep.subr.bf16.mxu1 %v14326_v45  ;;  %v312_v23 = vpack.c.bf16 %v187_v21, %v187_v21  ;;  %10256 = vmatprep.mubr.bf16.mxu1 %v313_v19  ;;  %v14352_v27 = vld [vmem:[#allocation6 + $0x1870] sm:$0xff]   ;;  %v14367_v42 = vld [vmem:[#allocation6 + $0x1898] sm:$0xff]   ;;  %v14388_v19 = vld [vmem:[#allocation6 + $0x1968] sm:$0xff]  }
 0x329   :  { %v14353_v28 = vld [vmem:[#allocation6 + $0x1830] sm:$0xff]   ;;  %v14362_v37 = vld [vmem:[#allocation6 + $0x18e0] sm:$0xff]   ;;  %v14381_v7 = vld [vmem:[#allocation6 + $0x1938] sm:$0xff]  }
 0x32a   :  { %13114 = vmatpush3.bf16.msra.mxu0 %v14325_v44  ;;  %v14368_v43 = vld [vmem:[#allocation6 + $0x1850] sm:$0xff]   ;;  %v14390_v21 = vld [vmem:[#allocation6 + $0x19e8] sm:$0xff]  }
 0x32b   :  { %13136 = vmatpush3.bf16.msra.mxu1 %v14327_v46  ;;  %13115 = vmatprep.subr.bf16.mxu0 %v14328_v47  ;;  %v14369_v44 = vld [vmem:[#allocation6 + $0x1810] sm:$0xff]   ;;  %v14372_v47 = vld [vmem:[#allocation6 + $0x1848] sm:$0xff]  }
 0x32c   :  { %13137 = vmatprep.subr.bf16.mxu1 %v14330_v49  ;;  %v14370_v45 = vld [vmem:[#allocation6 + $0x18d0] sm:$0xff]   ;;  %v14374_v49 = vld [vmem:[#allocation6 + $0x18c8] sm:$0xff]  }
 0x32d   :  { %v14371_v46 = vld [vmem:[#allocation6 + $0x1890] sm:$0xff]  }
 0x32e   :  { %13116 = vmatpush3.bf16.msra.mxu0 %v14329_v48  ;;  %v14373_v48 = vld [vmem:[#allocation6 + $0x1808] sm:$0xff]  }
 0x32f   :  { %13138 = vmatpush3.bf16.msra.mxu1 %v14331_v50  ;;  %13117 = vmatprep.subr.bf16.mxu0 %v14332_v51  ;;  %v14375_v50 = vld [vmem:[#allocation6 + $0x1888] sm:$0xff]  }
 0x330   :  { %13139 = vmatprep.subr.bf16.mxu1 %v14334_v53  ;;  %v14377_v53 = vld [vmem:[#allocation6 + $0x1800] sm:$0xff]  }
 0x332   :  { %13118 = vmatpush3.bf16.msra.mxu0 %v14333_v52  ;;  %v14376_v52 = vld [vmem:[#allocation6 + $0x1840] sm:$0xff]  }
 0x333   :  { %13140 = vmatpush3.bf16.msra.mxu1 %v14335_v54  ;;  %13119 = vmatprep.subr.bf16.mxu0 %v14336_v55  ;;  %v14378_v55 = vld [vmem:[#allocation6 + $0x18c0] sm:$0xff]  }
 0x334   :  { %13141 = vmatprep.subr.bf16.mxu1 %v14338_v57 }
 0x336   :  { %13120 = vmatpush3.bf16.msra.mxu0 %v14337_v56 }
 0x337   :  { %13142 = vmatpush3.bf16.msra.mxu1 %v14339_v58  ;;  %13121 = vmatprep.subr.bf16.mxu0 %v14340_v59  ;;  %v190_v58 = vld [vmem:[#allocation3 + $0x308] sm:$0xff] }
 0x338   :  { %13143 = vmatprep.subr.bf16.mxu1 %v14342_v61  ;;  %v14379_v61 = vld [vmem:[#allocation6 + $0x1880] sm:$0xff]  }
 0x33a   :  { %13122 = vmatpush3.bf16.msra.mxu0 %v14341_v60  ;;  %v315_v60 = vpack.c.bf16 %v190_v58, %v190_v58 }
 0x33b   :  { %13144 = vmatpush3.bf16.msra.mxu1 %v14343_v62  ;;  %13123 = vmatprep.subr.bf16.mxu0 %v14344_v0  ;;  %v189_v62 = vld [vmem:[#allocation3 + $0x300] sm:$0xff] }
 0x33c   :  { %13145 = vmatprep.subr.bf16.mxu1 %v14346_v4 }
 0x33e   :  { %13124 = vmatpush3.bf16.msra.mxu0 %v14345_v1  ;;  %v314_v1 = vpack.c.bf16 %v189_v62, %v189_v62 }
 0x33f   :  { %13146 = vmatpush3.bf16.msra.mxu1 %v14347_v8  ;;  %13153 = vmatprep.subr.bf16.mxu0 %v14348_v15  ;;  %v14384_v15 = vld [vmem:[#allocation6 + $0x1970] sm:$0xff]  }
 0x340   :  { %13175 = vmatprep.subr.bf16.mxu1 %v14350_v24  ;;  %v14393_v24 = vld [vmem:[#allocation6 + $0x1920] sm:$0xff]  }
 0x341   :  { %v12861_v63 = vpop.f32.mrf.mxu0  ;;  %10217 = vmatmul.mubr.bf16.vlgmr.msra.gmra.mxu0 %v310_v14  ;;  %v14383_v14 = vld [vmem:[#allocation6 + $0x19b8] sm:$0xff]  }
 0x342   :  { %v12883_v3 = vpop.f32.mrf.mxu1  ;;  %13154 = vmatpush3.bf16.msra.mxu0 %v14349_v20  ;;  %10257 = vmatmul.mubr.bf16.vlgmr.msra.gmra.mxu1 %v312_v23  ;;  %v14389_v20 = vld [vmem:[#allocation6 + $0x1928] sm:$0xff]   ;;  %v14392_v23 = vld [vmem:[#allocation6 + $0x1960] sm:$0xff]  }
 0x343   :  { %v12862_v2 = vpop.f32.mrf.mxu0  ;;  %13176 = vmatpush3.bf16.msra.mxu1 %v14351_v26  ;;  %13155 = vmatprep.subr.bf16.mxu0 %v14352_v27  ;;  %v14395_v26 = vld [vmem:[#allocation6 + $0x19a0] sm:$0xff]   ;;  %v14396_v27 = vld [vmem:[#allocation6 + $0x1958] sm:$0xff]  }
 0x344   :  { %v12863_v6 = vadd.f32 %v12862_v2, %v12861_v63  ;;  %v12884_v10 = vpop.f32.mrf.mxu1  ;;  %13177 = vmatprep.subr.bf16.mxu1 %v14354_v29  ;;  %v14380_v2 = vld [vmem:[#allocation6 + $0x1978] sm:$0xff]   ;;  %10296 = vmatprep.mubr.bf16.mxu0 %v315_v60 }
 0x345   :  { %v12864_v9 = vpop.f32.mrf.mxu0  ;;  %v12885_v13 = vadd.f32 %v12884_v10, %v12883_v3  ;;  %v192_v3 = vld [vmem:[#allocation3 + $0x318] sm:$0xff]  ;;  %v14398_v29 = vld [vmem:[#allocation6 + $0x19d8] sm:$0xff]  }
 0x346   :  { %v9739_v12 = vadd.f32 %v12863_v6, %v14825_v34  ;;  %v12886_v18 = vpop.f32.mrf.mxu1  ;;  %13156 = vmatpush3.bf16.msra.mxu0 %v14353_v28  ;;  %v14359_v34 = vld [vmem:[#allocation6 + $0x18a8] sm:$0xff]   ;;  %v317_v6 = vpack.c.bf16 %v192_v3, %v192_v3  ;;  %v14397_v28 = vld [vmem:[#allocation6 + $0x1918] sm:$0xff]   ;;  %v14416_v3 = vld [vmem:[#allocation6 + $0x1a70] sm:$0xff]  }
 0x347   :  { %v12865_v17 = vpop.f32.mrf.mxu0  ;;  %13178 = vmatpush3.bf16.msra.mxu1 %v14355_v30  ;;  %13157 = vmatprep.subr.bf16.mxu0 %v14356_v31  ;;  %v191_v9 = vld [vmem:[#allocation3 + $0x310] sm:$0xff]  ;;  %v14387_v18 = vld [vmem:[#allocation6 + $0x19b0] sm:$0xff]   ;;  %v14399_v30 = vld [vmem:[#allocation6 + $0x1998] sm:$0xff]  }
 0x348   :  { %v14828_v22 = vadd.f32 %v12885_v13, %v9739_v12  ;;  %v12887_v25 = vpop.f32.mrf.mxu1  ;;  %13179 = vmatprep.subr.bf16.mxu1 %v14358_v33  ;;  %10336 = vmatprep.mubr.bf16.mxu1 %v317_v6  ;;  %v316_v11 = vpack.c.bf16 %v191_v9, %v191_v9  ;;  %v14382_v12 = vld [vmem:[#allocation6 + $0x19f8] sm:$0xff]   ;;  %v14386_v17 = vld [vmem:[#allocation6 + $0x19f0] sm:$0xff]   ;;  %v14422_v9 = vld [vmem:[#allocation6 + $0x1ae8] sm:$0xff]  }
 0x349   :  { %v14394_v25 = vld [vmem:[#allocation6 + $0x19e0] sm:$0xff]   ;;  %v14400_v31 = vld [vmem:[#allocation6 + $0x1950] sm:$0xff]   ;;  %v14413_v60 = vld [vmem:[#allocation6 + $0x1a38] sm:$0xff]  }
 0x34a   :  { %13158 = vmatpush3.bf16.msra.mxu0 %v14357_v32  ;;  %v14401_v32 = vld [vmem:[#allocation6 + $0x1910] sm:$0xff]  }
 0x34b   :  { %13180 = vmatpush3.bf16.msra.mxu1 %v14359_v34  ;;  %13159 = vmatprep.subr.bf16.mxu0 %v14360_v35  ;;  %v14402_v33 = vld [vmem:[#allocation6 + $0x19d0] sm:$0xff]   ;;  %v14404_v35 = vld [vmem:[#allocation6 + $0x1948] sm:$0xff]  }
 0x34c   :  { %13181 = vmatprep.subr.bf16.mxu1 %v14362_v37  ;;  %v14403_v34 = vld [vmem:[#allocation6 + $0x1990] sm:$0xff]   ;;  %v14406_v37 = vld [vmem:[#allocation6 + $0x19c8] sm:$0xff]  }
 0x34d   :  { %v14419_v6 = vld [vmem:[#allocation6 + $0x1ab0] sm:$0xff]  }
 0x34e   :  { %13160 = vmatpush3.bf16.msra.mxu0 %v14361_v36  ;;  %v14405_v36 = vld [vmem:[#allocation6 + $0x1908] sm:$0xff]  }
 0x34f   :  { %13182 = vmatpush3.bf16.msra.mxu1 %v14363_v38  ;;  %13161 = vmatprep.subr.bf16.mxu0 %v14364_v39  ;;  %v14407_v39 = vld [vmem:[#allocation6 + $0x1988] sm:$0xff]  }
 0x350   :  { %13183 = vmatprep.subr.bf16.mxu1 %v14366_v41 }
 0x352   :  { %13162 = vmatpush3.bf16.msra.mxu0 %v14365_v40  ;;  %v14408_v40 = vld [vmem:[#allocation6 + $0x1940] sm:$0xff]  }
 0x353   :  { %13184 = vmatpush3.bf16.msra.mxu1 %v14367_v42  ;;  %13163 = vmatprep.subr.bf16.mxu0 %v14368_v43  ;;  %v14409_v42 = vld [vmem:[#allocation6 + $0x1900] sm:$0xff]  }
 0x354   :  { %13185 = vmatprep.subr.bf16.mxu1 %v14370_v45  ;;  %v14410_v45 = vld [vmem:[#allocation6 + $0x19c0] sm:$0xff]  }
 0x356   :  { %13164 = vmatpush3.bf16.msra.mxu0 %v14369_v44 }
 0x357   :  { %13186 = vmatpush3.bf16.msra.mxu1 %v14371_v46  ;;  %13165 = vmatprep.subr.bf16.mxu0 %v14372_v47  ;;  %v194_v46 = vld [vmem:[#allocation3 + $0x328] sm:$0xff] }
 0x358   :  { %13187 = vmatprep.subr.bf16.mxu1 %v14374_v49  ;;  %v14411_v49 = vld [vmem:[#allocation6 + $0x1980] sm:$0xff]  }
 0x35a   :  { %13166 = vmatpush3.bf16.msra.mxu0 %v14373_v48  ;;  %v319_v48 = vpack.c.bf16 %v194_v46, %v194_v46 }
 0x35b   :  { %13188 = vmatpush3.bf16.msra.mxu1 %v14375_v50  ;;  %13167 = vmatprep.subr.bf16.mxu0 %v14376_v52  ;;  %v193_v50 = vld [vmem:[#allocation3 + $0x320] sm:$0xff] }
 0x35c   :  { %13189 = vmatprep.subr.bf16.mxu1 %v14378_v55 }
 0x35e   :  { %13168 = vmatpush3.bf16.msra.mxu0 %v14377_v53  ;;  %v318_v53 = vpack.c.bf16 %v193_v50, %v193_v50 }
 0x35f   :  { %13190 = vmatpush3.bf16.msra.mxu1 %v14379_v61  ;;  %13197 = vmatprep.subr.bf16.mxu0 %v14380_v2  ;;  %v195_v61 = vld [vmem:[#allocation3 + $0x330] sm:$0xff]  ;;  %v14415_v2 = vld [vmem:[#allocation6 + $0x1ab8] sm:$0xff]  }
 0x360   :  { %13219 = vmatprep.subr.bf16.mxu1 %v14382_v12  ;;  %v14425_v12 = vld [vmem:[#allocation6 + $0x1a20] sm:$0xff]  }
 0x361   :  { %v12905_v51 = vpop.f32.mrf.mxu0  ;;  %10297 = vmatmul.mubr.bf16.vlgmr.msra.gmra.mxu0 %v314_v1 }
 0x362   :  { %v12927_v57 = vpop.f32.mrf.mxu1  ;;  %13198 = vmatpush3.bf16.msra.mxu0 %v14381_v7  ;;  %10337 = vmatmul.mubr.bf16.vlgmr.msra.gmra.mxu1 %v316_v11  ;;  %v14420_v7 = vld [vmem:[#allocation6 + $0x1a68] sm:$0xff]   ;;  %v14424_v11 = vld [vmem:[#allocation6 + $0x1a60] sm:$0xff]  }
 0x363   :  { %v12906_v54 = vpop.f32.mrf.mxu0  ;;  %13220 = vmatpush3.bf16.msra.mxu1 %v14383_v14  ;;  %13199 = vmatprep.subr.bf16.mxu0 %v14384_v15  ;;  %v14427_v14 = vld [vmem:[#allocation6 + $0x1aa0] sm:$0xff]   ;;  %v14428_v15 = vld [vmem:[#allocation6 + $0x1a58] sm:$0xff]  }
 0x364   :  { %v12907_v56 = vadd.f32 %v12906_v54, %v12905_v51  ;;  %v12928_v0 = vpop.f32.mrf.mxu1  ;;  %13221 = vmatprep.subr.bf16.mxu1 %v14386_v17  ;;  %v14412_v54 = vld [vmem:[#allocation6 + $0x1a78] sm:$0xff]   ;;  %10376 = vmatprep.mubr.bf16.mxu0 %v319_v48 }
 0x365   :  { %v12908_v59 = vpop.f32.mrf.mxu0  ;;  %v12929_v4 = vadd.f32 %v12928_v0, %v12927_v57  ;;  %v196_v57 = vld [vmem:[#allocation3 + $0x338] sm:$0xff]  ;;  %v14414_v0 = vld [vmem:[#allocation6 + $0x1af8] sm:$0xff]  }
 0x366   :  { %v9819_v63 = vadd.f32 %v12907_v56, %v14828_v22  ;;  %v12930_v8 = vpop.f32.mrf.mxu1  ;;  %13200 = vmatpush3.bf16.msra.mxu0 %v14385_v16  ;;  %v14391_v22 = vld [vmem:[#allocation6 + $0x19a8] sm:$0xff]   ;;  %v321_v59 = vpack.c.bf16 %v196_v57, %v196_v57  ;;  %v14429_v16 = vld [vmem:[#allocation6 + $0x1a18] sm:$0xff]   ;;  %v14450_v57 = vld [vmem:[#allocation6 + $0x1bf0] sm:$0xff]  }
 0x367   :  { %v12909_v5 = vpop.f32.mrf.mxu0  ;;  %13222 = vmatpush3.bf16.msra.mxu1 %v14387_v18  ;;  %13201 = vmatprep.subr.bf16.mxu0 %v14388_v19  ;;  %v14421_v8 = vld [vmem:[#allocation6 + $0x1a28] sm:$0xff]   ;;  %v14430_v17 = vld [vmem:[#allocation6 + $0x1ad8] sm:$0xff]   ;;  %v14432_v19 = vld [vmem:[#allocation6 + $0x1a50] sm:$0xff]  }
 0x368   :  { %v14831_v10 = vadd.f32 %v12929_v4, %v9819_v63  ;;  %v12931_v13 = vpop.f32.mrf.mxu1  ;;  %13223 = vmatprep.subr.bf16.mxu1 %v14390_v21  ;;  %v320_v63 = vpack.c.bf16 %v195_v61, %v195_v61  ;;  %10416 = vmatprep.mubr.bf16.mxu1 %v321_v59  ;;  %v14417_v4 = vld [vmem:[#allocation6 + $0x1a30] sm:$0xff]   ;;  %v14431_v18 = vld [vmem:[#allocation6 + $0x1a98] sm:$0xff]   ;;  %v14452_v59 = vld [vmem:[#allocation6 + $0x1b68] sm:$0xff]  }
 0x369   :  { %v14418_v5 = vld [vmem:[#allocation6 + $0x1af0] sm:$0xff]   ;;  %v14426_v13 = vld [vmem:[#allocation6 + $0x1ae0] sm:$0xff]   ;;  %v14445_v48 = vld [vmem:[#allocation6 + $0x1b38] sm:$0xff]  }
 0x36a   :  { %13202 = vmatpush3.bf16.msra.mxu0 %v14389_v20  ;;  %v14433_v20 = vld [vmem:[#allocation6 + $0x1a10] sm:$0xff]   ;;  %v14454_v61 = vld [vmem:[#allocation6 + $0x1be8] sm:$0xff]  }
 0x36b   :  { %13224 = vmatpush3.bf16.msra.mxu1 %v14391_v22  ;;  %13203 = vmatprep.subr.bf16.mxu0 %v14392_v23  ;;  %v14434_v21 = vld [vmem:[#allocation6 + $0x1ad0] sm:$0xff]   ;;  %v14436_v23 = vld [vmem:[#allocation6 + $0x1a48] sm:$0xff]  }
 0x36c   :  { %13225 = vmatprep.subr.bf16.mxu1 %v14394_v25  ;;  %v14435_v22 = vld [vmem:[#allocation6 + $0x1a90] sm:$0xff]   ;;  %v14438_v25 = vld [vmem:[#allocation6 + $0x1ac8] sm:$0xff]  }
 0x36e   :  { %13204 = vmatpush3.bf16.msra.mxu0 %v14393_v24  ;;  %v14437_v24 = vld [vmem:[#allocation6 + $0x1a08] sm:$0xff]  }
 0x36f   :  { %13226 = vmatpush3.bf16.msra.mxu1 %v14395_v26  ;;  %13205 = vmatprep.subr.bf16.mxu0 %v14396_v27  ;;  %v14439_v26 = vld [vmem:[#allocation6 + $0x1a88] sm:$0xff]  }
 0x370   :  { %13227 = vmatprep.subr.bf16.mxu1 %v14398_v29  ;;  %v14441_v29 = vld [vmem:[#allocation6 + $0x1a00] sm:$0xff]  }
 0x372   :  { %13206 = vmatpush3.bf16.msra.mxu0 %v14397_v28  ;;  %v14440_v28 = vld [vmem:[#allocation6 + $0x1a40] sm:$0xff]  }
 0x373   :  { %13228 = vmatpush3.bf16.msra.mxu1 %v14399_v30  ;;  %13207 = vmatprep.subr.bf16.mxu0 %v14400_v31 }
 0x374   :  { %13229 = vmatprep.subr.bf16.mxu1 %v14402_v33  ;;  %v198_v33 = vld [vmem:[#allocation3 + $0x348] sm:$0xff] }
 0x376   :  { %13208 = vmatpush3.bf16.msra.mxu0 %v14401_v32  ;;  %v14442_v32 = vld [vmem:[#allocation6 + $0x1ac0] sm:$0xff]  }
 0x377   :  { %13230 = vmatpush3.bf16.msra.mxu1 %v14403_v34  ;;  %13209 = vmatprep.subr.bf16.mxu0 %v14404_v35  ;;  %v323_v35 = vpack.c.bf16 %v198_v33, %v198_v33 }
 0x378   :  { %13231 = vmatprep.subr.bf16.mxu1 %v14406_v37 }
 0x37a   :  { %13210 = vmatpush3.bf16.msra.mxu0 %v14405_v36  ;;  %v14443_v36 = vld [vmem:[#allocation6 + $0x1a80] sm:$0xff]  }
 0x37b   :  { %13232 = vmatpush3.bf16.msra.mxu1 %v14407_v39  ;;  %13211 = vmatprep.subr.bf16.mxu0 %v14408_v40  ;;  %v197_v39 = vld [vmem:[#allocation3 + $0x340] sm:$0xff] }
 0x37c   :  { %13233 = vmatprep.subr.bf16.mxu1 %v14410_v45 }
 0x37e   :  { %13212 = vmatpush3.bf16.msra.mxu0 %v14409_v42  ;;  %v322_v42 = vpack.c.bf16 %v197_v39, %v197_v39 }
 0x37f   :  { %13234 = vmatpush3.bf16.msra.mxu1 %v14411_v49  ;;  %13241 = vmatprep.subr.bf16.mxu0 %v14412_v54  ;;  %v199_v49 = vld [vmem:[#allocation3 + $0x350] sm:$0xff]  ;;  %v14447_v54 = vld [vmem:[#allocation6 + $0x1bb8] sm:$0xff]  }
 0x380   :  { %13263 = vmatprep.subr.bf16.mxu1 %v14414_v0  ;;  %v14457_v0 = vld [vmem:[#allocation6 + $0x1b20] sm:$0xff]  }
 0x381   :  { %v12949_v38 = vpop.f32.mrf.mxu0  ;;  %10377 = vmatmul.mubr.bf16.vlgmr.msra.gmra.mxu0 %v318_v53 }
 0x382   :  { %v12971_v44 = vpop.f32.mrf.mxu1  ;;  %13242 = vmatpush3.bf16.msra.mxu0 %v14413_v60  ;;  %10417 = vmatmul.mubr.bf16.vlgmr.msra.gmra.mxu1 %v320_v63  ;;  %v14453_v60 = vld [vmem:[#allocation6 + $0x1b28] sm:$0xff]   ;;  %v14456_v63 = vld [vmem:[#allocation6 + $0x1b60] sm:$0xff]  }
 0x383   :  { %v12950_v41 = vpop.f32.mrf.mxu0  ;;  %13264 = vmatpush3.bf16.msra.mxu1 %v14415_v2  ;;  %13243 = vmatprep.subr.bf16.mxu0 %v14416_v3  ;;  %v14459_v2 = vld [vmem:[#allocation6 + $0x1ba0] sm:$0xff]   ;;  %v14460_v3 = vld [vmem:[#allocation6 + $0x1b58] sm:$0xff]  }
 0x384   :  { %v12951_v43 = vadd.f32 %v12950_v41, %v12949_v38  ;;  %v12972_v52 = vpop.f32.mrf.mxu1  ;;  %13265 = vmatprep.subr.bf16.mxu1 %v14418_v5  ;;  %10456 = vmatprep.mubr.bf16.mxu0 %v323_v35  ;;  %v14462_v5 = vld [vmem:[#allocation6 + $0x1bd8] sm:$0xff]  }
 0x385   :  { %v12952_v47 = vpop.f32.mrf.mxu0  ;;  %v12973_v55 = vadd.f32 %v12972_v52, %v12971_v44  ;;  %v200_v44 = vld [vmem:[#allocation3 + $0x358] sm:$0xff]  ;;  %v14446_v52 = vld [vmem:[#allocation6 + $0x1bf8] sm:$0xff]  }
 0x386   :  { %v9899_v51 = vadd.f32 %v12951_v43, %v14831_v10  ;;  %v12974_v58 = vpop.f32.mrf.mxu1  ;;  %13244 = vmatpush3.bf16.msra.mxu0 %v14417_v4  ;;  %v14423_v10 = vld [vmem:[#allocation6 + $0x1aa8] sm:$0xff]   ;;  %v14444_v43 = vld [vmem:[#allocation6 + $0x1b78] sm:$0xff]   ;;  %v325_v47 = vpack.c.bf16 %v200_v44, %v200_v44  ;;  %v14481_v44 = vld [vmem:[#allocation6 + $0x1c30] sm:$0xff]  }
 0x387   :  { %v12953_v56 = vpop.f32.mrf.mxu0  ;;  %13266 = vmatpush3.bf16.msra.mxu1 %v14419_v6  ;;  %13245 = vmatprep.subr.bf16.mxu0 %v14420_v7  ;;  %v14451_v58 = vld [vmem:[#allocation6 + $0x1bb0] sm:$0xff]   ;;  %v14461_v4 = vld [vmem:[#allocation6 + $0x1b18] sm:$0xff]  }
 0x388   :  { %v14834_v62 = vadd.f32 %v12973_v55, %v9899_v51  ;;  %v12975_v1 = vpop.f32.mrf.mxu1  ;;  %13267 = vmatprep.subr.bf16.mxu1 %v14422_v9  ;;  %v324_v51 = vpack.c.bf16 %v199_v49, %v199_v49  ;;  %10496 = vmatprep.mubr.bf16.mxu1 %v325_v47  ;;  %v14448_v55 = vld [vmem:[#allocation6 + $0x1b70] sm:$0xff]   ;;  %v14463_v6 = vld [vmem:[#allocation6 + $0x1b98] sm:$0xff]   ;;  %v14484_v47 = vld [vmem:[#allocation6 + $0x1c68] sm:$0xff]  }
 0x389   :  { %v14449_v56 = vld [vmem:[#allocation6 + $0x1b30] sm:$0xff]   ;;  %v14458_v1 = vld [vmem:[#allocation6 + $0x1be0] sm:$0xff]   ;;  %v14477_v35 = vld [vmem:[#allocation6 + $0x1c38] sm:$0xff]  }
 0x38a   :  { %13246 = vmatpush3.bf16.msra.mxu0 %v14421_v8  ;;  %v14464_v7 = vld [vmem:[#allocation6 + $0x1b50] sm:$0xff]   ;;  %v14486_v49 = vld [vmem:[#allocation6 + $0x1ce8] sm:$0xff]  }
 0x38b   :  { %13268 = vmatpush3.bf16.msra.mxu1 %v14423_v10  ;;  %13247 = vmatprep.subr.bf16.mxu0 %v14424_v11  ;;  %v14465_v8 = vld [vmem:[#allocation6 + $0x1b10] sm:$0xff]   ;;  %v14468_v11 = vld [vmem:[#allocation6 + $0x1b48] sm:$0xff]  }
 0x38c   :  { %13269 = vmatprep.subr.bf16.mxu1 %v14426_v13  ;;  %v14466_v9 = vld [vmem:[#allocation6 + $0x1bd0] sm:$0xff]   ;;  %v14470_v13 = vld [vmem:[#allocation6 + $0x1bc8] sm:$0xff]  }
 0x38d   :  { %v14467_v10 = vld [vmem:[#allocation6 + $0x1b90] sm:$0xff]  }
 0x38e   :  { %13248 = vmatpush3.bf16.msra.mxu0 %v14425_v12  ;;  %v14469_v12 = vld [vmem:[#allocation6 + $0x1b08] sm:$0xff]  }
 0x38f   :  { %13270 = vmatpush3.bf16.msra.mxu1 %v14427_v14  ;;  %13249 = vmatprep.subr.bf16.mxu0 %v14428_v15  ;;  %v14471_v14 = vld [vmem:[#allocation6 + $0x1b88] sm:$0xff]  }
 0x390   :  { %13271 = vmatprep.subr.bf16.mxu1 %v14430_v17  ;;  %v14473_v17 = vld [vmem:[#allocation6 + $0x1b00] sm:$0xff]  }
 0x392   :  { %13250 = vmatpush3.bf16.msra.mxu0 %v14429_v16  ;;  %v14472_v16 = vld [vmem:[#allocation6 + $0x1b40] sm:$0xff]  }
 0x393   :  { %13272 = vmatpush3.bf16.msra.mxu1 %v14431_v18  ;;  %13251 = vmatprep.subr.bf16.mxu0 %v14432_v19  ;;  %v14474_v19 = vld [vmem:[#allocation6 + $0x1bc0] sm:$0xff]  }
 0x394   :  { %13273 = vmatprep.subr.bf16.mxu1 %v14434_v21 }
 0x396   :  { %13252 = vmatpush3.bf16.msra.mxu0 %v14433_v20 }
 0x397   :  { %13274 = vmatpush3.bf16.msra.mxu1 %v14435_v22  ;;  %13253 = vmatprep.subr.bf16.mxu0 %v14436_v23  ;;  %v202_v22 = vld [vmem:[#allocation3 + $0x368] sm:$0xff] }
 0x398   :  { %13275 = vmatprep.subr.bf16.mxu1 %v14438_v25  ;;  %v14475_v25 = vld [vmem:[#allocation6 + $0x1b80] sm:$0xff]  }
 0x39a   :  { %13254 = vmatpush3.bf16.msra.mxu0 %v14437_v24  ;;  %v327_v24 = vpack.c.bf16 %v202_v22, %v202_v22 }
 0x39b   :  { %13276 = vmatpush3.bf16.msra.mxu1 %v14439_v26  ;;  %13255 = vmatprep.subr.bf16.mxu0 %v14440_v28  ;;  %v201_v26 = vld [vmem:[#allocation3 + $0x360] sm:$0xff] }
 0x39c   :  { %13277 = vmatprep.subr.bf16.mxu1 %v14442_v32 }
 0x39e   :  { %13256 = vmatpush3.bf16.msra.mxu0 %v14441_v29  ;;  %v326_v29 = vpack.c.bf16 %v201_v26, %v201_v26 }
 0x39f   :  { %13278 = vmatpush3.bf16.msra.mxu1 %v14443_v36  ;;  %13285 = vmatprep.subr.bf16.mxu0 %v14444_v43  ;;  %v14480_v43 = vld [vmem:[#allocation6 + $0x1c70] sm:$0xff]  }
 0x3a0   :  { %13307 = vmatprep.subr.bf16.mxu1 %v14446_v52  ;;  %v14489_v52 = vld [vmem:[#allocation6 + $0x1c20] sm:$0xff]  }
 0x3a1   :  { %v12993_v27 = vpop.f32.mrf.mxu0  ;;  %10457 = vmatmul.mubr.bf16.vlgmr.msra.gmra.mxu0 %v322_v42  ;;  %v14479_v42 = vld [vmem:[#allocation6 + $0x1cb8] sm:$0xff]  }
 0x3a2   :  { %v13015_v31 = vpop.f32.mrf.mxu1  ;;  %13286 = vmatpush3.bf16.msra.mxu0 %v14445_v48  ;;  %10497 = vmatmul.mubr.bf16.vlgmr.msra.gmra.mxu1 %v324_v51  ;;  %v14485_v48 = vld [vmem:[#allocation6 + $0x1c28] sm:$0xff]   ;;  %v14488_v51 = vld [vmem:[#allocation6 + $0x1c60] sm:$0xff]  }
 0x3a3   :  { %v12994_v30 = vpop.f32.mrf.mxu0  ;;  %13308 = vmatpush3.bf16.msra.mxu1 %v14447_v54  ;;  %13287 = vmatprep.subr.bf16.mxu0 %v14448_v55  ;;  %v14491_v54 = vld [vmem:[#allocation6 + $0x1ca0] sm:$0xff]   ;;  %v14492_v55 = vld [vmem:[#allocation6 + $0x1c58] sm:$0xff]  }
 0x3a4   :  { %v12995_v34 = vadd.f32 %v12994_v30, %v12993_v27  ;;  %v13016_v38 = vpop.f32.mrf.mxu1  ;;  %13309 = vmatprep.subr.bf16.mxu1 %v14450_v57  ;;  %v14476_v30 = vld [vmem:[#allocation6 + $0x1c78] sm:$0xff]   ;;  %10536 = vmatprep.mubr.bf16.mxu0 %v327_v24 }
 0x3a5   :  { %v12996_v37 = vpop.f32.mrf.mxu0  ;;  %v13017_v41 = vadd.f32 %v13016_v38, %v13015_v31  ;;  %v204_v31 = vld [vmem:[#allocation3 + $0x378] sm:$0xff]  ;;  %v14494_v57 = vld [vmem:[#allocation6 + $0x1cd8] sm:$0xff]  }
 0x3a6   :  { %v9979_v40 = vadd.f32 %v12995_v34, %v14834_v62  ;;  %v13018_v46 = vpop.f32.mrf.mxu1  ;;  %13288 = vmatpush3.bf16.msra.mxu0 %v14449_v56  ;;  %v14455_v62 = vld [vmem:[#allocation6 + $0x1ba8] sm:$0xff]   ;;  %v329_v34 = vpack.c.bf16 %v204_v31, %v204_v31  ;;  %v14493_v56 = vld [vmem:[#allocation6 + $0x1c18] sm:$0xff]   ;;  %v14512_v31 = vld [vmem:[#allocation6 + $0x1d70] sm:$0xff]  }
 0x3a7   :  { %v12997_v45 = vpop.f32.mrf.mxu0  ;;  %13310 = vmatpush3.bf16.msra.mxu1 %v14451_v58  ;;  %13289 = vmatprep.subr.bf16.mxu0 %v14452_v59  ;;  %v203_v37 = vld [vmem:[#allocation3 + $0x370] sm:$0xff]  ;;  %v14483_v46 = vld [vmem:[#allocation6 + $0x1cb0] sm:$0xff]   ;;  %v14495_v58 = vld [vmem:[#allocation6 + $0x1c98] sm:$0xff]  }
 0x3a8   :  { %v14837_v50 = vadd.f32 %v13017_v41, %v9979_v40  ;;  %v13019_v53 = vpop.f32.mrf.mxu1  ;;  %13311 = vmatprep.subr.bf16.mxu1 %v14454_v61  ;;  %10576 = vmatprep.mubr.bf16.mxu1 %v329_v34  ;;  %v328_v39 = vpack.c.bf16 %v203_v37, %v203_v37  ;;  %v14478_v40 = vld [vmem:[#allocation6 + $0x1cf8] sm:$0xff]   ;;  %v14482_v45 = vld [vmem:[#allocation6 + $0x1cf0] sm:$0xff]   ;;  %v14518_v37 = vld [vmem:[#allocation6 + $0x1de8] sm:$0xff]  }
 0x3a9   :  { %v14490_v53 = vld [vmem:[#allocation6 + $0x1ce0] sm:$0xff]   ;;  %v14496_v59 = vld [vmem:[#allocation6 + $0x1c50] sm:$0xff]   ;;  %v14509_v24 = vld [vmem:[#allocation6 + $0x1d38] sm:$0xff]  }
 0x3aa   :  { %13290 = vmatpush3.bf16.msra.mxu0 %v14453_v60  ;;  %v14497_v60 = vld [vmem:[#allocation6 + $0x1c10] sm:$0xff]  }
 0x3ab   :  { %13312 = vmatpush3.bf16.msra.mxu1 %v14455_v62  ;;  %13291 = vmatprep.subr.bf16.mxu0 %v14456_v63  ;;  %v14498_v61 = vld [vmem:[#allocation6 + $0x1cd0] sm:$0xff]   ;;  %v14500_v63 = vld [vmem:[#allocation6 + $0x1c48] sm:$0xff]  }
 0x3ac   :  { %13313 = vmatprep.subr.bf16.mxu1 %v14458_v1  ;;  %v14499_v62 = vld [vmem:[#allocation6 + $0x1c90] sm:$0xff]   ;;  %v14502_v1 = vld [vmem:[#allocation6 + $0x1cc8] sm:$0xff]  }
 0x3ad   :  { %v14515_v34 = vld [vmem:[#allocation6 + $0x1db0] sm:$0xff]  }
 0x3ae   :  { %13292 = vmatpush3.bf16.msra.mxu0 %v14457_v0  ;;  %v14501_v0 = vld [vmem:[#allocation6 + $0x1c08] sm:$0xff]  }
 0x3af   :  { %13314 = vmatpush3.bf16.msra.mxu1 %v14459_v2  ;;  %13293 = vmatprep.subr.bf16.mxu0 %v14460_v3  ;;  %v14503_v3 = vld [vmem:[#allocation6 + $0x1c88] sm:$0xff]  }
 0x3b0   :  { %13315 = vmatprep.subr.bf16.mxu1 %v14462_v5 }
 0x3b2   :  { %13294 = vmatpush3.bf16.msra.mxu0 %v14461_v4  ;;  %v14504_v4 = vld [vmem:[#allocation6 + $0x1c40] sm:$0xff]  }
 0x3b3   :  { %13316 = vmatpush3.bf16.msra.mxu1 %v14463_v6  ;;  %13295 = vmatprep.subr.bf16.mxu0 %v14464_v7  ;;  %v14505_v6 = vld [vmem:[#allocation6 + $0x1c00] sm:$0xff]  }
 0x3b4   :  { %13317 = vmatprep.subr.bf16.mxu1 %v14466_v9  ;;  %v14506_v9 = vld [vmem:[#allocation6 + $0x1cc0] sm:$0xff]  }
 0x3b6   :  { %13296 = vmatpush3.bf16.msra.mxu0 %v14465_v8 }
 0x3b7   :  { %13318 = vmatpush3.bf16.msra.mxu1 %v14467_v10  ;;  %13297 = vmatprep.subr.bf16.mxu0 %v14468_v11  ;;  %v206_v10 = vld [vmem:[#allocation3 + $0x388] sm:$0xff] }
 0x3b8   :  { %13319 = vmatprep.subr.bf16.mxu1 %v14470_v13  ;;  %v14507_v13 = vld [vmem:[#allocation6 + $0x1c80] sm:$0xff]  }
 0x3ba   :  { %13298 = vmatpush3.bf16.msra.mxu0 %v14469_v12  ;;  %v331_v12 = vpack.c.bf16 %v206_v10, %v206_v10 }
 0x3bb   :  { %13320 = vmatpush3.bf16.msra.mxu1 %v14471_v14  ;;  %13299 = vmatprep.subr.bf16.mxu0 %v14472_v16  ;;  %v205_v14 = vld [vmem:[#allocation3 + $0x380] sm:$0xff] }
 0x3bc   :  { %13321 = vmatprep.subr.bf16.mxu1 %v14474_v19 }
 0x3be   :  { %13300 = vmatpush3.bf16.msra.mxu0 %v14473_v17  ;;  %v330_v17 = vpack.c.bf16 %v205_v14, %v205_v14 }
 0x3bf   :  { %13322 = vmatpush3.bf16.msra.mxu1 %v14475_v25  ;;  %13329 = vmatprep.subr.bf16.mxu0 %v14476_v30  ;;  %v207_v25 = vld [vmem:[#allocation3 + $0x390] sm:$0xff]  ;;  %v14511_v30 = vld [vmem:[#allocation6 + $0x1db8] sm:$0xff]  }
 0x3c0   :  { %13351 = vmatprep.subr.bf16.mxu1 %v14478_v40  ;;  %v14521_v40 = vld [vmem:[#allocation6 + $0x1d20] sm:$0xff]  }
 0x3c1   :  { %v13037_v15 = vpop.f32.mrf.mxu0  ;;  %10537 = vmatmul.mubr.bf16.vlgmr.msra.gmra.mxu0 %v326_v29 }
 0x3c2   :  { %v13059_v21 = vpop.f32.mrf.mxu1  ;;  %13330 = vmatpush3.bf16.msra.mxu0 %v14477_v35  ;;  %10577 = vmatmul.mubr.bf16.vlgmr.msra.gmra.mxu1 %v328_v39  ;;  %v14516_v35 = vld [vmem:[#allocation6 + $0x1d68] sm:$0xff]   ;;  %v14520_v39 = vld [vmem:[#allocation6 + $0x1d60] sm:$0xff]  }
 0x3c3   :  { %v13038_v18 = vpop.f32.mrf.mxu0  ;;  %13352 = vmatpush3.bf16.msra.mxu1 %v14479_v42  ;;  %13331 = vmatprep.subr.bf16.mxu0 %v14480_v43  ;;  %v14523_v42 = vld [vmem:[#allocation6 + $0x1da0] sm:$0xff]   ;;  %v14524_v43 = vld [vmem:[#allocation6 + $0x1d58] sm:$0xff]  }
 0x3c4   :  { %v13039_v20 = vadd.f32 %v13038_v18, %v13037_v15  ;;  %v13060_v28 = vpop.f32.mrf.mxu1  ;;  %13353 = vmatprep.subr.bf16.mxu1 %v14482_v45  ;;  %v14508_v18 = vld [vmem:[#allocation6 + $0x1d78] sm:$0xff]   ;;  %10616 = vmatprep.mubr.bf16.mxu0 %v331_v12 }
 0x3c5   :  { %v13040_v23 = vpop.f32.mrf.mxu0  ;;  %v13061_v32 = vadd.f32 %v13060_v28, %v13059_v21  ;;  %v208_v21 = vld [vmem:[#allocation3 + $0x398] sm:$0xff]  ;;  %v14510_v28 = vld [vmem:[#allocation6 + $0x1df8] sm:$0xff]  }
 0x3c6   :  { %v10059_v27 = vadd.f32 %v13039_v20, %v14837_v50  ;;  %v13062_v36 = vpop.f32.mrf.mxu1  ;;  %13332 = vmatpush3.bf16.msra.mxu0 %v14481_v44  ;;  %v14487_v50 = vld [vmem:[#allocation6 + $0x1ca8] sm:$0xff]   ;;  %v333_v23 = vpack.c.bf16 %v208_v21, %v208_v21  ;;  %v14525_v44 = vld [vmem:[#allocation6 + $0x1d18] sm:$0xff]   ;;  %v14546_v21 = vld [vmem:[#allocation6 + $0x1ef0] sm:$0xff]  }
 0x3c7   :  { %v13041_v33 = vpop.f32.mrf.mxu0  ;;  %13354 = vmatpush3.bf16.msra.mxu1 %v14483_v46  ;;  %13333 = vmatprep.subr.bf16.mxu0 %v14484_v47  ;;  %v14517_v36 = vld [vmem:[#allocation6 + $0x1d28] sm:$0xff]   ;;  %v14526_v45 = vld [vmem:[#allocation6 + $0x1dd8] sm:$0xff]   ;;  %v14528_v47 = vld [vmem:[#allocation6 + $0x1d50] sm:$0xff]  }
 0x3c8   :  { %v14840_v38 = vadd.f32 %v13061_v32, %v10059_v27  ;;  %v13063_v41 = vpop.f32.mrf.mxu1  ;;  %13355 = vmatprep.subr.bf16.mxu1 %v14486_v49  ;;  %v332_v27 = vpack.c.bf16 %v207_v25, %v207_v25  ;;  %10656 = vmatprep.mubr.bf16.mxu1 %v333_v23  ;;  %v14513_v32 = vld [vmem:[#allocation6 + $0x1d30] sm:$0xff]   ;;  %v14527_v46 = vld [vmem:[#allocation6 + $0x1d98] sm:$0xff]   ;;  %v14548_v23 = vld [vmem:[#allocation6 + $0x1e68] sm:$0xff]  }
 0x3c9   :  { %v14514_v33 = vld [vmem:[#allocation6 + $0x1df0] sm:$0xff]   ;;  %v14522_v41 = vld [vmem:[#allocation6 + $0x1de0] sm:$0xff]   ;;  %v14541_v12 = vld [vmem:[#allocation6 + $0x1e38] sm:$0xff]  }
 0x3ca   :  { %13334 = vmatpush3.bf16.msra.mxu0 %v14485_v48  ;;  %v14529_v48 = vld [vmem:[#allocation6 + $0x1d10] sm:$0xff]   ;;  %v14550_v25 = vld [vmem:[#allocation6 + $0x1ee8] sm:$0xff]  }
 0x3cb   :  { %13356 = vmatpush3.bf16.msra.mxu1 %v14487_v50  ;;  %13335 = vmatprep.subr.bf16.mxu0 %v14488_v51  ;;  %v14530_v49 = vld [vmem:[#allocation6 + $0x1dd0] sm:$0xff]   ;;  %v14532_v51 = vld [vmem:[#allocation6 + $0x1d48] sm:$0xff]  }
 0x3cc   :  { %13357 = vmatprep.subr.bf16.mxu1 %v14490_v53  ;;  %v14531_v50 = vld [vmem:[#allocation6 + $0x1d90] sm:$0xff]   ;;  %v14534_v53 = vld [vmem:[#allocation6 + $0x1dc8] sm:$0xff]  }
 0x3ce   :  { %13336 = vmatpush3.bf16.msra.mxu0 %v14489_v52  ;;  %v14533_v52 = vld [vmem:[#allocation6 + $0x1d08] sm:$0xff]  }
 0x3cf   :  { %13358 = vmatpush3.bf16.msra.mxu1 %v14491_v54  ;;  %13337 = vmatprep.subr.bf16.mxu0 %v14492_v55  ;;  %v14535_v54 = vld [vmem:[#allocation6 + $0x1d88] sm:$0xff]  }
 0x3d0   :  { %13359 = vmatprep.subr.bf16.mxu1 %v14494_v57  ;;  %v14537_v57 = vld [vmem:[#allocation6 + $0x1d00] sm:$0xff]  }
 0x3d2   :  { %13338 = vmatpush3.bf16.msra.mxu0 %v14493_v56  ;;  %v14536_v56 = vld [vmem:[#allocation6 + $0x1d40] sm:$0xff]  }
 0x3d3   :  { %13360 = vmatpush3.bf16.msra.mxu1 %v14495_v58  ;;  %13339 = vmatprep.subr.bf16.mxu0 %v14496_v59 }
 0x3d4   :  { %13361 = vmatprep.subr.bf16.mxu1 %v14498_v61  ;;  %v210_v61 = vld [vmem:[#allocation3 + $0x3a8] sm:$0xff] }
 0x3d6   :  { %13340 = vmatpush3.bf16.msra.mxu0 %v14497_v60  ;;  %v14538_v60 = vld [vmem:[#allocation6 + $0x1dc0] sm:$0xff]  }
 0x3d7   :  { %13362 = vmatpush3.bf16.msra.mxu1 %v14499_v62  ;;  %13341 = vmatprep.subr.bf16.mxu0 %v14500_v63  ;;  %v335_v63 = vpack.c.bf16 %v210_v61, %v210_v61  ;;  %v14572_v61 = vld [vmem:[#allocation6 + $0x1f38] sm:$0xff]  }
 0x3d8   :  { %13363 = vmatprep.subr.bf16.mxu1 %v14502_v1 }
 0x3da   :  { %13342 = vmatpush3.bf16.msra.mxu0 %v14501_v0  ;;  %v14539_v0 = vld [vmem:[#allocation6 + $0x1d80] sm:$0xff]  }
 0x3db   :  { %13364 = vmatpush3.bf16.msra.mxu1 %v14503_v3  ;;  %13343 = vmatprep.subr.bf16.mxu0 %v14504_v4  ;;  %v209_v3 = vld [vmem:[#allocation3 + $0x3a0] sm:$0xff] }
 0x3dc   :  { %13365 = vmatprep.subr.bf16.mxu1 %v14506_v9 }
 0x3de   :  { %13344 = vmatpush3.bf16.msra.mxu0 %v14505_v6  ;;  %v334_v6 = vpack.c.bf16 %v209_v3, %v209_v3 }
 0x3df   :  { %13366 = vmatpush3.bf16.msra.mxu1 %v14507_v13  ;;  %13373 = vmatprep.subr.bf16.mxu0 %v14508_v18  ;;  %v211_v13 = vld [vmem:[#allocation3 + $0x3b0] sm:$0xff]  ;;  %v14543_v18 = vld [vmem:[#allocation6 + $0x1eb8] sm:$0xff]  }
 0x3e0   :  { %13395 = vmatprep.subr.bf16.mxu1 %v14510_v28  ;;  %v14553_v28 = vld [vmem:[#allocation6 + $0x1e20] sm:$0xff]  }
 0x3e1   :  { %v13081_v2 = vpop.f32.mrf.mxu0  ;;  %10617 = vmatmul.mubr.bf16.vlgmr.msra.gmra.mxu0 %v330_v17 }
 0x3e2   :  { %v13103_v8 = vpop.f32.mrf.mxu1  ;;  %13374 = vmatpush3.bf16.msra.mxu0 %v14509_v24  ;;  %10657 = vmatmul.mubr.bf16.vlgmr.msra.gmra.mxu1 %v332_v27  ;;  %v14549_v24 = vld [vmem:[#allocation6 + $0x1e28] sm:$0xff]   ;;  %v14552_v27 = vld [vmem:[#allocation6 + $0x1e60] sm:$0xff]  }
 0x3e3   :  { %v13082_v5 = vpop.f32.mrf.mxu0  ;;  %13396 = vmatpush3.bf16.msra.mxu1 %v14511_v30  ;;  %13375 = vmatprep.subr.bf16.mxu0 %v14512_v31  ;;  %v14555_v30 = vld [vmem:[#allocation6 + $0x1ea0] sm:$0xff]   ;;  %v14556_v31 = vld [vmem:[#allocation6 + $0x1e58] sm:$0xff]  }
 0x3e4   :  { %v13083_v7 = vadd.f32 %v13082_v5, %v13081_v2  ;;  %v13104_v16 = vpop.f32.mrf.mxu1  ;;  %13397 = vmatprep.subr.bf16.mxu1 %v14514_v33  ;;  %10696 = vmatprep.mubr.bf16.mxu0 %v335_v63  ;;  %v14558_v33 = vld [vmem:[#allocation6 + $0x1ed8] sm:$0xff]  }
 0x3e5   :  { %v13084_v11 = vpop.f32.mrf.mxu0  ;;  %v13105_v19 = vadd.f32 %v13104_v16, %v13103_v8  ;;  %v212_v8 = vld [vmem:[#allocation3 + $0x3b8] sm:$0xff]  ;;  %v14542_v16 = vld [vmem:[#allocation6 + $0x1ef8] sm:$0xff]  }
 0x3e6   :  { %v10139_v15 = vadd.f32 %v13083_v7, %v14840_v38  ;;  %v13106_v22 = vpop.f32.mrf.mxu1  ;;  %13376 = vmatpush3.bf16.msra.mxu0 %v14513_v32  ;;  %v14519_v38 = vld [vmem:[#allocation6 + $0x1da8] sm:$0xff]   ;;  %v14540_v7 = vld [vmem:[#allocation6 + $0x1e78] sm:$0xff]   ;;  %v337_v11 = vpack.c.bf16 %v212_v8, %v212_v8 }
 0x3e7   :  { %v13085_v20 = vpop.f32.mrf.mxu0  ;;  %13398 = vmatpush3.bf16.msra.mxu1 %v14515_v34  ;;  %13377 = vmatprep.subr.bf16.mxu0 %v14516_v35  ;;  %v14547_v22 = vld [vmem:[#allocation6 + $0x1eb0] sm:$0xff]   ;;  %v14557_v32 = vld [vmem:[#allocation6 + $0x1e18] sm:$0xff]  }
 0x3e8   :  { %v14843_v26 = vadd.f32 %v13105_v19, %v10139_v15  ;;  %v13107_v29 = vpop.f32.mrf.mxu1  ;;  %13399 = vmatprep.subr.bf16.mxu1 %v14518_v37  ;;  %v336_v15 = vpack.c.bf16 %v211_v13, %v211_v13  ;;  %10736 = vmatprep.mubr.bf16.mxu1 %v337_v11  ;;  %v14544_v19 = vld [vmem:[#allocation6 + $0x1e70] sm:$0xff]   ;;  %v14559_v34 = vld [vmem:[#allocation6 + $0x1e98] sm:$0xff]   ;;  %v14579_v11 = vld [vmem:[#allocation6 + $0x1f00] sm:$0xff]  }
 0x3e9   :  { %v14545_v20 = vld [vmem:[#allocation6 + $0x1e30] sm:$0xff]   ;;  %v14554_v29 = vld [vmem:[#allocation6 + $0x1ee0] sm:$0xff]   ;;  %v14576_v8 = vld [vmem:[#allocation6 + $0x1f18] sm:$0xff]  }
 0x3ea   :  { %13378 = vmatpush3.bf16.msra.mxu0 %v14517_v36  ;;  %v14560_v35 = vld [vmem:[#allocation6 + $0x1e50] sm:$0xff]   ;;  %v217_v13 = vld [vmem:[#allocation3 + $0x3e0] sm:$0xff] }
 0x3eb   :  { %13400 = vmatpush3.bf16.msra.mxu1 %v14519_v38  ;;  %13379 = vmatprep.subr.bf16.mxu0 %v14520_v39  ;;  %v14561_v36 = vld [vmem:[#allocation6 + $0x1e10] sm:$0xff]   ;;  %v14564_v39 = vld [vmem:[#allocation6 + $0x1e48] sm:$0xff]  }
 0x3ec   :  { %13401 = vmatprep.subr.bf16.mxu1 %v14522_v41  ;;  %v14562_v37 = vld [vmem:[#allocation6 + $0x1ed0] sm:$0xff]   ;;  %v14566_v41 = vld [vmem:[#allocation6 + $0x1ec8] sm:$0xff]  }
 0x3ed   :  { %v14563_v38 = vld [vmem:[#allocation6 + $0x1e90] sm:$0xff]  }
 0x3ee   :  { %13380 = vmatpush3.bf16.msra.mxu0 %v14521_v40  ;;  %v14565_v40 = vld [vmem:[#allocation6 + $0x1e08] sm:$0xff]  }
 0x3ef   :  { %13402 = vmatpush3.bf16.msra.mxu1 %v14523_v42  ;;  %13381 = vmatprep.subr.bf16.mxu0 %v14524_v43  ;;  %v14567_v42 = vld [vmem:[#allocation6 + $0x1e88] sm:$0xff]  }
 0x3f0   :  { %13403 = vmatprep.subr.bf16.mxu1 %v14526_v45  ;;  %v14569_v45 = vld [vmem:[#allocation6 + $0x1e00] sm:$0xff]  }
 0x3f2   :  { %13382 = vmatpush3.bf16.msra.mxu0 %v14525_v44  ;;  %v14568_v44 = vld [vmem:[#allocation6 + $0x1e40] sm:$0xff]  }
 0x3f3   :  { %13404 = vmatpush3.bf16.msra.mxu1 %v14527_v46  ;;  %13383 = vmatprep.subr.bf16.mxu0 %v14528_v47  ;;  %v14570_v47 = vld [vmem:[#allocation6 + $0x1ec0] sm:$0xff]  }
 0x3f4   :  { %13405 = vmatprep.subr.bf16.mxu1 %v14530_v49 }
 0x3f6   :  { %13384 = vmatpush3.bf16.msra.mxu0 %v14529_v48 }
 0x3f7   :  { %13406 = vmatpush3.bf16.msra.mxu1 %v14531_v50  ;;  %13385 = vmatprep.subr.bf16.mxu0 %v14532_v51  ;;  %v214_v50 = vld [vmem:[#allocation3 + $0x3c8] sm:$0xff] }
 0x3f8   :  { %13407 = vmatprep.subr.bf16.mxu1 %v14534_v53  ;;  %v14571_v53 = vld [vmem:[#allocation6 + $0x1e80] sm:$0xff]  }
 0x3fa   :  { %13386 = vmatpush3.bf16.msra.mxu0 %v14533_v52  ;;  %v339_v52 = vpack.c.bf16 %v214_v50, %v214_v50 }
 0x3fb   :  { %13408 = vmatpush3.bf16.msra.mxu1 %v14535_v54  ;;  %13387 = vmatprep.subr.bf16.mxu0 %v14536_v56  ;;  %v213_v54 = vld [vmem:[#allocation3 + $0x3c0] sm:$0xff]  ;;  %v216_v56 = vld [vmem:[#allocation3 + $0x3d8] sm:$0xff] }
 0x3fc   :  { %13409 = vmatprep.subr.bf16.mxu1 %v14538_v60  ;;  %v341_v60 = vpack.c.bf16 %v216_v56, %v216_v56 }
 0x3fe   :  { %13388 = vmatpush3.bf16.msra.mxu0 %v14537_v57 }
 0x3ff   :  { %13410 = vmatpush3.bf16.msra.mxu1 %v14539_v0  ;;  %13417 = vmatprep.subr.bf16.mxu0 %v14540_v7  ;;  %v215_v0 = vld [vmem:[#allocation3 + $0x3d0] sm:$0xff]  ;;  %v14575_v7 = vld [vmem:[#allocation6 + $0x1f20] sm:$0xff]  }
 0x400   :  { %13439 = vmatprep.subr.bf16.mxu1 %v14542_v16 }
 0x401   :  { %v13125_v55 = vpop.f32.mrf.mxu0  ;;  %10697 = vmatmul.mubr.bf16.vlgmr.msra.gmra.mxu0 %v334_v6  ;;  %v14574_v6 = vld [vmem:[#allocation6 + $0x1f28] sm:$0xff]  }
 0x402   :  { %v13147_v59 = vpop.f32.mrf.mxu1  ;;  %13418 = vmatpush3.bf16.msra.mxu0 %v14541_v12  ;;  %10737 = vmatmul.mubr.bf16.vlgmr.msra.gmra.mxu1 %v336_v15  ;;  %v342_v15 = vpack.c.bf16 %v217_v13, %v217_v13 }
 0x403   :  { %v13126_v58 = vpop.f32.mrf.mxu0  ;;  %13440 = vmatpush3.bf16.msra.mxu1 %v14543_v18  ;;  %13419 = vmatprep.subr.bf16.mxu0 %v14544_v19 }
 0x404   :  { %v13127_v62 = vadd.f32 %v13126_v58, %v13125_v55  ;;  %v13148_v2 = vpop.f32.mrf.mxu1  ;;  %13441 = vmatprep.subr.bf16.mxu1 %v14546_v21  ;;  %v14719_v55 = vmov 0.0   ;;  %10776 = vmatprep.mubr.bf16.mxu0 %v339_v52 }
 0x405   :  { %v13128_v1 = vpop.f32.mrf.mxu0  ;;  %v13149_v5 = vadd.f32 %v13148_v2, %v13147_v59  ;;  %v338_v59 = vpack.c.bf16 %v213_v54, %v213_v54  ;;  %10816 = vmatprep.mubr.bf16.mxu1 %v341_v60  ;;  %v340_v2 = vpack.c.bf16 %v215_v0, %v215_v0  ;;  %v10882_v54 = vld [vmem:[%s14968_s3 + $0x18] sm:$0xff] }
 0x406   :  { %v10219_v4 = vadd.f32 %v13127_v62, %v14843_v26  ;;  %v13150_v10 = vpop.f32.mrf.mxu1  ;;  %13420 = vmatpush3.bf16.msra.mxu0 %v14545_v20  ;;  %v14551_v26 = vld [vmem:[#allocation6 + $0x1ea8] sm:$0xff]  }
 0x407   :  { %v13129_v9 = vpop.f32.mrf.mxu0  ;;  %13442 = vmatpush3.bf16.msra.mxu1 %v14547_v22  ;;  %13421 = vmatprep.subr.bf16.mxu0 %v14548_v23  ;;  %v14578_v10 = vld [vmem:[#allocation6 + $0x1f08] sm:$0xff]  }
 0x408   :  { %v14846_v14 = vadd.f32 %v13149_v5, %v10219_v4  ;;  %v13151_v17 = vpop.f32.mrf.mxu1  ;;  %13443 = vmatprep.subr.bf16.mxu1 %v14550_v25  ;;  %v14573_v4 = vld [vmem:[#allocation6 + $0x1f30] sm:$0xff]  }
 0x409   :  { %v14577_v9 = vld [vmem:[#allocation6 + $0x1f10] sm:$0xff]  }
 0x40a   :  { %13422 = vmatpush3.bf16.msra.mxu0 %v14549_v24 }
 0x40b   :  { %13444 = vmatpush3.bf16.msra.mxu1 %v14551_v26  ;;  %13423 = vmatprep.subr.bf16.mxu0 %v14552_v27 }
 0x40c   :  { %13445 = vmatprep.subr.bf16.mxu1 %v14554_v29 }
 0x40e   :  { %13424 = vmatpush3.bf16.msra.mxu0 %v14553_v28 }
 0x40f   :  { %13446 = vmatpush3.bf16.msra.mxu1 %v14555_v30  ;;  %13425 = vmatprep.subr.bf16.mxu0 %v14556_v31 }
 0x410   :  { %13447 = vmatprep.subr.bf16.mxu1 %v14558_v33 }
 0x412   :  { %13426 = vmatpush3.bf16.msra.mxu0 %v14557_v32 }
 0x413   :  { %13448 = vmatpush3.bf16.msra.mxu1 %v14559_v34  ;;  %13427 = vmatprep.subr.bf16.mxu0 %v14560_v35 }
 0x414   :  { %13449 = vmatprep.subr.bf16.mxu1 %v14562_v37 }
 0x416   :  { %13428 = vmatpush3.bf16.msra.mxu0 %v14561_v36 }
 0x417   :  { %13450 = vmatpush3.bf16.msra.mxu1 %v14563_v38  ;;  %13429 = vmatprep.subr.bf16.mxu0 %v14564_v39  ;;  %v10894_v38 = vld [vmem:[%s14968_s3 + $0x78] sm:$0xff]  ;;  %v10893_v39 = vld [vmem:[%s14968_s3 + $0x70] sm:$0xff] }
 0x418   :  { %13451 = vmatprep.subr.bf16.mxu1 %v14566_v41  ;;  %v10891_v41 = vld [vmem:[%s14968_s3 + $0x60] sm:$0xff] }
 0x41a   :  { %13430 = vmatpush3.bf16.msra.mxu0 %v14565_v40  ;;  %v10892_v40 = vld [vmem:[%s14968_s3 + $0x68] sm:$0xff] }
 0x41b   :  { %13452 = vmatpush3.bf16.msra.mxu1 %v14567_v42  ;;  %13431 = vmatprep.subr.bf16.mxu0 %v14568_v44  ;;  %v10890_v42 = vld [vmem:[%s14968_s3 + $0x58] sm:$0xff]  ;;  %v10888_v44 = vld [vmem:[%s14968_s3 + $0x48] sm:$0xff] }
 0x41c   :  { %13453 = vmatprep.subr.bf16.mxu1 %v14570_v47  ;;  %v10885_v47 = vld [vmem:[%s14968_s3 + $0x30] sm:$0xff] }
 0x41e   :  { %13432 = vmatpush3.bf16.msra.mxu0 %v14569_v45  ;;  %v10887_v45 = vld [vmem:[%s14968_s3 + $0x40] sm:$0xff] }
 0x41f   :  { %13496 = vmatprep.subr.bf16.mxu0 %v14719_v55  ;;  %13454 = vmatpush3.bf16.msra.mxu1 %v14571_v53 }
 0x420   :  { %13516 = vmatprep.subr.mxu1 %v14719_v55 }
 0x421   :  { %v13169_v43 = vpop.f32.mrf.mxu0  ;;  %10777 = vmatmul.mubr.bf16.vlgmr.msra.gmra.mxu0 %v338_v59  ;;  %v10881_v59 = vld [vmem:[%s14968_s3 + $0x10] sm:$0xff] }
 0x422   :  { %v13191_v49 = vpop.f32.mrf.mxu1  ;;  %13497 = vmatpush3.bf16.msra.mxu0 %v14572_v61  ;;  %13512 = vmatprep.mubr.msk.bf16.mxu0 %vm14720_vm0, %v14719_v55 }
 0x423   :  { %v13170_v46 = vpop.f32.mrf.mxu0  ;;  %10817 = vmatmul.mubr.bf16.vlgmr.msra.gmra.mxu1 %v340_v2  ;;  %13498 = vmatprep.subr.bf16.mxu0 %v14719_v55  ;;  %v10879_v2 = vld [vmem:[%s14968_s3] sm:$0xff] }
 0x424   :  { %v13171_v48 = vadd.f32 %v13170_v46, %v13169_v43  ;;  %v13192_v58 = vpop.f32.mrf.mxu1  ;;  %13548 = vmatprep.mubr.msk.f32.mxu1 %vm14720_vm0, %v14719_v55  ;;  %13517 = vmatpush3.msra.mxu1 %v10894_v38  ;;  %v10889_v43 = vld [vmem:[%s14968_s3 + $0x50] sm:$0xff]  ;;  %v10886_v46 = vld [vmem:[%s14968_s3 + $0x38] sm:$0xff] }
 0x425   :  { %v13172_v51 = vpop.f32.mrf.mxu0  ;;  %v13193_v62 = vadd.f32 %v13192_v58, %v13191_v49  ;;  %13518 = vmatprep.subr.mxu1 %v14719_v55  ;;  %v10883_v49 = vld [vmem:[%s14968_s3 + $0x20] sm:$0xff] }
 0x426   :  { %v10299_v57 = vadd.f32 %v13171_v48, %v14846_v14  ;;  %v13194_v1 = vpop.f32.mrf.mxu1  ;;  %13499 = vmatpush3.bf16.msra.mxu0 %v14573_v4  ;;  %13519 = vmatpush3.msra.mxu1 %v10893_v39  ;;  %v10884_v48 = vld [vmem:[%s14968_s3 + $0x28] sm:$0xff]  ;;  %v10979_v4 = vld [vmem:[%s14970_s5 + $0x30] sm:$0xff] }
 0x427   :  { %v13173_v63 = vpop.f32.mrf.mxu0  ;;  %13500 = vmatprep.subr.bf16.mxu0 %v14719_v55  ;;  %13520 = vmatprep.subr.mxu1 %v14719_v55 }
 0x428   :  { %v10339_v3 = vadd.f32 %v13193_v62, %v10299_v57  ;;  %v13195_v5 = vpop.f32.mrf.mxu1  ;;  %13521 = vmatpush3.msra.mxu1 %v10892_v40  ;;  %v10880_v63 = vld [vmem:[%s14968_s3 + $0x8] sm:$0xff] }
 0x429   :  { %13522 = vmatprep.subr.mxu1 %v14719_v55  ;;  %v10978_v5 = vld [vmem:[%s14970_s5 + $0x28] sm:$0xff] }
 0x42a   :  { %13501 = vmatpush3.bf16.msra.mxu0 %v14574_v6  ;;  %13523 = vmatpush3.msra.mxu1 %v10891_v41  ;;  %v10977_v6 = vld [vmem:[%s14970_s5 + $0x20] sm:$0xff] }
 0x42b   :  { %13502 = vmatprep.subr.bf16.mxu0 %v14719_v55  ;;  %13524 = vmatprep.subr.mxu1 %v14719_v55 }
 0x42c   :  { %13525 = vmatpush3.msra.mxu1 %v10890_v42 }
 0x42d   :  { %13526 = vmatprep.subr.mxu1 %v14719_v55 }
 0x42e   :  { %13503 = vmatpush3.bf16.msra.mxu0 %v14575_v7  ;;  %13527 = vmatpush3.msra.mxu1 %v10889_v43  ;;  %v10976_v7 = vld [vmem:[%s14970_s5 + $0x18] sm:$0xff] }
 0x42f   :  { %13504 = vmatprep.subr.bf16.mxu0 %v14719_v55  ;;  %13528 = vmatprep.subr.mxu1 %v14719_v55 }
 0x430   :  { %13529 = vmatpush3.msra.mxu1 %v10888_v44 }
 0x431   :  { %13530 = vmatprep.subr.mxu1 %v14719_v55 }
 0x432   :  { %13505 = vmatpush3.bf16.msra.mxu0 %v14576_v8  ;;  %13531 = vmatpush3.msra.mxu1 %v10887_v45  ;;  %v12093_v45 = vld [vmem:[#allocation8] ss:$0 sm:$0xff] }
 0x433   :  { %13506 = vmatprep.subr.bf16.mxu0 %v14719_v55  ;;  %13532 = vmatprep.subr.mxu1 %v14719_v55 }
 0x434   :  { %13533 = vmatpush3.msra.mxu1 %v10886_v46 }
 0x435   :  { %13534 = vmatprep.subr.mxu1 %v14719_v55 }
 0x436   :  { %13507 = vmatpush3.bf16.msra.mxu0 %v14577_v9  ;;  %13535 = vmatpush3.msra.mxu1 %v10885_v47 }
 0x437   :  { %13508 = vmatprep.subr.bf16.mxu0 %v14719_v55  ;;  %13536 = vmatprep.subr.mxu1 %v14719_v55 }
 0x438   :  { %13537 = vmatpush3.msra.mxu1 %v10884_v48 }
 0x439   :  { %13538 = vmatprep.subr.mxu1 %v14719_v55 }
 0x43a   :  { %13509 = vmatpush3.bf16.msra.mxu0 %v14578_v10  ;;  %13539 = vmatpush3.msra.mxu1 %v10883_v49 }
 0x43b   :  { %13510 = vmatprep.subr.bf16.mxu0 %v14719_v55  ;;  %13540 = vmatprep.subr.mxu1 %v14719_v55 }
 0x43c   :  { %13541 = vmatpush3.msra.mxu1 %v10882_v54  ;;  %v10973_v54 = vld [vmem:[%s14970_s5] sm:$0xff] }
 0x43d   :  { %13542 = vmatprep.subr.mxu1 %v14719_v55 }
 0x43e   :  { %13511 = vmatpush3.bf16.msra.mxu0 %v14579_v11  ;;  %13543 = vmatpush3.msra.mxu1 %v10881_v59 }
 0x43f   :  { %13551 = vmatprep.subr.mxu0 %v14719_v55  ;;  %13544 = vmatprep.subr.mxu1 %v14719_v55 }
 0x440   :  { %13545 = vmatpush3.msra.mxu1 %v10880_v63 }
 0x441   :  { %v13213_v12 = vpop.f32.mrf.mxu0  ;;  %13513 = vmatmul.mubr.bf16.vlgmr.msra.gmra.mxu0 %v342_v15  ;;  %13546 = vmatprep.subr.mxu1 %v14719_v55 }
 0x442   :  { %v13235_v17 = vpop.f32.mrf.mxu1  ;;  %13567 = vmatprep.mubr.msk.f32.mxu0 %vm14720_vm0, %v14719_v55  ;;  %13547 = vmatpush3.msra.mxu1 %v10879_v2 }
 0x443   :  { %v13214_v14 = vpop.f32.mrf.mxu0 }
 0x444   :  { %v13215_v16 = vadd.f32 %v13214_v14, %v13213_v12  ;;  %v13236_v20 = vpop.f32.mrf.mxu1 }
 0x445   :  { %v13216_v18 = vpop.f32.mrf.mxu0  ;;  %v13237_v21 = vadd.f32 %v13236_v20, %v13235_v17 }
 0x446   :  { %v10379_v19 = vadd.f32 %v13215_v16, %v10339_v3  ;;  %v13238_v23 = vpop.f32.mrf.mxu1  ;;  %v10980_v3 = vld [vmem:[%s14970_s5 + $0x38] sm:$0xff] }
 0x447   :  { %v13217_v22 = vpop.f32.mrf.mxu0  ;;  %13552 = vmatpush3.msra.mxu0 %v10980_v3 }
 0x448   :  { %v10419_v24 = vadd.f32 %v13237_v21, %v10379_v19  ;;  %v13239_v25 = vpop.f32.mrf.mxu1  ;;  %13553 = vmatprep.subr.mxu0 %v14719_v55 }
 0x449   :  { %13554 = vmatpush3.msra.mxu0 %v10979_v4 }
 0x44a   :  { %13555 = vmatprep.subr.mxu0 %v14719_v55 }
 0x44b   :  { %13556 = vmatpush3.msra.mxu0 %v10978_v5 }
 0x44c   :  { %13557 = vmatprep.subr.mxu0 %v14719_v55 }
 0x44d   :  { %13558 = vmatpush3.msra.mxu0 %v10977_v6 }
 0x44e   :  { %13559 = vmatprep.subr.mxu0 %v14719_v55 }
 0x44f   :  { %13560 = vmatpush3.msra.mxu0 %v10976_v7 }
 0x450   :  { %13561 = vmatprep.subr.mxu0 %v14719_v55 }
 0x461   :  { %v13257_v26 = vpop.f32.mrf.mxu0 }
 0x462   :  { %v13279_v28 = vpop.f32.mrf.mxu1 }
 0x463   :  { %v13258_v27 = vpop.f32.mrf.mxu0 }
 0x464   :  { %v13259_v29 = vadd.f32 %v13258_v27, %v13257_v26  ;;  %v13280_v31 = vpop.f32.mrf.mxu1 }
 0x465   :  { %v13260_v30 = vpop.f32.mrf.mxu0  ;;  %v13281_v33 = vadd.f32 %v13280_v31, %v13279_v28 }
 0x466   :  { %v10459_v32 = vadd.f32 %v13259_v29, %v10419_v24  ;;  %v13282_v35 = vpop.f32.mrf.mxu1 }
 0x467   :  { %v13261_v34 = vpop.f32.mrf.mxu0 }
 0x468   :  { %v10499_v36 = vadd.f32 %v13281_v33, %v10459_v32  ;;  %v13283_v37 = vpop.f32.mrf.mxu1 }
 0x481   :  { %v13301_v50 = vpop.f32.mrf.mxu0 }
 0x482   :  { %v13323_v53 = vpop.f32.mrf.mxu1 }
 0x483   :  { %v13302_v51 = vpop.f32.mrf.mxu0 }
 0x484   :  { %v13303_v52 = vadd.f32 %v13302_v51, %v13301_v50  ;;  %v13324_v58 = vpop.f32.mrf.mxu1 }
 0x485   :  { %v13304_v56 = vpop.f32.mrf.mxu0  ;;  %v13325_v60 = vadd.f32 %v13324_v58, %v13323_v53  ;;  %v10974_v53 = vld [vmem:[%s14970_s5 + $0x8] sm:$0xff] }
 0x486   :  { %v10539_v57 = vadd.f32 %v13303_v52, %v10499_v36  ;;  %v13326_v62 = vpop.f32.mrf.mxu1  ;;  %v10975_v52 = vld [vmem:[%s14970_s5 + $0x10] sm:$0xff]  ;;  %v12094_v56 = vld [vmem:[#allocation9] ss:$0 sm:$0xff]  ;;  %s14721_s5 = smov [#allocation12]  }
 0x487   :  { %v13305_v61 = vpop.f32.mrf.mxu0  ;;  %13562 = vmatpush3.msra.mxu0 %v10975_v52  ;;  %s11082_s21 = sshll.u32 %s14721_s5, 4  ;;  %s11083_s21 = int_to_ptr.vmem [resolvable:$true] %s11082_s21 }
 0x488   :  { %v10579_v0 = vadd.f32 %v13325_v60, %v10539_v57  ;;  %v13327_v1 = vpop.f32.mrf.mxu1  ;;  %13563 = vmatprep.subr.mxu0 %v14719_v55  ;;  %v12095_v61 = vld [vmem:[#allocation11] ss:$0 sm:$0xff]  ;;  %s14684_s22 = scalar_lea.vmem %s11083_s21, 128  ;;  %p14689_p12 = scmp.lt.s32.totalorder %s11083_s21, %s11083_s21 }
 0x489   :  { %13564 = vmatpush3.msra.mxu0 %v10974_v53  ;;  %p14685_p11 = scmp.ne.s32.totalorder %s11083_s21, %s14684_s22  ;;  %p14690_p13 = scmp.lt.s32.totalorder %s14684_s22, %s14684_s22 }
 0x48a   :  { %13565 = vmatprep.subr.mxu0 %v14719_v55 }
 0x48b   :  { %13566 = vmatpush3.msra.mxu0 %v10973_v54  ;;  %p14691_p0 = por %p14690_p13, %p14689_p12 }
 0x48d   :  { %p14692_p1 = pnand %p14691_p0, %p14685_p11 }
 0x4a1   :  { %v13345_v8 = vpop.f32.mrf.mxu0 }
 0x4a2   :  { %v13367_v11 = vpop.f32.mrf.mxu1 }
 0x4a3   :  { %v13346_v9 = vpop.f32.mrf.mxu0 }
 0x4a4   :  { %v13347_v10 = vadd.f32 %v13346_v9, %v13345_v8  ;;  %v13368_v14 = vpop.f32.mrf.mxu1 }
 0x4a5   :  { %v13348_v12 = vpop.f32.mrf.mxu0  ;;  %v13369_v15 = vadd.f32 %v13368_v14, %v13367_v11 }
 0x4a6   :  { %v10619_v13 = vadd.f32 %v13347_v10, %v10579_v0  ;;  %v13370_v17 = vpop.f32.mrf.mxu1 }
 0x4a7   :  { %v13349_v16 = vpop.f32.mrf.mxu0 }
 0x4a8   :  { %v10659_v18 = vadd.f32 %v13369_v15, %v10619_v13  ;;  %v13371_v19 = vpop.f32.mrf.mxu1 }
 0x4c1   :  { %v13389_v20 = vpop.f32.mrf.mxu0 }
 0x4c2   :  { %v13411_v22 = vpop.f32.mrf.mxu1 }
 0x4c3   :  { %v13390_v21 = vpop.f32.mrf.mxu0 }
 0x4c4   :  { %v13412_v24 = vpop.f32.mrf.mxu1  ;;  %v13391_v36 = vadd.f32 %v13390_v21, %v13389_v20 }
 0x4c5   :  { %v13392_v23 = vpop.f32.mrf.mxu0  ;;  %v13413_v38 = vadd.f32 %v13412_v24, %v13411_v22 }
 0x4c6   :  { %v13414_v26 = vpop.f32.mrf.mxu1  ;;  %v10699_v37 = vadd.f32 %v13391_v36, %v10659_v18 }
 0x4c7   :  { %v13393_v25 = vpop.f32.mrf.mxu0 }
 0x4c8   :  { %v13415_v27 = vpop.f32.mrf.mxu1  ;;  %v10739_v40 = vadd.f32 %v13413_v38, %v10699_v37 }
 0x4e1   :  { %v13433_v28 = vpop.f32.mrf.mxu0 }
 0x4e3   :  { %v13434_v29 = vpop.f32.mrf.mxu0  ;;  %v13455_v30 = vpop.f32.mrf.mxu1 }
 0x4e4   :  { %v13435_v39 = vadd.f32 %v13434_v29, %v13433_v28 }
 0x4e5   :  { %v13436_v31 = vpop.f32.mrf.mxu0  ;;  %v13456_v32 = vpop.f32.mrf.mxu1 }
 0x4e6   :  { %v10779_v41 = vadd.f32 %v13435_v39, %v10739_v40  ;;  %v13457_v42 = vadd.f32 %v13456_v32, %v13455_v30 }
 0x4e7   :  { %v13437_v33 = vpop.f32.mrf.mxu0  ;;  %v13458_v34 = vpop.f32.mrf.mxu1 }
 0x4e8   :  { %v10819_v43 = vadd.f32 %v13457_v42, %v10779_v41 }
 0x4e9   :  { %v13459_v35 = vpop.f32.mrf.mxu1 }
 0x501   :  { %v10858_v44 = vpop.f32.mrf.mxu0 }
 0x502   :  { %v10859_v46 = vadd.f32 %v10858_v44, %v10819_v43 }
 0x503   :  { %v13514_v47 = vpop.f32.mrf.mxu0 }
 0x504   :  { %v10877_v48 = vadd.f32 %v12093_v45, %v10859_v46 }
 0x505   :  { %v10861_v49 = vpop.f32.mrf.mxu0 }
 0x506   :  { %v10878_v50 = vmax.f32 %v10877_v48, 0.0 }
 0x507   :  { %v13515_v51 = vpop.f32.mrf.mxu0 }
 0x508   :  { %13549 = vmatmul.mubr.f32.vlgmr.msra.gmra.mxu1 %v10878_v50 }
 0x5c8   :  { %v10968_v57 = vpop.f32.mrf.mxu1 }
 0x5c9   :  { %v10969_v58 = vadd.f32 %v12094_v56, %v10968_v57 }
 0x5ca   :  { %v13550_v59 = vpop.f32.mrf.mxu1 }
 0x5cb   :  { %v10972_v60 = vmax.f32 %v10969_v58, 0.0 }
 0x5cd   :  { %13568 = vmatmul.mubr.msk.f32.vlgmr.msra.gmra.mxu0 %vm10988_vm1, %v10972_v60 }
 0x68d   :  { %v11058_v62 = vpop.f32.mrf.mxu0 }
 0x68e   :  { %v11059_v63 = vadd.f32 %v12095_v61, %v11058_v62 }
 0x68f   :  { %v13569_v0 = vpop.f32.mrf.mxu0 }
 0x690   :  { %v11063_v1 = vsel %vm11062_vm2, %v11059_v63, -inf }
 0x691   :  { %11064 = vmax.xlane.f32.xlu0 %v11063_v1 }
 0x71a   :  { %v11065_v55 = vpop.xlane.xlu0 %11064 }
 0x71b   :  { %v11066_v2 = vsub.f32 %v11059_v63, %v11065_v55 }
 0x71d   :  { %v11067_v3 = vmul.f32 1.442695, %v11066_v2 }
 0x71f   :  { %14580 = vpow2.f32 %v11067_v3 }
 0x72c   :  { %v14581_v4 = vpop.eup %14580 }
 0x72d   :  { %v11069_v5 = vsel %vm11062_vm2, %v14581_v4, 0.0 }
 0x72e   :  { %11070 = vadd.xlane.f32.xlu0 %v11069_v5 }
 0x7b7   :  { %v11071_v6 = vpop.xlane.xlu0 %11070 }
 0x7b8   :  { %14582 = vlog2.f32 %v11071_v6 }
 0x7c5   :  { %v14583_v7 = vpop.eup %14582 }
 0x7c6   :  { %v11073_v8 = vmul.f32 0.6931472, %v14583_v7 }
 0x7c8   :  { %v11074_v9 = vsub.f32 %v11066_v2, %v11073_v8 }
 0x7ca   :  { %11075 = vst.msk [vmem:[#allocation12] sm:$0xff] %vm11062_vm2, %v11074_v9 }
 0x7cb   :  { %14695 = shalt.err (!%p14692_p1)
}
 0x7cc   :  { %11085 = dma.vmem_to_hbm [thread:$0]  %s11083_s21, 128, %s14972_s7, [#allocation5]  }
 0x7cd   :  { %14710 = dma.done.wait [#allocation5], 128  }
 0x7ce   :  { %14711 = vsyncadd [#allocation5], 4294967168 }
 0x7cf   :  { %11089 = vsyncpa [#allocation4], 1 }
 0x7d0   :  { %11090 = vsyncpa [#allocation7], 1 }
 0x7d1   :  { %11091 = vsyncpa [#allocation10], 1 }
 0x7d2   :  { %11092 = vsyncpa [#allocation5], 1 }

</bundles_post_ra>
